<compile_context>
chip_gen: v6e
topology: v6e:2x2x1
jax: 0.10.0
libtpu: 0.0.40
codegen_flags: <defaults>
</compile_context>

<pallas_src>
import functools

import numpy as np
import jax
import jax.numpy as jnp
from jax.experimental import pallas as pl
from jax.experimental.pallas import tpu as pltpu

NEG_SLOPE = 0.01  # nn.LeakyReLU() default negative_slope
LANE = 128


# --------------------------------------------------------------------------
# build-time parameter prep (numpy, runs once)
# --------------------------------------------------------------------------
def build_toeplitz_cat(w, W_in):
    """(Cout, Cin, KH, KW) conv weight -> fused-K Toeplitz RHS of shape
    (KH*W_in*Cin, W_in*Cout), stored bf16.  K (row) order is (dy, w_in, cin).
    Output columns are permuted so even-w_out blocks fill the lower lane half and
    odd-w_out blocks the upper half (2x W max-pool == max of two lane halves).
    W zero-padding is folded in by omitting the out-of-range taps."""
    Cout, Cin, KH, KW = w.shape
    assert W_in % 2 == 0
    P = KW // 2
    wnp = np.asarray(w, np.float32)
    half = W_in // 2
    toep = np.zeros((KH, W_in * Cin, W_in * Cout), np.float32)
    for wo in range(W_in):
        col = wo // 2 if wo % 2 == 0 else half + wo // 2
        for dx in range(KW):
            wi = wo + dx - P
            if 0 <= wi < W_in:
                toep[:, wi * Cin:(wi + 1) * Cin, col * Cout:(col + 1) * Cout] = \
                    np.transpose(wnp[:, :, :, dx], (2, 1, 0))  # (KH, Cin, Cout)
    return jnp.asarray(toep.reshape(KH * W_in * Cin, W_in * Cout), jnp.bfloat16)


def build_dense_head(wfc, bfc, C2out, H4, W4, NC, k, t, out_pad):
    """Dense weight (bf16): input rows permuted from torch (c,h,w) flatten order to
    the kernel's (h,w,c) order, sigma output columns permuted (g,j,i) -> (j,i,g),
    columns zero-padded to out_pad for a lane-dense output.  Bias stays f32."""
    d_out, feat_in = wfc.shape
    M = NC * k
    a, s = M * t, M * t * t
    Wt = np.asarray(wfc, np.float32).T                        # (feat, d_out), rows (c,h,w)
    Wt = Wt.reshape(C2out, H4, W4, d_out).transpose(1, 2, 0, 3).reshape(feat_in, d_out)
    brow = np.asarray(bfc, np.float32).reshape(1, d_out)
    old = np.arange(s).reshape(M, t, t)                       # old[g, j, i]
    perm = old.transpose(1, 2, 0).reshape(s)                  # new order (j, i, g)
    cols = np.concatenate([np.arange(a), a + perm, np.arange(a + s, d_out)])
    w_all = np.pad(Wt[:, cols], ((0, 0), (0, out_pad - d_out)))
    b_all = np.pad(brow[:, cols], ((0, 0), (0, out_pad - d_out)))
    return jnp.asarray(w_all, jnp.bfloat16), jnp.asarray(b_all, jnp.float32)


def build_params(w1, b1, w2, b2, wfc, bfc, *, H, W, n_channels, k, t):
    C1out = w1.shape[0]
    C2out = w2.shape[0]
    W2, H4, W4 = W // 2, H // 4, W // 4
    d_out = n_channels * k * (t * t + t + 1)
    out_pad = ((d_out + LANE - 1) // LANE) * LANE
    w_head, b_head = build_dense_head(wfc, bfc, C2out, H4, W4, n_channels, k, t, out_pad)
    # bias rows are tiled per w block; tiling is invariant under the even/odd
    # output-column permutation (every w block carries the same bias vector).
    return dict(
        toep1=build_toeplitz_cat(w1, W),
        brow1=jnp.tile(jnp.asarray(b1, jnp.float32), W).reshape(1, W * C1out),
        toep2=build_toeplitz_cat(w2, W2),
        brow2=jnp.tile(jnp.asarray(b2, jnp.float32), W2).reshape(1, W2 * C2out),
        w_head=w_head, b_head=b_head,
    )


# --------------------------------------------------------------------------
# wrapper-side input slab (conv1 Toeplitz LHS)
# --------------------------------------------------------------------------
def _slab1_row_perm(B, H, Bblk):
    """Row order of the conv1 LHS: per batch group g (grid block), rows are
    (u, r, q1, b_local) -> input/conv1 row h = 4*q1 + 2*r + u of batch g*Bblk+b_local.
    u = 2x1 H-pool member, r = pooled-row parity (needed by the conv2 tap shifts)."""
    H4 = H // 4
    perm = np.empty(B * H, np.int64)
    i = 0
    for g in range(B // Bblk):
        for u in range(2):
            for r in range(2):
                for q1 in range(H4):
                    for bl in range(Bblk):
                        perm[i] = (g * Bblk + bl) * H + 4 * q1 + 2 * r + u
                        i += 1
    return perm


def _build_conv1_slab(x_nhwc, KH, Bblk):
    """(B,H,W,Cin) -> (B*H, KH*W*Cin) bf16 row-shifted slab, lane order (dy,w,cin),
    rows permuted per _slab1_row_perm.
    # TODO(synk): at production H*W this materialises KH x the input in HBM; switch
    # to per-dy accumulating matmuls from a single H-padded input to cut DMA ~5x."""
    B, H, W, Cin = x_nhwc.shape
    P = KH // 2
    x2d = x_nhwc.reshape(B, H, W * Cin)
    xpad = jnp.pad(x2d, ((0, 0), (P, P), (0, 0)))
    slab = jnp.stack([xpad[:, dy:dy + H, :] for dy in range(KH)], axis=2)
    slab = slab.reshape(B * H, KH * W * Cin)
    perm = jnp.asarray(_slab1_row_perm(B, H, Bblk), dtype=jnp.int32)
    return jnp.take(slab, perm, axis=0).astype(jnp.bfloat16)


def _choose_bblk(B, H1):
    """Batch elements per grid step.  Targets ~256 conv1 LHS rows (fills the
    256-wide MXU on v6e/v7x) subject to the output-block constraint
    (Bblk % 8 == 0 or Bblk == B), preferring >=2 grid steps so the parallel batch
    axis can be sharded over v7x's two TensorCores."""
    target = max(1, 256 // H1)
    cands = [d for d in range(1, B + 1) if B % d == 0 and (d % 8 == 0 or d == B)]
    small = [d for d in cands if d <= target]
    if not small:
        return min(cands)
    multi = [d for d in small if B // d >= 2]
    return max(multi) if multi else max(small)


def _vmem_limit_bytes():
    """Per-generation VMEM limit: leave headroom below physical VMEM
    (64 MiB/TC on v7x, 128 MiB on v5e/v6e)."""
    try:
        phys = pltpu.get_tpu_info().vmem_capacity_bytes
    except Exception:
        phys = 64 * 1024 * 1024
    return int(max(32 * 1024 * 1024,
                   min(phys - 16 * 1024 * 1024, 100 * 1024 * 1024)))


# --------------------------------------------------------------------------
# fused kernel
# --------------------------------------------------------------------------
def gfn_kernel(x_ref, t1_ref, b1_ref, t2_ref, b2_ref, wh_ref, bh_ref, o_ref,
               *, Bblk, H1, KH, WC1, WC2, NC, KMIX, T, OUT_PAD):
    """conv1+act+pool + conv2+act+pool + linear + head for Bblk batch elements.

    x_ref : (Bblk*H1, KH*W1*Cin)    bf16 conv1 Toeplitz LHS, rows (u, r, q1, b)
    t1_ref: (KH*W1*Cin, W1*C1out)   bf16 conv1 Toeplitz RHS (even/odd columns)
    b1_ref: (1, W1*C1out)           f32
    t2_ref: (KH*W2*C1out, W2*C2out) bf16 conv2 Toeplitz RHS
    b2_ref: (1, W2*C2out)           f32
    wh_ref: (H4*W4*C2out, OUT_PAD)  bf16 dense-head weight, rows (h, w, c)
    bh_ref: (1, OUT_PAD)            f32
    o_ref : (Bblk, OUT_PAD)         f32 lane-dense [mu | sigma(i,l,g) | pi | 0-pad]
    """
    P = KH // 2
    H4 = H1 // 4
    WpC = WC1 // 2                 # pooled conv1 lanes = W2*C1out
    W4C = WC2 // 2                 # pooled conv2 lanes = W4*C2out
    HALF1 = Bblk * (H1 // 2)
    HALF2 = Bblk * H4

    # ------------------ conv1: one fused-K bf16 matmul + pools -------------
    a1 = jnp.dot(x_ref[...], t1_ref[...], preferred_element_type=jnp.float32)
    a1 = a1 + b1_ref[...]
    a1 = jnp.maximum(a1, NEG_SLOPE * a1)                      # LeakyReLU
    cp1 = jnp.maximum(a1[:, :WpC], a1[:, WpC:])               # W-pool (lane halves)
    p1 = jnp.maximum(cp1[:HALF1, :], cp1[HALF1:, :])          # H-pool (row halves)
    # p1 rows: (r, q1, b) -> pooled conv1 row h' = 2*q1 + r of batch b.
    ph = (p1[:HALF2, :], p1[HALF2:, :])                       # parity halves, rows (q1, b)

    def tap(r, m):
        """Pooled-conv1 rows 2*(q+m)+r for every dest row (q, b): a whole-block
        row shift by m*Bblk with zero fill (== the conv2 H zero-padding)."""
        src = ph[r]
        if m == 0:
            return src
        z = jnp.zeros((abs(m) * Bblk, WpC), src.dtype)
        if m > 0:
            return jnp.concatenate([src[m * Bblk:, :], z], axis=0)
        return jnp.concatenate([z, src[:m * Bblk, :]], axis=0)

    # ------------- conv2: one fused-K bf16 matmul per row parity -----------
    pooled = None
    for p2 in (0, 1):                                         # conv2 output row = 2*q + p2
        strips = [tap((p2 + dy - P) % 2, (p2 + dy - P) // 2) for dy in range(KH)]
        slab2 = jnp.concatenate(strips, axis=1).astype(t2_ref.dtype)
        a2 = jnp.dot(slab2, t2_ref[...], preferred_element_type=jnp.float32)
        a2 = a2 + b2_ref[...]
        a2 = jnp.maximum(a2, NEG_SLOPE * a2)                  # LeakyReLU
        cp2 = jnp.maximum(a2[:, :W4C], a2[:, W4C:])           # W-pool
        pooled = cp2 if pooled is None else jnp.maximum(pooled, cp2)   # H-pool
    # pooled rows: (q, b) -> conv2 pooled row q of batch b, lanes (w4, c2out).

    # ------------------ dense head (Linear + mu / Sigma / pi) --------------
    z_in = jnp.concatenate([pooled[q * Bblk:(q + 1) * Bblk, :] for q in range(H4)],
                           axis=1).astype(wh_ref.dtype)       # (Bblk, H4*W4*C2out)
    z = jnp.dot(z_in, wh_ref[...], preferred_element_type=jnp.float32)
    z = z + bh_ref[...]

    M = NC * KMIX
    A = M * T
    S = M * T * T

    def blk(j, i):                                            # sigma_raw[:, j, i] over g lanes
        off = A + (j * T + i) * M
        return z[:, off:off + M]

    sig_parts = []
    for i in range(T):
        for l in range(T):
            acc = blk(0, i) * blk(0, l)
            for j in range(1, T):
                acc = acc + blk(j, i) * blk(j, l)
            sig_parts.append(0.5 * acc)                       # Sigma[g][i, l] across g lanes

    pis = []
    for c in range(NC):                                       # per-channel softmax over KMIX
        lg = z[:, A + S + c * KMIX:A + S + (c + 1) * KMIX]
        e = jnp.exp(lg - jnp.max(lg, axis=-1, keepdims=True))
        pis.append(e / jnp.sum(e, axis=-1, keepdims=True))

    pieces = [z[:, :A]] + sig_parts + pis
    pad = OUT_PAD - (A + S + M)
    if pad:
        pieces.append(jnp.zeros((Bblk, pad), jnp.float32))
    o_ref[...] = jnp.concatenate(pieces, axis=1)              # single lane-dense store


# --------------------------------------------------------------------------
# forward wrapper
# --------------------------------------------------------------------------
def feature_extractor_forward(x_nchw, params, *, n_channels, k, t):
    B, Cin, H1, W1 = x_nchw.shape
    assert H1 % 4 == 0 and W1 % 4 == 0
    toep1, brow1 = params["toep1"], params["brow1"]
    toep2, brow2 = params["toep2"], params["brow2"]
    w_head, b_head = params["w_head"], params["b_head"]

    KH = toep1.shape[0] // (W1 * Cin)
    C1out = toep1.shape[1] // W1
    W2 = W1 // 2
    C2out = toep2.shape[1] // W2
    H4, W4 = H1 // 4, W1 // 4
    WC1, WC2 = W1 * C1out, W2 * C2out
    K1, K2 = toep1.shape[0], toep2.shape[0]
    F = H4 * W4 * C2out
    OUT_PAD = w_head.shape[1]
    M = n_channels * k
    A, S = M * t, M * t * t

    Bblk = _choose_bblk(B, H1)
    grid = (B // Bblk,)

    x_nhwc = jnp.transpose(x_nchw, (0, 2, 3, 1))
    slab1 = _build_conv1_slab(x_nhwc, KH, Bblk)               # (B*H1, K1) bf16

    kernel = functools.partial(gfn_kernel, Bblk=Bblk, H1=H1, KH=KH, WC1=WC1,
                               WC2=WC2, NC=n_channels, KMIX=k, T=t,
                               OUT_PAD=OUT_PAD)
    # NOTE: at production widths toep2 grows O(W^2*C1out*C2out); before scaling W,
    # add an "arbitrary" grid axis tiling the WC2 output columns (conv1 stage under
    # pl.when(j == 0)) so resident weights stay inside VMEM (64 MiB/TC on v7x) and
    # the parallel axis always exposes >=2 steps.
    out = pl.pallas_call(
        kernel,
        out_shape=jax.ShapeDtypeStruct((B, OUT_PAD), jnp.float32),
        grid=grid,
        in_specs=[
            pl.BlockSpec((Bblk * H1, K1), lambda i: (i, 0)),
            pl.BlockSpec((K1, WC1), lambda i: (0, 0)),
            pl.BlockSpec((1, WC1), lambda i: (0, 0)),
            pl.BlockSpec((K2, WC2), lambda i: (0, 0)),
            pl.BlockSpec((1, WC2), lambda i: (0, 0)),
            pl.BlockSpec((F, OUT_PAD), lambda i: (0, 0)),
            pl.BlockSpec((1, OUT_PAD), lambda i: (0, 0)),
        ],
        out_specs=pl.BlockSpec((Bblk, OUT_PAD), lambda i: (i, 0)),
        compiler_params=pltpu.CompilerParams(
            dimension_semantics=("parallel",),                # v7x: shard over 2 TCs
            vmem_limit_bytes=_vmem_limit_bytes()),
    )(slab1, toep1, brow1, toep2, brow2, w_head, b_head)

    mu = out[:, :A].reshape(B * n_channels, k, t)
    # kernel sigma lanes are (i, l, g); torch wants (g, i, l) -> tiny XLA transpose.
    sigma = jnp.transpose(out[:, A:A + S].reshape(B, t, t, M),
                          (0, 3, 1, 2)).reshape(B * n_channels, k, t, t)
    pi = out[:, A + S:A + S + M].reshape(B * n_channels, k)
    return mu, sigma, pi


# --------------------------------------------------------------------------
if __name__ == "__main__":
    B, Cin, Hin, Win = 2, 4, 16, 16
    n_channels, k, t = 3, 4, 2

    key = jax.random.PRNGKey(0)
    ks = jax.random.split(key, 7)
    w1 = jax.random.normal(ks[0], (32, Cin, 5, 5), jnp.float32) / np.sqrt(Cin * 25)
    b1 = 0.1 * jax.random.normal(ks[1], (32,), jnp.float32)
    w2 = jax.random.normal(ks[2], (64, 32, 5, 5), jnp.float32) / np.sqrt(32 * 25)
    b2 = 0.1 * jax.random.normal(ks[3], (64,), jnp.float32)
    feat_in = 64 * (Hin // 4) * (Win // 4)                    # LazyLinear in_features
    d_out = n_channels * k * (t * t + t + 1)
    wfc = jax.random.normal(ks[4], (d_out, feat_in), jnp.float32) / np.sqrt(feat_in)
    bfc = 0.1 * jax.random.normal(ks[5], (d_out,), jnp.float32)
    x = jax.random.normal(ks[6], (B, Cin, Hin, Win), jnp.float32)

    params = build_params(w1, b1, w2, b2, wfc, bfc, H=Hin, W=Win,
                          n_channels=n_channels, k=k, t=t)

    fwd = jax.jit(functools.partial(feature_extractor_forward,
                                    n_channels=n_channels, k=k, t=t))
    mu, sigma, pi = fwd(x, params)
    jax.block_until_ready((mu, sigma, pi))

    assert mu.shape == (B * n_channels, k, t)
    assert sigma.shape == (B * n_channels, k, t, t)
    assert pi.shape == (B * n_channels, k)
    assert bool(jnp.all(jnp.isfinite(mu)))
    assert bool(jnp.all(jnp.isfinite(sigma)))
    assert bool(jnp.all(jnp.isfinite(pi)))
    print("KERNEL_OK")
</pallas_src>

<mosaic_0001>
module attributes {stable_mosaic.version = 11 : i64} {
  func.func @gfn_kernel(%arg0: i32, %arg1: memref<32x320xbf16, #tpu.memory_space<vmem>>, %arg2: memref<320x512xbf16, #tpu.memory_space<vmem>>, %arg3: memref<1x512xf32, #tpu.memory_space<vmem>>, %arg4: memref<1280x512xbf16, #tpu.memory_space<vmem>>, %arg5: memref<1x512xf32, #tpu.memory_space<vmem>>, %arg6: memref<1024x128xbf16, #tpu.memory_space<vmem>>, %arg7: memref<1x128xf32, #tpu.memory_space<vmem>>, %arg8: memref<2x128xf32, #tpu.memory_space<vmem>>) attributes {dimension_semantics = [#tpu.dimension_semantics<parallel>], iteration_bounds = array<i64: 1>, scalar_prefetch = 0 : i64, scratch_operands = 0 : i64, tpu.core_type = #tpu.core_type<tc>, window_params = [{transform_indices = @transform_0, window_bounds = array<i64: 32, 320>}, {pipeline_mode = #tpu.pipeline_mode<synchronous>, transform_indices = @transform_1, window_bounds = array<i64: 320, 512>}, {pipeline_mode = #tpu.pipeline_mode<synchronous>, transform_indices = @transform_2, window_bounds = array<i64: 1, 512>}, {pipeline_mode = #tpu.pipeline_mode<synchronous>, transform_indices = @transform_3, window_bounds = array<i64: 1280, 512>}, {pipeline_mode = #tpu.pipeline_mode<synchronous>, transform_indices = @transform_4, window_bounds = array<i64: 1, 512>}, {pipeline_mode = #tpu.pipeline_mode<synchronous>, transform_indices = @transform_5, window_bounds = array<i64: 1024, 128>}, {pipeline_mode = #tpu.pipeline_mode<synchronous>, transform_indices = @transform_6, window_bounds = array<i64: 1, 128>}, {transform_indices = @transform_7, window_bounds = array<i64: 2, 128>}]} {
    %c0 = arith.constant 0 : index
    %c0_0 = arith.constant 0 : index
    %0 = vector.load %arg1[%c0, %c0_0] : memref<32x320xbf16, #tpu.memory_space<vmem>>, vector<32x320xbf16>
    %c0_1 = arith.constant 0 : index
    %c0_2 = arith.constant 0 : index
    %1 = vector.load %arg2[%c0_1, %c0_2] : memref<320x512xbf16, #tpu.memory_space<vmem>>, vector<320x512xbf16>
    %cst = arith.constant dense<0.000000e+00> : vector<32x512xf32>
    %2 = tpu.matmul %0, %1, %cst {dimension_numbers = #tpu.dot_dimension_numbers<[1], [0], [0], [1], [0, 0, 1, 1], [], []>} : vector<32x320xbf16>, vector<320x512xbf16>, vector<32x512xf32> -> vector<32x512xf32>
    %c0_3 = arith.constant 0 : index
    %c0_4 = arith.constant 0 : index
    %3 = vector.load %arg3[%c0_3, %c0_4] : memref<1x512xf32, #tpu.memory_space<vmem>>, vector<1x512xf32>
    %4 = vector.broadcast %3 : vector<1x512xf32> to vector<32x512xf32>
    %5 = arith.addf %2, %4 : vector<32x512xf32>
    %cst_5 = arith.constant 0.00999999977 : f32
    %6 = vector.broadcast %cst_5 : f32 to vector<32x512xf32>
    %7 = arith.mulf %6, %5 : vector<32x512xf32>
    %8 = arith.maximumf %5, %7 : vector<32x512xf32>
    %9 = vector.extract_strided_slice %8 {offsets = [0, 0], sizes = [32, 256], strides = [1, 1]} : vector<32x512xf32> to vector<32x256xf32>
    %10 = vector.extract_strided_slice %8 {offsets = [0, 256], sizes = [32, 256], strides = [1, 1]} : vector<32x512xf32> to vector<32x256xf32>
    %11 = arith.maximumf %9, %10 : vector<32x256xf32>
    %12 = vector.extract_strided_slice %11 {offsets = [0, 0], sizes = [16, 256], strides = [1, 1]} : vector<32x256xf32> to vector<16x256xf32>
    %13 = vector.extract_strided_slice %11 {offsets = [16, 0], sizes = [16, 256], strides = [1, 1]} : vector<32x256xf32> to vector<16x256xf32>
    %14 = arith.maximumf %12, %13 : vector<16x256xf32>
    %15 = vector.extract_strided_slice %14 {offsets = [0, 0], sizes = [8, 256], strides = [1, 1]} : vector<16x256xf32> to vector<8x256xf32>
    %16 = vector.extract_strided_slice %14 {offsets = [8, 0], sizes = [8, 256], strides = [1, 1]} : vector<16x256xf32> to vector<8x256xf32>
    %cst_6 = arith.constant 0.000000e+00 : f32
    %17 = vector.broadcast %cst_6 : f32 to vector<2x256xf32>
    %18 = vector.extract_strided_slice %15 {offsets = [0, 0], sizes = [6, 256], strides = [1, 1]} : vector<8x256xf32> to vector<6x256xf32>
    %19 = tpu.concatenate %17, %18 in 0 : vector<2x256xf32>, vector<6x256xf32> -> vector<8x256xf32>
    %cst_7 = arith.constant 0.000000e+00 : f32
    %20 = vector.broadcast %cst_7 : f32 to vector<2x256xf32>
    %21 = vector.extract_strided_slice %16 {offsets = [0, 0], sizes = [6, 256], strides = [1, 1]} : vector<8x256xf32> to vector<6x256xf32>
    %22 = tpu.concatenate %20, %21 in 0 : vector<2x256xf32>, vector<6x256xf32> -> vector<8x256xf32>
    %cst_8 = arith.constant 0.000000e+00 : f32
    %23 = vector.broadcast %cst_8 : f32 to vector<2x256xf32>
    %24 = vector.extract_strided_slice %15 {offsets = [2, 0], sizes = [6, 256], strides = [1, 1]} : vector<8x256xf32> to vector<6x256xf32>
    %25 = tpu.concatenate %24, %23 in 0 : vector<6x256xf32>, vector<2x256xf32> -> vector<8x256xf32>
    %26 = tpu.concatenate %19, %22, %15, %16, %25 in 1 : vector<8x256xf32>, vector<8x256xf32>, vector<8x256xf32>, vector<8x256xf32>, vector<8x256xf32> -> vector<8x1280xf32>
    %27 = arith.truncf %26 : vector<8x1280xf32> to vector<8x1280xbf16>
    %c0_9 = arith.constant 0 : index
    %c0_10 = arith.constant 0 : index
    %28 = vector.load %arg4[%c0_9, %c0_10] : memref<1280x512xbf16, #tpu.memory_space<vmem>>, vector<1280x512xbf16>
    %cst_11 = arith.constant dense<0.000000e+00> : vector<8x512xf32>
    %29 = tpu.matmul %27, %28, %cst_11 {dimension_numbers = #tpu.dot_dimension_numbers<[1], [0], [0], [1], [0, 0, 1, 1], [], []>} : vector<8x1280xbf16>, vector<1280x512xbf16>, vector<8x512xf32> -> vector<8x512xf32>
    %c0_12 = arith.constant 0 : index
    %c0_13 = arith.constant 0 : index
    %30 = vector.load %arg5[%c0_12, %c0_13] : memref<1x512xf32, #tpu.memory_space<vmem>>, vector<1x512xf32>
    %31 = vector.broadcast %30 : vector<1x512xf32> to vector<8x512xf32>
    %32 = arith.addf %29, %31 : vector<8x512xf32>
    %cst_14 = arith.constant 0.00999999977 : f32
    %33 = vector.broadcast %cst_14 : f32 to vector<8x512xf32>
    %34 = arith.mulf %33, %32 : vector<8x512xf32>
    %35 = arith.maximumf %32, %34 : vector<8x512xf32>
    %36 = vector.extract_strided_slice %35 {offsets = [0, 0], sizes = [8, 256], strides = [1, 1]} : vector<8x512xf32> to vector<8x256xf32>
    %37 = vector.extract_strided_slice %35 {offsets = [0, 256], sizes = [8, 256], strides = [1, 1]} : vector<8x512xf32> to vector<8x256xf32>
    %38 = arith.maximumf %36, %37 : vector<8x256xf32>
    %cst_15 = arith.constant 0.000000e+00 : f32
    %39 = vector.broadcast %cst_15 : f32 to vector<2x256xf32>
    %40 = vector.extract_strided_slice %16 {offsets = [0, 0], sizes = [6, 256], strides = [1, 1]} : vector<8x256xf32> to vector<6x256xf32>
    %41 = tpu.concatenate %39, %40 in 0 : vector<2x256xf32>, vector<6x256xf32> -> vector<8x256xf32>
    %cst_16 = arith.constant 0.000000e+00 : f32
    %42 = vector.broadcast %cst_16 : f32 to vector<2x256xf32>
    %43 = vector.extract_strided_slice %15 {offsets = [2, 0], sizes = [6, 256], strides = [1, 1]} : vector<8x256xf32> to vector<6x256xf32>
    %44 = tpu.concatenate %43, %42 in 0 : vector<6x256xf32>, vector<2x256xf32> -> vector<8x256xf32>
    %cst_17 = arith.constant 0.000000e+00 : f32
    %45 = vector.broadcast %cst_17 : f32 to vector<2x256xf32>
    %46 = vector.extract_strided_slice %16 {offsets = [2, 0], sizes = [6, 256], strides = [1, 1]} : vector<8x256xf32> to vector<6x256xf32>
    %47 = tpu.concatenate %46, %45 in 0 : vector<6x256xf32>, vector<2x256xf32> -> vector<8x256xf32>
    %48 = tpu.concatenate %41, %15, %16, %44, %47 in 1 : vector<8x256xf32>, vector<8x256xf32>, vector<8x256xf32>, vector<8x256xf32>, vector<8x256xf32> -> vector<8x1280xf32>
    %49 = arith.truncf %48 : vector<8x1280xf32> to vector<8x1280xbf16>
    %c0_18 = arith.constant 0 : index
    %c0_19 = arith.constant 0 : index
    %50 = vector.load %arg4[%c0_18, %c0_19] : memref<1280x512xbf16, #tpu.memory_space<vmem>>, vector<1280x512xbf16>
    %cst_20 = arith.constant dense<0.000000e+00> : vector<8x512xf32>
    %51 = tpu.matmul %49, %50, %cst_20 {dimension_numbers = #tpu.dot_dimension_numbers<[1], [0], [0], [1], [0, 0, 1, 1], [], []>} : vector<8x1280xbf16>, vector<1280x512xbf16>, vector<8x512xf32> -> vector<8x512xf32>
    %c0_21 = arith.constant 0 : index
    %c0_22 = arith.constant 0 : index
    %52 = vector.load %arg5[%c0_21, %c0_22] : memref<1x512xf32, #tpu.memory_space<vmem>>, vector<1x512xf32>
    %53 = vector.broadcast %52 : vector<1x512xf32> to vector<8x512xf32>
    %54 = arith.addf %51, %53 : vector<8x512xf32>
    %cst_23 = arith.constant 0.00999999977 : f32
    %55 = vector.broadcast %cst_23 : f32 to vector<8x512xf32>
    %56 = arith.mulf %55, %54 : vector<8x512xf32>
    %57 = arith.maximumf %54, %56 : vector<8x512xf32>
    %58 = vector.extract_strided_slice %57 {offsets = [0, 0], sizes = [8, 256], strides = [1, 1]} : vector<8x512xf32> to vector<8x256xf32>
    %59 = vector.extract_strided_slice %57 {offsets = [0, 256], sizes = [8, 256], strides = [1, 1]} : vector<8x512xf32> to vector<8x256xf32>
    %60 = arith.maximumf %58, %59 : vector<8x256xf32>
    %61 = arith.maximumf %38, %60 : vector<8x256xf32>
    %62 = vector.extract_strided_slice %61 {offsets = [0, 0], sizes = [2, 256], strides = [1, 1]} : vector<8x256xf32> to vector<2x256xf32>
    %63 = vector.extract_strided_slice %61 {offsets = [2, 0], sizes = [2, 256], strides = [1, 1]} : vector<8x256xf32> to vector<2x256xf32>
    %64 = vector.extract_strided_slice %61 {offsets = [4, 0], sizes = [2, 256], strides = [1, 1]} : vector<8x256xf32> to vector<2x256xf32>
    %65 = vector.extract_strided_slice %61 {offsets = [6, 0], sizes = [2, 256], strides = [1, 1]} : vector<8x256xf32> to vector<2x256xf32>
    %66 = tpu.concatenate %62, %63, %64, %65 in 1 : vector<2x256xf32>, vector<2x256xf32>, vector<2x256xf32>, vector<2x256xf32> -> vector<2x1024xf32>
    %67 = arith.truncf %66 : vector<2x1024xf32> to vector<2x1024xbf16>
    %c0_24 = arith.constant 0 : index
    %c0_25 = arith.constant 0 : index
    %68 = vector.load %arg6[%c0_24, %c0_25] : memref<1024x128xbf16, #tpu.memory_space<vmem>>, vector<1024x128xbf16>
    %cst_26 = arith.constant dense<0.000000e+00> : vector<2x128xf32>
    %69 = tpu.matmul %67, %68, %cst_26 {dimension_numbers = #tpu.dot_dimension_numbers<[1], [0], [0], [1], [0, 0, 1, 1], [], []>} : vector<2x1024xbf16>, vector<1024x128xbf16>, vector<2x128xf32> -> vector<2x128xf32>
    %c0_27 = arith.constant 0 : index
    %c0_28 = arith.constant 0 : index
    %70 = vector.load %arg7[%c0_27, %c0_28] : memref<1x128xf32, #tpu.memory_space<vmem>>, vector<1x128xf32>
    %71 = vector.broadcast %70 : vector<1x128xf32> to vector<2x128xf32>
    %72 = arith.addf %69, %71 : vector<2x128xf32>
    %73 = vector.extract_strided_slice %72 {offsets = [0, 24], sizes = [2, 12], strides = [1, 1]} : vector<2x128xf32> to vector<2x12xf32>
    %74 = vector.extract_strided_slice %72 {offsets = [0, 24], sizes = [2, 12], strides = [1, 1]} : vector<2x128xf32> to vector<2x12xf32>
    %75 = arith.mulf %73, %74 : vector<2x12xf32>
    %76 = vector.extract_strided_slice %72 {offsets = [0, 48], sizes = [2, 12], strides = [1, 1]} : vector<2x128xf32> to vector<2x12xf32>
    %77 = vector.extract_strided_slice %72 {offsets = [0, 48], sizes = [2, 12], strides = [1, 1]} : vector<2x128xf32> to vector<2x12xf32>
    %78 = arith.mulf %76, %77 : vector<2x12xf32>
    %79 = arith.addf %75, %78 : vector<2x12xf32>
    %cst_29 = arith.constant 5.000000e-01 : f32
    %80 = vector.broadcast %cst_29 : f32 to vector<2x12xf32>
    %81 = arith.mulf %80, %79 : vector<2x12xf32>
    %82 = vector.extract_strided_slice %72 {offsets = [0, 24], sizes = [2, 12], strides = [1, 1]} : vector<2x128xf32> to vector<2x12xf32>
    %83 = vector.extract_strided_slice %72 {offsets = [0, 36], sizes = [2, 12], strides = [1, 1]} : vector<2x128xf32> to vector<2x12xf32>
    %84 = arith.mulf %82, %83 : vector<2x12xf32>
    %85 = vector.extract_strided_slice %72 {offsets = [0, 48], sizes = [2, 12], strides = [1, 1]} : vector<2x128xf32> to vector<2x12xf32>
    %86 = vector.extract_strided_slice %72 {offsets = [0, 60], sizes = [2, 12], strides = [1, 1]} : vector<2x128xf32> to vector<2x12xf32>
    %87 = arith.mulf %85, %86 : vector<2x12xf32>
    %88 = arith.addf %84, %87 : vector<2x12xf32>
    %cst_30 = arith.constant 5.000000e-01 : f32
    %89 = vector.broadcast %cst_30 : f32 to vector<2x12xf32>
    %90 = arith.mulf %89, %88 : vector<2x12xf32>
    %91 = vector.extract_strided_slice %72 {offsets = [0, 36], sizes = [2, 12], strides = [1, 1]} : vector<2x128xf32> to vector<2x12xf32>
    %92 = vector.extract_strided_slice %72 {offsets = [0, 24], sizes = [2, 12], strides = [1, 1]} : vector<2x128xf32> to vector<2x12xf32>
    %93 = arith.mulf %91, %92 : vector<2x12xf32>
    %94 = vector.extract_strided_slice %72 {offsets = [0, 60], sizes = [2, 12], strides = [1, 1]} : vector<2x128xf32> to vector<2x12xf32>
    %95 = vector.extract_strided_slice %72 {offsets = [0, 48], sizes = [2, 12], strides = [1, 1]} : vector<2x128xf32> to vector<2x12xf32>
    %96 = arith.mulf %94, %95 : vector<2x12xf32>
    %97 = arith.addf %93, %96 : vector<2x12xf32>
    %cst_31 = arith.constant 5.000000e-01 : f32
    %98 = vector.broadcast %cst_31 : f32 to vector<2x12xf32>
    %99 = arith.mulf %98, %97 : vector<2x12xf32>
    %100 = vector.extract_strided_slice %72 {offsets = [0, 36], sizes = [2, 12], strides = [1, 1]} : vector<2x128xf32> to vector<2x12xf32>
    %101 = vector.extract_strided_slice %72 {offsets = [0, 36], sizes = [2, 12], strides = [1, 1]} : vector<2x128xf32> to vector<2x12xf32>
    %102 = arith.mulf %100, %101 : vector<2x12xf32>
    %103 = vector.extract_strided_slice %72 {offsets = [0, 60], sizes = [2, 12], strides = [1, 1]} : vector<2x128xf32> to vector<2x12xf32>
    %104 = vector.extract_strided_slice %72 {offsets = [0, 60], sizes = [2, 12], strides = [1, 1]} : vector<2x128xf32> to vector<2x12xf32>
    %105 = arith.mulf %103, %104 : vector<2x12xf32>
    %106 = arith.addf %102, %105 : vector<2x12xf32>
    %cst_32 = arith.constant 5.000000e-01 : f32
    %107 = vector.broadcast %cst_32 : f32 to vector<2x12xf32>
    %108 = arith.mulf %107, %106 : vector<2x12xf32>
    %109 = vector.extract_strided_slice %72 {offsets = [0, 72], sizes = [2, 4], strides = [1, 1]} : vector<2x128xf32> to vector<2x4xf32>
    %cst_33 = arith.constant dense<0xFF800000> : vector<2xf32>
    %110 = vector.multi_reduction <maximumf>, %109, %cst_33 [1] : vector<2x4xf32> to vector<2xf32>
    %111 = vector.shape_cast %110 : vector<2xf32> to vector<2x1xf32>
    %112 = vector.broadcast %111 : vector<2x1xf32> to vector<2x4xf32>
    %113 = arith.subf %109, %112 : vector<2x4xf32>
    %114 = math.exp %113 : vector<2x4xf32>
    %cst_34 = arith.constant dense<0.000000e+00> : vector<2xf32>
    %115 = vector.multi_reduction <add>, %114, %cst_34 [1] : vector<2x4xf32> to vector<2xf32>
    %116 = vector.shape_cast %115 : vector<2xf32> to vector<2x1xf32>
    %117 = vector.broadcast %116 : vector<2x1xf32> to vector<2x4xf32>
    %118 = arith.divf %114, %117 : vector<2x4xf32>
    %119 = vector.extract_strided_slice %72 {offsets = [0, 76], sizes = [2, 4], strides = [1, 1]} : vector<2x128xf32> to vector<2x4xf32>
    %cst_35 = arith.constant dense<0xFF800000> : vector<2xf32>
    %120 = vector.multi_reduction <maximumf>, %119, %cst_35 [1] : vector<2x4xf32> to vector<2xf32>
    %121 = vector.shape_cast %120 : vector<2xf32> to vector<2x1xf32>
    %122 = vector.broadcast %121 : vector<2x1xf32> to vector<2x4xf32>
    %123 = arith.subf %119, %122 : vector<2x4xf32>
    %124 = math.exp %123 : vector<2x4xf32>
    %cst_36 = arith.constant dense<0.000000e+00> : vector<2xf32>
    %125 = vector.multi_reduction <add>, %124, %cst_36 [1] : vector<2x4xf32> to vector<2xf32>
    %126 = vector.shape_cast %125 : vector<2xf32> to vector<2x1xf32>
    %127 = vector.broadcast %126 : vector<2x1xf32> to vector<2x4xf32>
    %128 = arith.divf %124, %127 : vector<2x4xf32>
    %129 = vector.extract_strided_slice %72 {offsets = [0, 80], sizes = [2, 4], strides = [1, 1]} : vector<2x128xf32> to vector<2x4xf32>
    %cst_37 = arith.constant dense<0xFF800000> : vector<2xf32>
    %130 = vector.multi_reduction <maximumf>, %129, %cst_37 [1] : vector<2x4xf32> to vector<2xf32>
    %131 = vector.shape_cast %130 : vector<2xf32> to vector<2x1xf32>
    %132 = vector.broadcast %131 : vector<2x1xf32> to vector<2x4xf32>
    %133 = arith.subf %129, %132 : vector<2x4xf32>
    %134 = math.exp %133 : vector<2x4xf32>
    %cst_38 = arith.constant dense<0.000000e+00> : vector<2xf32>
    %135 = vector.multi_reduction <add>, %134, %cst_38 [1] : vector<2x4xf32> to vector<2xf32>
    %136 = vector.shape_cast %135 : vector<2xf32> to vector<2x1xf32>
    %137 = vector.broadcast %136 : vector<2x1xf32> to vector<2x4xf32>
    %138 = arith.divf %134, %137 : vector<2x4xf32>
    %139 = vector.extract_strided_slice %72 {offsets = [0, 0], sizes = [2, 24], strides = [1, 1]} : vector<2x128xf32> to vector<2x24xf32>
    %cst_39 = arith.constant 0.000000e+00 : f32
    %140 = vector.broadcast %cst_39 : f32 to vector<2x44xf32>
    %141 = tpu.concatenate %139, %81, %90, %99, %108, %118, %128, %138, %140 in 1 : vector<2x24xf32>, vector<2x12xf32>, vector<2x12xf32>, vector<2x12xf32>, vector<2x12xf32>, vector<2x4xf32>, vector<2x4xf32>, vector<2x4xf32>, vector<2x44xf32> -> vector<2x128xf32>
    %c0_40 = arith.constant 0 : index
    %c0_41 = arith.constant 0 : index
    %142 = vector.load %arg8[%c0_40, %c0_41] : memref<2x128xf32, #tpu.memory_space<vmem>>, vector<2x128xf32>
    tpu.vector_store %arg8[%c0_40, %c0_41], %141 {strides = array<i32>} : memref<2x128xf32, #tpu.memory_space<vmem>>, vector<2x128xf32>,
    return
  }
  func.func @transform_0(%arg0: i32) -> (i32, i32) {
    %c0_i32 = arith.constant 0 : i32
    %c0_i32_0 = arith.constant 0 : i32
    return %arg0, %c0_i32 : i32, i32
  }
  func.func @transform_1(%arg0: i32) -> (i32, i32) {
    %c0_i32 = arith.constant 0 : i32
    %c0_i32_0 = arith.constant 0 : i32
    %c0_i32_1 = arith.constant 0 : i32
    return %c0_i32, %c0_i32_0 : i32, i32
  }
  func.func @transform_2(%arg0: i32) -> (i32, i32) {
    %c0_i32 = arith.constant 0 : i32
    %c0_i32_0 = arith.constant 0 : i32
    %c0_i32_1 = arith.constant 0 : i32
    return %c0_i32, %c0_i32_0 : i32, i32
  }
  func.func @transform_3(%arg0: i32) -> (i32, i32) {
    %c0_i32 = arith.constant 0 : i32
    %c0_i32_0 = arith.constant 0 : i32
    %c0_i32_1 = arith.constant 0 : i32
    return %c0_i32, %c0_i32_0 : i32, i32
  }
  func.func @transform_4(%arg0: i32) -> (i32, i32) {
    %c0_i32 = arith.constant 0 : i32
    %c0_i32_0 = arith.constant 0 : i32
    %c0_i32_1 = arith.constant 0 : i32
    return %c0_i32, %c0_i32_0 : i32, i32
  }
  func.func @transform_5(%arg0: i32) -> (i32, i32) {
    %c0_i32 = arith.constant 0 : i32
    %c0_i32_0 = arith.constant 0 : i32
    %c0_i32_1 = arith.constant 0 : i32
    return %c0_i32, %c0_i32_0 : i32, i32
  }
  func.func @transform_6(%arg0: i32) -> (i32, i32) {
    %c0_i32 = arith.constant 0 : i32
    %c0_i32_0 = arith.constant 0 : i32
    %c0_i32_1 = arith.constant 0 : i32
    return %c0_i32, %c0_i32_0 : i32, i32
  }
  func.func @transform_7(%arg0: i32) -> (i32, i32) {
    %c0_i32 = arith.constant 0 : i32
    %c0_i32_0 = arith.constant 0 : i32
    return %arg0, %c0_i32 : i32, i32
  }
}

</mosaic_0001>

<bundles_post_ra>
// kernel: feature_extractor_forward.1
= control target key start
LH: loop header
LB: loop body
LE: loop exit
PB: predicated region body
PF: predicated region fallthrough
CT: control target
= control target key end

     0   :  { %12 = vsyncpa [#allocation3], 0  ;;  %s7001_s0 = inlined_call_operand.vmem [shape: bf16[32,320], index: 0, kind: input, shape index: {}]   ;;  %s7002_s1 = inlined_call_operand.hbm [shape: bf16[320,512], index: 1, kind: input, shape index: {}]   ;;  %s7003_s2 = inlined_call_operand.hbm [shape: f32[1,512], index: 2, kind: input, shape index: {}]   ;;  %s7004_s3 = inlined_call_operand.hbm [shape: bf16[1280,512], index: 3, kind: input, shape index: {}]   ;;  %s7005_s4 = inlined_call_operand.hbm [shape: f32[1,512], index: 4, kind: input, shape index: {}]   ;;  %s7006_s5 = inlined_call_operand.hbm [shape: bf16[1024,128], index: 5, kind: input, shape index: {}]   ;;  %s7007_s6 = inlined_call_operand.hbm [shape: f32[1,128], index: 6, kind: input, shape index: {}]   ;;  %s7008_s7 = inlined_call_operand.vmem [shape: f32[2,128], index: 7, kind: output, shape index: {}]  }
   0x1   :  { %13 = vsyncpa [#allocation5], 0 }
   0x2   :  { %14 = vsyncpa [#allocation8], 0 }
   0x3   :  { %15 = vsyncpa [#allocation11], 0  ;;  %s6255_s24 = smov [#allocation4]   ;;  %s6256_s26 = smov [#allocation7]  }
   0x4   :  { %s36_s25 = sshll.u32 %s6255_s24, 4  ;;  %s58_s27 = sshll.u32 %s6256_s26, 4  ;;  %s37_s25 = int_to_ptr.vmem [resolvable:$true] %s36_s25  ;;  %s59_s27 = int_to_ptr.vmem [resolvable:$true] %s58_s27 }
   0x5   :  { %s6135_s28 = scalar_lea.vmem %s37_s25, 64  ;;  %p6140_p1 = scmp.lt.s32.totalorder %s37_s25, %s37_s25 }
   0x6   :  { %p6136_p0 = scmp.ne.s32.totalorder %s37_s25, %s6135_s28  ;;  %p6141_p2 = scmp.lt.s32.totalorder %s6135_s28, %s6135_s28 }
   0x8   :  { %p6142_p3 = por %p6141_p2, %p6140_p1 }
   0xa   :  { %p6143_p4 = pnand %p6142_p3, %p6136_p0 }
   0xc   :  { %6146 = shalt.err (!%p6143_p4)
}
   0xd   :  { %39 = dma.hbm_to_vmem [thread:$0]  %s7003_s2, 64, %s37_s25, [#allocation5]  }
   0xe   :  { %s6155_s8 = scalar_lea.vmem %s59_s27, 64  ;;  %p6160_p6 = scmp.lt.s32.totalorder %s59_s27, %s59_s27 }
   0xf   :  { %p6156_p5 = scmp.ne.s32.totalorder %s59_s27, %s6155_s8  ;;  %p6161_p7 = scmp.lt.s32.totalorder %s6155_s8, %s6155_s8 }
  0x11   :  { %p6162_p8 = por %p6161_p7, %p6160_p6 }
  0x13   :  { %p6163_p9 = pnand %p6162_p8, %p6156_p5 }
  0x15   :  { %6166 = shalt.err (!%p6163_p9)
}
  0x16   :  { %61 = dma.hbm_to_vmem [thread:$0]  %s7005_s4, 64, %s59_s27, [#allocation8]  }
  0x17   :  { %s6257_s11 = smov [#allocation2]  }
  0x18   :  { %s23_s12 = sshll.u32 %s6257_s11, 4  ;;  %s24_s12 = int_to_ptr.vmem [resolvable:$true] %s23_s12 }
  0x19   :  { %s6175_s13 = scalar_lea.vmem %s24_s12, 10240  ;;  %p6180_p11 = scmp.lt.s32.totalorder %s24_s12, %s24_s12 }
  0x1a   :  { %p6176_p10 = scmp.ne.s32.totalorder %s24_s12, %s6175_s13  ;;  %p6181_p12 = scmp.lt.s32.totalorder %s6175_s13, %s6175_s13 }
  0x1c   :  { %p6182_p13 = por %p6181_p12, %p6180_p11 }
  0x1e   :  { %p6183_p0 = pnand %p6182_p13, %p6176_p10 }
  0x20   :  { %6186 = shalt.err (!%p6183_p0)
}
  0x21   :  { %s6258_s2 = smov 256   ;;  %s6259_s14 = smov 16  }
  0x22   :  { %29 = dma.hbm_to_vmem [thread:$0]  %s7002_s1, 10240, %s24_s12, [#allocation3], %s6258_s2, %s6258_s2, %s6259_s14  }
  0x23   :  { %s6260_s17 = smov [#allocation6]   ;;  %s6261_s4 = smov [#allocation9]  }
  0x24   :  { %s45_s18 = sshll.u32 %s6260_s17, 4  ;;  %s67_s19 = sshll.u32 %s6261_s4, 4  ;;  %s46_s18 = int_to_ptr.vmem [resolvable:$true] %s45_s18  ;;  %s68_s19 = int_to_ptr.vmem [resolvable:$true] %s67_s19 }
  0x25   :  { %s6195_s20 = scalar_lea.vmem %s46_s18, 40960  ;;  %p6200_p2 = scmp.lt.s32.totalorder %s46_s18, %s46_s18 }
  0x26   :  { %p6196_p1 = scmp.ne.s32.totalorder %s46_s18, %s6195_s20  ;;  %p6201_p3 = scmp.lt.s32.totalorder %s6195_s20, %s6195_s20 }
  0x28   :  { %p6202_p4 = por %p6201_p3, %p6200_p2 }
  0x2a   :  { %p6203_p5 = pnand %p6202_p4, %p6196_p1 }
  0x2c   :  { %6206 = shalt.err (!%p6203_p5)
}
  0x2d   :  { %51 = dma.hbm_to_vmem [thread:$0]  %s7004_s3, 40960, %s46_s18, [#allocation5], %s6258_s2, %s6258_s2, %s6259_s14  }
  0x2e   :  { %s6215_s23 = scalar_lea.vmem %s68_s19, 8192  ;;  %p6220_p7 = scmp.lt.s32.totalorder %s68_s19, %s68_s19 }
  0x2f   :  { %p6216_p6 = scmp.ne.s32.totalorder %s68_s19, %s6215_s23  ;;  %p6221_p8 = scmp.lt.s32.totalorder %s6215_s23, %s6215_s23 }
  0x31   :  { %p6222_p9 = por %p6221_p8, %p6220_p7 }
  0x33   :  { %p6223_p10 = pnand %p6222_p9, %p6216_p6 }
  0x35   :  { %6226 = shalt.err (!%p6223_p10)
}
  0x36   :  { %s6262_s1 = smov 64   ;;  %s6263_s24 = smov 4  }
  0x37   :  { %73 = dma.hbm_to_vmem [thread:$0]  %s7006_s5, 8192, %s68_s19, [#allocation8], %s6262_s1, %s6262_s1, %s6263_s24  }
  0x38   :  { %s6264_s27 = smov [#allocation10]  }
  0x39   :  { %s80_s28 = sshll.u32 %s6264_s27, 4  ;;  %s81_s28 = int_to_ptr.vmem [resolvable:$true] %s80_s28 }
  0x3a   :  { %s6235_s29 = scalar_lea.vmem %s81_s28, 16  ;;  %s6239_s3 = scalar_lea.vmem %s81_s28, 32 }
  0x3b   :  { %p6236_p11 = scmp.ne.s32.totalorder %s81_s28, %s6235_s29  ;;  %p6240_p12 = scmp.lt.s32.totalorder %s81_s28, %s81_s28 }
  0x3c   :  { %p6241_p13 = scmp.lt.s32.totalorder %s6239_s3, %s6235_s29 }
  0x3e   :  { %p6242_p0 = por %p6241_p13, %p6240_p12 }
  0x40   :  { %p6243_p1 = pnand %p6242_p0, %p6236_p11 }
  0x42   :  { %6246 = shalt.err (!%p6243_p1)
}
  0x43   :  { %83 = dma.hbm_to_vmem [thread:$0]  %s7007_s6, 16, %s81_s28, [#allocation11]  }
  0x44   :  { %6247 = dma.done.wait [#allocation3], 10240  }
  0x45   :  { %6248 = vsyncadd [#allocation3], 4294957056 }
  0x46   :  { %6249 = dma.done.wait [#allocation5], 41024  }
  0x47   :  { %6250 = vsyncadd [#allocation5], 4294926272 }
  0x48   :  { %6251 = dma.done.wait [#allocation8], 8256  }
  0x49   :  { %6252 = vsyncadd [#allocation8], 4294959040 }
  0x4a   :  { %6253 = dma.done.wait [#allocation11], 16  }
  0x4b   :  { %6254 = vsyncadd [#allocation11], 4294967280  ;;  %v6265_v0 = vmov 0   ;;  %v5213_v1 = vld [vmem:[#allocation2 + $0xe4] ss:$16 sps:$4 sm:$0xff]   ;;  %vm643_vm0 = vcmask 523264  }
  0x4c   :  { %735 = vmatprep.mubr.bf16.mxu1 %v6265_v0  ;;  %v5215_v2 = vld [vmem:[#allocation2 + $0x264] ss:$16 sps:$4 sm:$0xff]   ;;  %650 = vmatprep.subr.bf16.mxu0 %v5213_v1  ;;  %v5217_v3 = vld [vmem:[#allocation2 + $0xe0] ss:$16 sps:$4 sm:$0xff]   ;;  %v5242_v18 = vld [vmem:[#allocation2 + $0xec] ss:$16 sps:$4 sm:$0xff]  }
  0x4d   :  { %v5218_v4 = vld [vmem:[#allocation2 + $0x260] ss:$16 sps:$4 sm:$0xff]   ;;  %711 = vmatprep.subr.bf16.mxu1 %v5215_v2  ;;  %v5219_v5 = vld [vmem:[#allocation2 + $0xc4] ss:$16 sps:$4 sm:$0xff]   ;;  %651 = vmatpush1.bf16.msra.mxu0 %v5217_v3  ;;  %v5240_v20 = vld [vmem:[#allocation2 + $0xe8] ss:$16 sps:$4 sm:$0xff]  }
  0x4e   :  { %712 = vmatpush1.bf16.msra.mxu1 %v5218_v4  ;;  %v5221_v6 = vld [vmem:[#allocation2 + $0x244] ss:$16 sps:$4 sm:$0xff]   ;;  %v5223_v7 = vld [vmem:[#allocation2 + $0xc0] ss:$16 sps:$4 sm:$0xff]   ;;  %652 = vmatprep.subr.bf16.mxu0 %v5219_v5  ;;  %v5248_v23 = vld [vmem:[#allocation2 + $0xcc] ss:$16 sps:$4 sm:$0xff]  }
  0x4f   :  { %v5224_v8 = vld [vmem:[#allocation2 + $0x240] ss:$16 sps:$4 sm:$0xff]   ;;  %713 = vmatprep.subr.bf16.mxu1 %v5221_v6  ;;  %v5225_v9 = vld [vmem:[#allocation2 + $0xa4] ss:$16 sps:$4 sm:$0xff]   ;;  %v5246_v24 = vld [vmem:[#allocation2 + $0xc8] ss:$16 sps:$4 sm:$0xff]  }
  0x50   :  { %v5227_v10 = vld [vmem:[#allocation2 + $0x224] ss:$16 sps:$4 sm:$0xff]   ;;  %v5229_v11 = vld [vmem:[#allocation2 + $0xa0] ss:$16 sps:$4 sm:$0xff]   ;;  %v5254_v27 = vld [vmem:[#allocation2 + $0xac] ss:$16 sps:$4 sm:$0xff]  }
  0x51   :  { %v5230_v12 = vld [vmem:[#allocation2 + $0x220] ss:$16 sps:$4 sm:$0xff]   ;;  %653 = vmatpush1.bf16.msra.mxu0 %v5223_v7  ;;  %v5231_v13 = vld [vmem:[#allocation2 + $0x84] ss:$16 sps:$4 sm:$0xff]   ;;  %v5252_v28 = vld [vmem:[#allocation2 + $0xa8] ss:$16 sps:$4 sm:$0xff]  }
  0x52   :  { %714 = vmatpush1.bf16.msra.mxu1 %v5224_v8  ;;  %654 = vmatprep.subr.bf16.mxu0 %v5225_v9  ;;  %v5233_v14 = vld [vmem:[#allocation2 + $0x204] ss:$16 sps:$4 sm:$0xff]   ;;  %v5235_v15 = vld [vmem:[#allocation2 + $0x80] ss:$16 sps:$4 sm:$0xff]   ;;  %v5260_v31 = vld [vmem:[#allocation2 + $0x8c] ss:$16 sps:$4 sm:$0xff]  }
  0x53   :  { %715 = vmatprep.subr.bf16.mxu1 %v5227_v10  ;;  %v5236_v16 = vld [vmem:[#allocation2 + $0x200] ss:$16 sps:$4 sm:$0xff]   ;;  %v5237_v17 = vld [vmem:[#allocation2 + $0x64] ss:$16 sps:$4 sm:$0xff]   ;;  %v5258_v32 = vld [vmem:[#allocation2 + $0x88] ss:$16 sps:$4 sm:$0xff]  }
  0x54   :  { %v6335_v19 = vld [vmem:[%s7001_s0 + $0x8] ss:$12 sps:$4 sm:$0xff]   ;;  %v5243_v21 = vld [vmem:[#allocation2 + $0x60] ss:$16 sps:$4 sm:$0xff]   ;;  %v5266_v35 = vld [vmem:[#allocation2 + $0x6c] ss:$16 sps:$4 sm:$0xff]  }
  0x55   :  { %655 = vmatpush1.bf16.msra.mxu0 %v5229_v11  ;;  %v5244_v22 = vld [vmem:[#allocation2 + $0x44] ss:$16 sps:$4 sm:$0xff]   ;;  %v5249_v25 = vld [vmem:[#allocation2 + $0x40] ss:$16 sps:$4 sm:$0xff]   ;;  %v5264_v36 = vld [vmem:[#allocation2 + $0x68] ss:$16 sps:$4 sm:$0xff]  }
  0x56   :  { %716 = vmatpush1.bf16.msra.mxu1 %v5230_v12  ;;  %656 = vmatprep.subr.bf16.mxu0 %v5231_v13  ;;  %v5250_v26 = vld [vmem:[#allocation2 + $0x24] ss:$16 sps:$4 sm:$0xff]   ;;  %v5255_v29 = vld [vmem:[#allocation2 + $0x20] ss:$16 sps:$4 sm:$0xff]   ;;  %v5272_v39 = vld [vmem:[#allocation2 + $0x4c] ss:$16 sps:$4 sm:$0xff]  }
  0x57   :  { %717 = vmatprep.subr.bf16.mxu1 %v5233_v14  ;;  %v5256_v30 = vld [vmem:[#allocation2 + $0x4] ss:$16 sps:$4 sm:$0xff]   ;;  %v5261_v33 = vld [vmem:[#allocation2] ss:$16 sps:$4 sm:$0xff]   ;;  %v5270_v40 = vld [vmem:[#allocation2 + $0x48] ss:$16 sps:$4 sm:$0xff]  }
  0x58   :  { %v5262_v34 = vld [vmem:[#allocation2 + $0x1e4] ss:$16 sps:$4 sm:$0xff]   ;;  %v5267_v37 = vld [vmem:[#allocation2 + $0x1e0] ss:$16 sps:$4 sm:$0xff]   ;;  %v5278_v43 = vld [vmem:[#allocation2 + $0x2c] ss:$16 sps:$4 sm:$0xff]  }
  0x59   :  { %657 = vmatpush1.bf16.msra.mxu0 %v5235_v15  ;;  %v5268_v38 = vld [vmem:[#allocation2 + $0x1c4] ss:$16 sps:$4 sm:$0xff]   ;;  %v5273_v41 = vld [vmem:[#allocation2 + $0x1c0] ss:$16 sps:$4 sm:$0xff]   ;;  %v5276_v44 = vld [vmem:[#allocation2 + $0x28] ss:$16 sps:$4 sm:$0xff]  }
  0x5a   :  { %718 = vmatpush1.bf16.msra.mxu1 %v5236_v16  ;;  %658 = vmatprep.subr.bf16.mxu0 %v5237_v17  ;;  %v5274_v42 = vld [vmem:[#allocation2 + $0x1a4] ss:$16 sps:$4 sm:$0xff]   ;;  %v5279_v45 = vld [vmem:[#allocation2 + $0x1a0] ss:$16 sps:$4 sm:$0xff]   ;;  %v5284_v47 = vld [vmem:[#allocation2 + $0xc] ss:$16 sps:$4 sm:$0xff]  }
  0x5b   :  { %756 = vmatprep.subr.bf16.mxu1 %v5242_v18  ;;  %v5280_v46 = vld [vmem:[#allocation2 + $0x184] ss:$16 sps:$4 sm:$0xff]   ;;  %v5282_v48 = vld [vmem:[#allocation2 + $0x8] ss:$16 sps:$4 sm:$0xff]   ;;  %v5285_v49 = vld [vmem:[#allocation2 + $0x180] ss:$16 sps:$4 sm:$0xff]  }
  0x5c   :  { %v5286_v50 = vld [vmem:[#allocation2 + $0x164] ss:$16 sps:$4 sm:$0xff]   ;;  %v5290_v52 = vld [vmem:[#allocation2 + $0x1ec] ss:$16 sps:$4 sm:$0xff]   ;;  %v5288_v53 = vld [vmem:[#allocation2 + $0x1e8] ss:$16 sps:$4 sm:$0xff]  }
  0x5d   :  { %4622 = vmatmul.mubr.msk.bf16.vlgmr.msra.gmra.mxu1 %vm643_vm0, %v6335_v19  ;;  %659 = vmatpush1.bf16.msra.mxu0 %v5243_v21  ;;  %v5312_v51 = vld [vmem:[%s7001_s0 + $0x4] ss:$12 sps:$4 sm:$0xff]   ;;  %v6346_v55 = vld [vmem:[%s7001_s0 + $0x20] ss:$12 sps:$4 sm:$0xff]   ;;  %v5294_v58 = vld [vmem:[#allocation2 + $0x1c8] ss:$16 sps:$4 sm:$0xff]  }
  0x5e   :  { %757 = vmatpush1.bf16.msra.mxu1 %v5240_v20  ;;  %660 = vmatprep.subr.bf16.mxu0 %v5244_v22  ;;  %v5291_v54 = vld [vmem:[#allocation2 + $0x160] ss:$16 sps:$4 sm:$0xff]   ;;  %v5292_v56 = vld [vmem:[#allocation2 + $0x144] ss:$16 sps:$4 sm:$0xff]   ;;  %v5296_v57 = vld [vmem:[#allocation2 + $0x1cc] ss:$16 sps:$4 sm:$0xff]  }
  0x5f   :  { %758 = vmatprep.subr.bf16.mxu1 %v5248_v23  ;;  %745 = vmatprep.mubr.bf16.mxu1 %v6265_v0  ;;  %v5297_v59 = vld [vmem:[#allocation2 + $0x140] ss:$16 sps:$4 sm:$0xff]   ;;  %v5298_v60 = vld [vmem:[#allocation2 + $0x124] ss:$16 sps:$4 sm:$0xff]   ;;  %v5302_v61 = vld [vmem:[#allocation2 + $0x1ac] ss:$16 sps:$4 sm:$0xff]  }
  0x60   :  { %682 = vmatprep.mubr.bf16.mxu0 %v5312_v51  ;;  %v5300_v62 = vld [vmem:[#allocation2 + $0x1a8] ss:$16 sps:$4 sm:$0xff]   ;;  %v5303_v63 = vld [vmem:[#allocation2 + $0x120] ss:$16 sps:$4 sm:$0xff]   ;;  %v5304_v1 = vld [vmem:[#allocation2 + $0x104] ss:$16 sps:$4 sm:$0xff]  }
  0x61   :  { %661 = vmatpush1.bf16.msra.mxu0 %v5249_v25  ;;  %v5308_v2 = vld [vmem:[#allocation2 + $0x18c] ss:$16 sps:$4 sm:$0xff]   ;;  %v5306_v3 = vld [vmem:[#allocation2 + $0x188] ss:$16 sps:$4 sm:$0xff]   ;;  %v5309_v4 = vld [vmem:[#allocation2 + $0x100] ss:$16 sps:$4 sm:$0xff]  }
  0x62   :  { %759 = vmatpush1.bf16.msra.mxu1 %v5246_v24  ;;  %662 = vmatprep.subr.bf16.mxu0 %v5250_v26  ;;  %v5315_v5 = vld [vmem:[#allocation2 + $0x16c] ss:$16 sps:$4 sm:$0xff]   ;;  %v5313_v8 = vld [vmem:[#allocation2 + $0x168] ss:$16 sps:$4 sm:$0xff]   ;;  %v5341_v25 = vld [vmem:[#allocation6 + $0xe0] ss:$16 sps:$4 sm:$0xff]  }
  0x63   :  { %760 = vmatprep.subr.bf16.mxu1 %v5254_v27  ;;  %v5318_v6 = vld [vmem:[#allocation2 + $0x26c] ss:$16 sps:$4 sm:$0xff]   ;;  %v5316_v9 = vld [vmem:[#allocation2 + $0x268] ss:$16 sps:$4 sm:$0xff]   ;;  %vm912_vm1 = vcmask 1041408   ;;  %vm927_vm4 = vcmask 1045504  }
  0x64   :  { %v5310_v7 = vld [vmem:[%s7001_s0] ss:$12 sps:$4 sm:$0xff]   ;;  %v5326_v12 = vld [vmem:[%s7001_s0 + $0x1c] ss:$12 sps:$4 sm:$0xff]   ;;  %v5328_v17 = vld [vmem:[%s7001_s0 + $0x18] ss:$12 sps:$4 sm:$0xff]  }
  0x65   :  { %663 = vmatpush1.bf16.msra.mxu0 %v5255_v29  ;;  %4623 = vmatmul.mubr.msk.bf16.gmra.mxu1 %vm643_vm0, %v6346_v55  ;;  %v5322_v10 = vld [vmem:[#allocation2 + $0x14c] ss:$16 sps:$4 sm:$0xff]   ;;  %v5320_v13 = vld [vmem:[#allocation2 + $0x148] ss:$16 sps:$4 sm:$0xff]   ;;  %vm4946_vm2 = vmneg %vm912_vm1  ;;  %vm4484_vm6 = vcmask 681600   ;;  %vm4451_vm7 = vcmask 616000  }
  0x66   :  { %761 = vmatpush1.bf16.msra.mxu1 %v5252_v28  ;;  %664 = vmatprep.subr.bf16.mxu0 %v5256_v30  ;;  %v5325_v11 = vld [vmem:[#allocation2 + $0x24c] ss:$16 sps:$4 sm:$0xff]   ;;  %v5323_v14 = vld [vmem:[#allocation2 + $0x248] ss:$16 sps:$4 sm:$0xff]   ;;  %v5347_v28 = vld [vmem:[#allocation6 + $0x2e0] ss:$16 sps:$4 sm:$0xff]  }
  0x67   :  { %762 = vmatprep.subr.bf16.mxu1 %v5260_v31  ;;  %788 = vmatprep.mubr.bf16.mxu1 %v5312_v51  ;;  %v5331_v15 = vld [vmem:[#allocation2 + $0x12c] ss:$16 sps:$4 sm:$0xff]   ;;  %v5329_v18 = vld [vmem:[#allocation2 + $0x128] ss:$16 sps:$4 sm:$0xff]   ;;  %v5344_v31 = vld [vmem:[#allocation6 + $0xc0] ss:$16 sps:$4 sm:$0xff]  }
  0x68   :  { %v5334_v16 = vld [vmem:[#allocation2 + $0x22c] ss:$16 sps:$4 sm:$0xff]   ;;  %v5332_v20 = vld [vmem:[#allocation2 + $0x228] ss:$16 sps:$4 sm:$0xff]   ;;  %v5380_v51 = vld [vmem:[#allocation6] ss:$16 sps:$4 sm:$0xff]  }
  0x69   :  { %665 = vmatpush1.bf16.msra.mxu0 %v5261_v33  ;;  %v5337_v21 = vld [vmem:[#allocation2 + $0x10c] ss:$16 sps:$4 sm:$0xff]   ;;  %v5335_v23 = vld [vmem:[#allocation2 + $0x108] ss:$16 sps:$4 sm:$0xff]   ;;  %v5350_v33 = vld [vmem:[#allocation6 + $0xa0] ss:$16 sps:$4 sm:$0xff]  }
  0x6a   :  { %763 = vmatpush1.bf16.msra.mxu1 %v5258_v32  ;;  %666 = vmatprep.subr.bf16.mxu0 %v5262_v34  ;;  %v5340_v22 = vld [vmem:[#allocation2 + $0x20c] ss:$16 sps:$4 sm:$0xff]   ;;  %v5338_v24 = vld [vmem:[#allocation2 + $0x208] ss:$16 sps:$4 sm:$0xff]   ;;  %v5353_v32 = vld [vmem:[#allocation6 + $0x2c0] ss:$16 sps:$4 sm:$0xff]  }
  0x6b   :  { %764 = vmatprep.subr.bf16.mxu1 %v5266_v35  ;;  %v5343_v26 = vld [vmem:[#allocation6 + $0xe4] ss:$16 sps:$4 sm:$0xff]   ;;  %v5359_v35 = vld [vmem:[#allocation6 + $0x2a0] ss:$16 sps:$4 sm:$0xff]   ;;  %vm6400_vm3 = vmpackc.low %vm4946_vm2, %vm4946_vm2  ;;  %vm4468_vm8 = vcmask 648800   ;;  %s6266_s0 = smov 116  }
  0x6c   :  { %v5346_v27 = vld [vmem:[#allocation6 + $0xc4] ss:$16 sps:$4 sm:$0xff]   ;;  %vm6443_vm5 = vmpackc.low %vm927_vm4, %vm927_vm4  ;;  %s6267_s18 = smov 56   ;;  %s6268_s4 = smov 52   ;;  %vm4462_vm9 = vcmask 25600   ;;  %vm4511_vm10 = vcmask 195584  }
  0x6d   :  { %667 = vmatpush2.bf16.msra.mxu0 %v5267_v37  ;;  %v5349_v29 = vld [vmem:[#allocation6 + $0x2e4] ss:$16 sps:$4 sm:$0xff]   ;;  %v5356_v37 = vld [vmem:[#allocation6 + $0x80] ss:$16 sps:$4 sm:$0xff]   ;;  %s6269_s19 = smov 104   ;;  %s6270_s20 = smov 48  }
  0x6e   :  { %765 = vmatpush1.bf16.msra.mxu1 %v5264_v36  ;;  %668 = vmatprep.subr.bf16.mxu0 %v5268_v38  ;;  %v5355_v30 = vld [vmem:[#allocation6 + $0x2c4] ss:$16 sps:$4 sm:$0xff]   ;;  %v5365_v38 = vld [vmem:[#allocation6 + $0x280] ss:$16 sps:$4 sm:$0xff]   ;;  %s6271_s21 = smov 24   ;;  %s6272_s22 = smov 12  }
  0x6f   :  { %766 = vmatprep.subr.bf16.mxu1 %v5272_v39  ;;  %v5358_v34 = vld [vmem:[#allocation6 + $0x84] ss:$16 sps:$4 sm:$0xff]   ;;  %vm4513_vm11 = vcmask 293888   ;;  %vm4515_vm12 = vcmask 392192   ;;  %vm4517_vm13 = vcmask 490496   ;;  %vm4519_vm14 = vcmask 588800  }
  0x70   :  { %v5367_v36 = vld [vmem:[#allocation6 + $0x284] ss:$16 sps:$4 sm:$0xff]   ;;  %vm4521_vm15 = vcmask 621568   ;;  %vm4525_vm1 = vcmask 687104  }
  0x71   :  { %669 = vmatpush2.bf16.msra.mxu0 %v5273_v41  ;;  %v5364_v39 = vld [vmem:[#allocation6 + $0x64] ss:$16 sps:$4 sm:$0xff]   ;;  %v5362_v41 = vld [vmem:[#allocation6 + $0x60] ss:$16 sps:$4 sm:$0xff]  }
  0x72   :  { %767 = vmatpush1.bf16.msra.mxu1 %v5270_v40  ;;  %670 = vmatprep.subr.bf16.mxu0 %v5274_v42  ;;  %v5373_v40 = vld [vmem:[#allocation6 + $0x264] ss:$16 sps:$4 sm:$0xff]   ;;  %v5371_v42 = vld [vmem:[#allocation6 + $0x260] ss:$16 sps:$4 sm:$0xff]  }
  0x73   :  { %768 = vmatprep.subr.bf16.mxu1 %v5278_v43  ;;  %v5370_v43 = vld [vmem:[#allocation6 + $0x44] ss:$16 sps:$4 sm:$0xff]  }
  0x75   :  { %671 = vmatpush2.bf16.msra.mxu0 %v5279_v45  ;;  %v5376_v45 = vld [vmem:[#allocation6 + $0x24] ss:$16 sps:$4 sm:$0xff]  }
  0x76   :  { %769 = vmatpush1.bf16.msra.mxu1 %v5276_v44  ;;  %672 = vmatprep.subr.bf16.mxu0 %v5280_v46  ;;  %v5368_v44 = vld [vmem:[#allocation6 + $0x40] ss:$16 sps:$4 sm:$0xff]   ;;  %v5379_v46 = vld [vmem:[#allocation6 + $0x244] ss:$16 sps:$4 sm:$0xff]  }
  0x77   :  { %770 = vmatprep.subr.bf16.mxu1 %v5284_v47  ;;  %v5374_v47 = vld [vmem:[#allocation6 + $0x20] ss:$16 sps:$4 sm:$0xff]  }
  0x79   :  { %673 = vmatpush2.bf16.msra.mxu0 %v5285_v49  ;;  %v5382_v49 = vld [vmem:[#allocation6 + $0x4] ss:$16 sps:$4 sm:$0xff]  }
  0x7a   :  { %771 = vmatpush1.bf16.msra.mxu1 %v5282_v48  ;;  %674 = vmatprep.subr.bf16.mxu0 %v5286_v50  ;;  %v5377_v48 = vld [vmem:[#allocation6 + $0x240] ss:$16 sps:$4 sm:$0xff]   ;;  %v5385_v50 = vld [vmem:[#allocation6 + $0x224] ss:$16 sps:$4 sm:$0xff]  }
  0x7b   :  { %772 = vmatprep.subr.bf16.mxu1 %v5290_v52  ;;  %v5383_v52 = vld [vmem:[#allocation6 + $0x220] ss:$16 sps:$4 sm:$0xff]  }
  0x7d   :  { %675 = vmatpush2.bf16.msra.mxu0 %v5291_v54  ;;  %v5391_v54 = vld [vmem:[#allocation6 + $0x204] ss:$16 sps:$4 sm:$0xff]  }
  0x7e   :  { %773 = vmatpush2.bf16.msra.mxu1 %v5288_v53  ;;  %676 = vmatprep.subr.bf16.mxu0 %v5292_v56  ;;  %v5388_v53 = vld [vmem:[#allocation6 + $0x1e4] ss:$16 sps:$4 sm:$0xff]   ;;  %v5389_v56 = vld [vmem:[#allocation6 + $0x200] ss:$16 sps:$4 sm:$0xff]  }
  0x7f   :  { %774 = vmatprep.subr.bf16.mxu1 %v5296_v57  ;;  %v5394_v57 = vld [vmem:[#allocation6 + $0x1c4] ss:$16 sps:$4 sm:$0xff]  }
  0x81   :  { %677 = vmatpush2.bf16.msra.mxu0 %v5297_v59  ;;  %v5392_v59 = vld [vmem:[#allocation6 + $0x1c0] ss:$16 sps:$4 sm:$0xff]  }
  0x82   :  { %775 = vmatpush2.bf16.msra.mxu1 %v5294_v58  ;;  %678 = vmatprep.subr.bf16.mxu0 %v5298_v60  ;;  %v5397_v58 = vld [vmem:[#allocation6 + $0x3e4] ss:$16 sps:$4 sm:$0xff]   ;;  %v5395_v60 = vld [vmem:[#allocation6 + $0x3e0] ss:$16 sps:$4 sm:$0xff]  }
  0x83   :  { %776 = vmatprep.subr.bf16.mxu1 %v5302_v61  ;;  %v5400_v61 = vld [vmem:[#allocation6 + $0x1a4] ss:$16 sps:$4 sm:$0xff]  }
  0x85   :  { %679 = vmatpush2.bf16.msra.mxu0 %v5303_v63  ;;  %v5398_v63 = vld [vmem:[#allocation6 + $0x1a0] ss:$16 sps:$4 sm:$0xff]  }
  0x86   :  { %777 = vmatpush2.bf16.msra.mxu1 %v5300_v62  ;;  %680 = vmatprep.subr.bf16.mxu0 %v5304_v1  ;;  %v5403_v62 = vld [vmem:[#allocation6 + $0x3c4] ss:$16 sps:$4 sm:$0xff]   ;;  %v5401_v1 = vld [vmem:[#allocation6 + $0x3c0] ss:$16 sps:$4 sm:$0xff]  }
  0x87   :  { %778 = vmatprep.subr.bf16.mxu1 %v5308_v2  ;;  %v5406_v2 = vld [vmem:[#allocation6 + $0x184] ss:$16 sps:$4 sm:$0xff]  }
  0x89   :  { %681 = vmatpush2.bf16.msra.mxu0 %v5309_v4  ;;  %v5404_v4 = vld [vmem:[#allocation6 + $0x180] ss:$16 sps:$4 sm:$0xff]  }
  0x8a   :  { %779 = vmatpush2.bf16.msra.mxu1 %v5306_v3  ;;  %817 = vmatprep.subr.bf16.mxu0 %v5318_v6  ;;  %v5409_v3 = vld [vmem:[#allocation6 + $0x3a4] ss:$16 sps:$4 sm:$0xff]  }
  0x8b   :  { %780 = vmatprep.subr.bf16.mxu1 %v5315_v5  ;;  %v5407_v5 = vld [vmem:[#allocation6 + $0x3a0] ss:$16 sps:$4 sm:$0xff]   ;;  %v5412_v6 = vld [vmem:[#allocation6 + $0x164] ss:$16 sps:$4 sm:$0xff]  }
  0x8c   :  { %683 = vmatmul.mubr.bf16.vlgmr.msra.gmra.mxu0 %v5310_v7 }
  0x8d   :  { %818 = vmatpush1.bf16.msra.mxu0 %v5316_v9  ;;  %692 = vmatprep.mubr.bf16.mxu0 %v5326_v12  ;;  %v5413_v9 = vld [vmem:[#allocation6 + $0x380] ss:$16 sps:$4 sm:$0xff]  }
  0x8e   :  { %781 = vmatpush2.bf16.msra.mxu1 %v5313_v8  ;;  %819 = vmatprep.subr.bf16.mxu0 %v5325_v11  ;;  %v5410_v8 = vld [vmem:[#allocation6 + $0x160] ss:$16 sps:$4 sm:$0xff]   ;;  %v5421_v11 = vld [vmem:[#allocation6 + $0x364] ss:$16 sps:$4 sm:$0xff]  }
  0x8f   :  { %782 = vmatprep.subr.bf16.mxu1 %v5322_v10  ;;  %v5418_v10 = vld [vmem:[#allocation6 + $0x144] ss:$16 sps:$4 sm:$0xff]  }
  0x91   :  { %820 = vmatpush1.bf16.msra.mxu0 %v5323_v14  ;;  %v5424_v14 = vld [vmem:[#allocation6 + $0x124] ss:$16 sps:$4 sm:$0xff]  }
  0x92   :  { %783 = vmatpush2.bf16.msra.mxu1 %v5320_v13  ;;  %821 = vmatprep.subr.bf16.mxu0 %v5334_v16  ;;  %v5419_v13 = vld [vmem:[#allocation6 + $0x360] ss:$16 sps:$4 sm:$0xff]  }
  0x93   :  { %784 = vmatprep.subr.bf16.mxu1 %v5331_v15  ;;  %v5427_v15 = vld [vmem:[#allocation6 + $0x344] ss:$16 sps:$4 sm:$0xff]   ;;  %v5422_v16 = vld [vmem:[#allocation6 + $0x120] ss:$16 sps:$4 sm:$0xff]  }
  0x94   :  { %693 = vmatmul.mubr.bf16.gmra.mxu0 %v5328_v17 }
  0x95   :  { %822 = vmatpush1.bf16.msra.mxu0 %v5332_v20  ;;  %841 = vmatprep.mubr.bf16.mxu0 %v6265_v0  ;;  %v5433_v20 = vld [vmem:[#allocation6 + $0x324] ss:$16 sps:$4 sm:$0xff]  }
  0x96   :  { %785 = vmatpush2.bf16.msra.mxu1 %v5329_v18  ;;  %823 = vmatprep.subr.bf16.mxu0 %v5340_v22  ;;  %v5430_v18 = vld [vmem:[#allocation6 + $0x104] ss:$16 sps:$4 sm:$0xff]   ;;  %v5431_v22 = vld [vmem:[#allocation6 + $0x320] ss:$16 sps:$4 sm:$0xff]  }
  0x97   :  { %786 = vmatprep.subr.bf16.mxu1 %v5337_v21  ;;  %v5428_v21 = vld [vmem:[#allocation6 + $0x100] ss:$16 sps:$4 sm:$0xff]  }
  0x99   :  { %824 = vmatpush1.bf16.msra.mxu0 %v5338_v24  ;;  %v5439_v24 = vld [vmem:[#allocation6 + $0x4e4] ss:$16 sps:$4 sm:$0xff]  }
  0x9a   :  { %787 = vmatpush2.bf16.msra.mxu1 %v5335_v23  ;;  %2882 = vmatprep.subr.bf16.mxu0 %v5343_v26  ;;  %v5436_v23 = vld [vmem:[#allocation6 + $0x304] ss:$16 sps:$4 sm:$0xff]  }
  0x9b   :  { %2923 = vmatprep.subr.bf16.mxu1 %v5349_v29  ;;  %v5445_v26 = vld [vmem:[#allocation6 + $0x6e4] ss:$16 sps:$4 sm:$0xff]  }
  0x9c   :  { %4624 = vmatmul.mubr.msk.bf16.vlgmr.msra.gmra.mxu0 %vm643_vm0, %v6335_v19  ;;  %v5352_v19 = vld [vmem:[#allocation6 + $0xa4] ss:$16 sps:$4 sm:$0xff]  }
  0x9d   :  { %789 = vmatmul.mubr.bf16.vlgmr.msra.gmra.mxu1 %v5310_v7  ;;  %851 = vmatprep.mubr.bf16.mxu0 %v6265_v0  ;;  %v5361_v0 = vld [vmem:[#allocation6 + $0x2a4] ss:$16 sps:$4 sm:$0xff]  }
  0x9e   :  { %798 = vmatprep.mubr.bf16.mxu1 %v5326_v12  ;;  %2883 = vmatpush1.bf16.msra.mxu0 %v5341_v25  ;;  %v5415_v7 = vld [vmem:[#allocation6 + $0x384] ss:$16 sps:$4 sm:$0xff]   ;;  %v5416_v12 = vld [vmem:[#allocation6 + $0x140] ss:$16 sps:$4 sm:$0xff]  }
  0x9f   :  { %2924 = vmatpush1.bf16.msra.mxu1 %v5347_v28  ;;  %2884 = vmatprep.subr.bf16.mxu0 %v5346_v27  ;;  %v5434_v25 = vld [vmem:[#allocation6 + $0x300] ss:$16 sps:$4 sm:$0xff]  }
  0xa0   :  { %2925 = vmatprep.subr.bf16.mxu1 %v5355_v30  ;;  %v193_v30 = vlaneseq }
  0xa2   :  { %2885 = vmatpush1.bf16.msra.mxu0 %v5344_v31 }
  0xa3   :  { %2926 = vmatpush1.bf16.msra.mxu1 %v5353_v32  ;;  %2886 = vmatprep.subr.bf16.mxu0 %v5352_v19  ;;  %v6365_v19 = vshrl.u32 %v193_v30, 7 }
  0xa4   :  { %4625 = vmatmul.mubr.msk.bf16.gmra.mxu0 %vm643_vm0, %v6346_v55  ;;  %2927 = vmatprep.subr.bf16.mxu1 %v5361_v0  ;;  %v5386_v55 = vld [vmem:[#allocation6 + $0x1e0] ss:$16 sps:$4 sm:$0xff]   ;;  %vm4523_vm0 = vcmask 654336  }
  0xa5   :  { %799 = vmatmul.mubr.bf16.gmra.mxu1 %v5328_v17  ;;  %v5425_v17 = vld [vmem:[#allocation6 + $0x340] ss:$16 sps:$4 sm:$0xff]  }
  0xa6   :  { %2887 = vmatpush1.bf16.msra.mxu0 %v5350_v33 }
  0xa7   :  { %2928 = vmatpush1.bf16.msra.mxu1 %v5359_v35  ;;  %2888 = vmatprep.subr.bf16.mxu0 %v5358_v34  ;;  %v195_v35 = vsub.s32 0, %v6365_v19 }
  0xa8   :  { %2929 = vmatprep.subr.bf16.mxu1 %v5367_v36  ;;  %v191_v36 = vld [vmem:[#allocation4] sm:$0xf] }
  0xaa   :  { %2889 = vmatpush1.bf16.msra.mxu0 %v5356_v37 }
  0xab   :  { %2930 = vmatpush1.bf16.msra.mxu1 %v5365_v38  ;;  %2890 = vmatprep.subr.bf16.mxu0 %v5364_v39  ;;  %v199_v39 = vsub.s32 1, %v6365_v19 }
  0xac   :  { %2931 = vmatprep.subr.bf16.mxu1 %v5373_v40 }
  0xae   :  { %2891 = vmatpush1.bf16.msra.mxu0 %v5362_v41  ;;  %v196_v41 = vrot.slane %v191_v36, %v195_v35 }
  0xaf   :  { %2932 = vmatpush1.bf16.msra.mxu1 %v5371_v42  ;;  %2892 = vmatprep.subr.bf16.mxu0 %v5370_v43 }
  0xb0   :  { %2933 = vmatprep.subr.bf16.mxu1 %v5379_v46  ;;  %v7009_v46 = vsub.s32 3, %v6365_v19 }
  0xb2   :  { %2893 = vmatpush1.bf16.msra.mxu0 %v5368_v44  ;;  %v7010_v44 = vsub.s32 2, %v6365_v19 }
  0xb3   :  { %2894 = vmatprep.subr.bf16.mxu0 %v5376_v45  ;;  %2934 = vmatpush1.bf16.msra.mxu1 %v5377_v48  ;;  %v200_v45 = vrot.slane %v191_v36, %v199_v39 }
  0xb4   :  { %2935 = vmatprep.subr.bf16.mxu1 %v5385_v50 }
  0xb6   :  { %2895 = vmatpush1.bf16.msra.mxu0 %v5374_v47 }
  0xb7   :  { %2896 = vmatprep.subr.bf16.mxu0 %v5382_v49  ;;  %2936 = vmatpush1.bf16.msra.mxu1 %v5383_v52 }
  0xb8   :  { %2937 = vmatprep.subr.bf16.mxu1 %v5391_v54  ;;  %v208_v54 = vrot.slane %v191_v36, %v7009_v46  ;;  %v6618_v46 = vld [vmem:[#allocation6 + $0x66c] ss:$16 sps:$4 sm:$0xff]  }
  0xb9   :  { %7081 = vst [vmem:[#allocation24_spill] sm:$0xff] %v6618_v46 }
  0xba   :  { %2897 = vmatpush1.bf16.msra.mxu0 %v5380_v51  ;;  %v204_v51 = vrot.slane %v191_v36, %v7010_v44  ;;  %v6632_v44 = vld [vmem:[#allocation6 + $0x86c] ss:$16 sps:$4 sm:$0xff]  }
  0xbb   :  { %2898 = vmatprep.subr.bf16.mxu0 %v5388_v53  ;;  %2938 = vmatpush1.bf16.msra.mxu1 %v5389_v56  ;;  %7086 = vst [vmem:[#allocation29_spill] sm:$0xff] %v6632_v44 }
  0xbc   :  { %2939 = vmatprep.subr.bf16.mxu1 %v5397_v58 }
  0xbe   :  { %2899 = vmatpush2.bf16.msra.mxu0 %v5386_v55 }
  0xbf   :  { %2900 = vmatprep.subr.bf16.mxu0 %v5394_v57  ;;  %2940 = vmatpush2.bf16.msra.mxu1 %v5395_v60 }
  0xc0   :  { %2941 = vmatprep.subr.bf16.mxu1 %v5403_v62 }
  0xc2   :  { %2901 = vmatpush2.bf16.msra.mxu0 %v5392_v59 }
  0xc3   :  { %2902 = vmatprep.subr.bf16.mxu0 %v5400_v61  ;;  %2942 = vmatpush2.bf16.msra.mxu1 %v5401_v1 }
  0xc4   :  { %2943 = vmatprep.subr.bf16.mxu1 %v5409_v3 }
  0xc6   :  { %2903 = vmatpush2.bf16.msra.mxu0 %v5398_v63 }
  0xc7   :  { %2904 = vmatprep.subr.bf16.mxu0 %v5406_v2  ;;  %2944 = vmatpush2.bf16.msra.mxu1 %v5407_v5 }
  0xc8   :  { %2945 = vmatprep.subr.bf16.mxu1 %v5415_v7 }
  0xca   :  { %2905 = vmatpush2.bf16.msra.mxu0 %v5404_v4 }
  0xcb   :  { %2906 = vmatprep.subr.bf16.mxu0 %v5412_v6  ;;  %2946 = vmatpush2.bf16.msra.mxu1 %v5413_v9 }
  0xcc   :  { %2947 = vmatprep.subr.bf16.mxu1 %v5421_v11 }
  0xce   :  { %2907 = vmatpush2.bf16.msra.mxu0 %v5410_v8 }
  0xcf   :  { %2908 = vmatprep.subr.bf16.mxu0 %v5418_v10  ;;  %2948 = vmatpush2.bf16.msra.mxu1 %v5419_v13 }
  0xd0   :  { %2949 = vmatprep.subr.bf16.mxu1 %v5427_v15 }
  0xd2   :  { %2909 = vmatpush2.bf16.msra.mxu0 %v5416_v12 }
  0xd3   :  { %2910 = vmatprep.subr.bf16.mxu0 %v5424_v14  ;;  %2950 = vmatpush2.bf16.msra.mxu1 %v5425_v17 }
  0xd4   :  { %2951 = vmatprep.subr.bf16.mxu1 %v5433_v20 }
  0xd6   :  { %2911 = vmatpush2.bf16.msra.mxu0 %v5422_v16 }
  0xd7   :  { %2912 = vmatprep.subr.bf16.mxu0 %v5430_v18  ;;  %2952 = vmatpush2.bf16.msra.mxu1 %v5431_v22 }
  0xd8   :  { %2953 = vmatprep.subr.bf16.mxu1 %v5436_v23 }
  0xda   :  { %2913 = vmatpush2.bf16.msra.mxu0 %v5428_v21 }
  0xdb   :  { %2964 = vmatprep.subr.bf16.mxu0 %v5439_v24  ;;  %2954 = vmatpush2.bf16.msra.mxu1 %v5434_v25 }
  0xdc   :  { %3005 = vmatprep.subr.bf16.mxu1 %v5445_v26 }
 0x11d   :  { %v737_v27 = vpop.f32.mrf.mxu1 }
 0x11f   :  { %v739_v28 = vpop.f32.mrf.mxu1 }
 0x121   :  { %v741_v29 = vpop.f32.mrf.mxu1 }
 0x123   :  { %v743_v31 = vpop.f32.mrf.mxu1 }
 0x125   :  { %v747_v33 = vpop.f32.mrf.mxu1 }
 0x127   :  { %v749_v37 = vpop.f32.mrf.mxu1 }
 0x129   :  { %v751_v42 = vpop.f32.mrf.mxu1 }
 0x12b   :  { %v753_v49 = vpop.f32.mrf.mxu1 }
 0x14c   :  { %v684_v32 = vpop.f32.mrf.mxu0 }
 0x14d   :  { %v685_v48 = vadd.f32 %v684_v32, %v196_v41 }
 0x14e   :  { %v686_v0 = vpop.f32.mrf.mxu0 }
 0x14f   :  { %v687_v52 = vadd.f32 %v686_v0, %v200_v45  ;;  %v6379_v57 = vadd.f32 %v737_v27, %v685_v48 }
 0x150   :  { %v688_v34 = vpop.f32.mrf.mxu0 }
 0x151   :  { %v689_v53 = vadd.f32 %v688_v34, %v196_v41  ;;  %v6381_v61 = vadd.f32 %v739_v28, %v687_v52  ;;  %v862_v5 = vmul.f32 0.01, %v6379_v57 }
 0x152   :  { %v690_v38 = vpop.f32.mrf.mxu0 }
 0x153   :  { %v6383_v62 = vadd.f32 %v741_v29, %v689_v53  ;;  %v691_v6 = vadd.f32 %v690_v38, %v200_v45  ;;  %v863_v13 = vmul.f32 0.01, %v6381_v61  ;;  %v878_v22 = vmax.f32 %v6379_v57, %v862_v5 }
 0x154   :  { %v694_v40 = vpop.f32.mrf.mxu0 }
 0x155   :  { %v695_v1 = vadd.f32 %v694_v40, %v196_v41  ;;  %v866_v14 = vmul.f32 0.01, %v6383_v62  ;;  %v744_v23 = vadd.f32 %v743_v31, %v691_v6  ;;  %v879_v32 = vmax.f32 %v6381_v61, %v863_v13 }
 0x156   :  { %v696_v43 = vpop.f32.mrf.mxu0 }
 0x157   :  { %v697_v2 = vadd.f32 %v696_v43, %v200_v45  ;;  %v748_v16 = vadd.f32 %v747_v33, %v695_v1  ;;  %v882_v0 = vmax.f32 %v6383_v62, %v866_v14  ;;  %v867_v43 = vmul.f32 0.01, %v744_v23 }
 0x158   :  { %v698_v47 = vpop.f32.mrf.mxu0 }
 0x159   :  { %v699_v8 = vadd.f32 %v698_v47, %v196_v41  ;;  %v750_v17 = vadd.f32 %v749_v37, %v697_v2  ;;  %v870_v36 = vmul.f32 0.01, %v748_v16 }
 0x15a   :  { %v700_v50 = vpop.f32.mrf.mxu0 }
 0x15b   :  { %v701_v18 = vadd.f32 %v700_v50, %v200_v45  ;;  %v752_v25 = vadd.f32 %v751_v42, %v699_v8  ;;  %v871_v37 = vmul.f32 0.01, %v750_v17 }
 0x15c   :  { %v843_v56 = vpop.f32.mrf.mxu0 }
 0x15d   :  { %v790_v55 = vpop.f32.mrf.mxu1  ;;  %v754_v38 = vadd.f32 %v753_v49, %v701_v18  ;;  %v874_v48 = vmul.f32 0.01, %v752_v25  ;;  %v887_v61 = vmax.f32 %v750_v17, %v871_v37 }
 0x15e   :  { %v791_v58 = vadd.f32 %v790_v55, %v204_v51  ;;  %v845_v60 = vpop.f32.mrf.mxu0 }
 0x15f   :  { %v792_v59 = vpop.f32.mrf.mxu1  ;;  %v875_v62 = vmul.f32 0.01, %v754_v38  ;;  %v890_v5 = vmax.f32 %v752_v25, %v874_v48  ;;  %v5455_v48 = vld [vmem:[#allocation6 + $0x6a0] ss:$16 sps:$4 sm:$0xff]  }
 0x160   :  { %v793_v63 = vadd.f32 %v792_v59, %v208_v54  ;;  %v847_v4 = vpop.f32.mrf.mxu0  ;;  %v844_v9 = vadd.f32 %v843_v56, %v791_v58 }
 0x161   :  { %v794_v3 = vpop.f32.mrf.mxu1  ;;  %v891_v13 = vmax.f32 %v754_v38, %v875_v62  ;;  %v5448_v38 = vld [vmem:[#allocation6 + $0x4a4] ss:$16 sps:$4 sm:$0xff]   ;;  %v5470_v62 = vld [vmem:[#allocation6 + $0x420] ss:$16 sps:$4 sm:$0xff]  }
 0x162   :  { %v795_v7 = vadd.f32 %v794_v3, %v204_v51  ;;  %v846_v10 = vadd.f32 %v845_v60, %v793_v63  ;;  %v849_v12 = vpop.f32.mrf.mxu0  ;;  %v864_v26 = vmul.f32 0.01, %v844_v9  ;;  %v886_v60 = vmax.f32 %v748_v16, %v870_v36  ;;  %v5443_v36 = vld [vmem:[#allocation6 + $0x6e0] ss:$16 sps:$4 sm:$0xff]  }
 0x163   :  { %v796_v11 = vpop.f32.mrf.mxu1 }
 0x164   :  { %v797_v15 = vadd.f32 %v796_v11, %v208_v54  ;;  %v853_v21 = vpop.f32.mrf.mxu0  ;;  %v848_v24 = vadd.f32 %v847_v4, %v795_v7  ;;  %v865_v27 = vmul.f32 0.01, %v846_v10  ;;  %v880_v50 = vmax.f32 %v844_v9, %v864_v26 }
 0x165   :  { %v800_v20 = vpop.f32.mrf.mxu1 }
 0x166   :  { %v801_v28 = vadd.f32 %v800_v20, %v204_v51  ;;  %v855_v30 = vpop.f32.mrf.mxu0  ;;  %v850_v33 = vadd.f32 %v849_v12, %v797_v15  ;;  %v868_v42 = vmul.f32 0.01, %v848_v24  ;;  %v881_v52 = vmax.f32 %v846_v10, %v865_v27  ;;  %v5437_v27 = vld [vmem:[#allocation6 + $0x4e0] ss:$16 sps:$4 sm:$0xff]  }
 0x167   :  { %v802_v29 = vpop.f32.mrf.mxu1  ;;  %v883_v12 = vmax.f32 %v744_v23, %v867_v43  ;;  %v5449_v43 = vld [vmem:[#allocation6 + $0x6c0] ss:$16 sps:$4 sm:$0xff]  }
 0x168   :  { %v803_v34 = vadd.f32 %v802_v29, %v208_v54  ;;  %v854_v40 = vadd.f32 %v853_v21, %v801_v28  ;;  %v857_v31 = vpop.f32.mrf.mxu0  ;;  %v869_v56 = vmul.f32 0.01, %v850_v33  ;;  %v884_v1 = vmax.f32 %v848_v24, %v868_v42  ;;  %v5454_v42 = vld [vmem:[#allocation6 + $0x484] ss:$16 sps:$4 sm:$0xff]  }
 0x169   :  { %v804_v41 = vpop.f32.mrf.mxu1  ;;  %v895_v6 = vmax.f32 %v879_v32, %v881_v52  ;;  %v5463_v52 = vld [vmem:[#allocation6 + $0x684] ss:$16 sps:$4 sm:$0xff]  }
 0x16a   :  { %v856_v45 = vadd.f32 %v855_v30, %v803_v34  ;;  %v805_v47 = vadd.f32 %v804_v41, %v204_v51  ;;  %v872_v53 = vmul.f32 0.01, %v854_v40  ;;  %v859_v63 = vpop.f32.mrf.mxu0  ;;  %v894_v51 = vmax.f32 %v878_v22, %v880_v50  ;;  %v5442_v30 = vld [vmem:[#allocation6 + $0x4c4] ss:$16 sps:$4 sm:$0xff]   ;;  %v5440_v34 = vld [vmem:[#allocation6 + $0x4c0] ss:$16 sps:$4 sm:$0xff]  }
 0x16b   :  { %v806_v55 = vpop.f32.mrf.mxu1  ;;  %v885_v8 = vmax.f32 %v850_v33, %v869_v56  ;;  %v896_v14 = vmax.f32 %v882_v0, %v884_v1  ;;  %v5460_v50 = vld [vmem:[#allocation6 + $0x464] ss:$16 sps:$4 sm:$0xff]  }
 0x16c   :  { %v873_v57 = vmul.f32 0.01, %v856_v45  ;;  %v858_v58 = vadd.f32 %v857_v31, %v805_v47  ;;  %v807_v59 = vadd.f32 %v806_v55, %v208_v54  ;;  %v888_v49 = vmax.f32 %v854_v40, %v872_v53  ;;  %v5451_v40 = vld [vmem:[#allocation6 + $0x6c4] ss:$16 sps:$4 sm:$0xff]   ;;  %v5446_v31 = vld [vmem:[#allocation6 + $0x4a0] ss:$16 sps:$4 sm:$0xff]  }
 0x16d   :  { %v897_v20 = vmax.f32 %v883_v12, %v885_v8  ;;  %v5452_v47 = vld [vmem:[#allocation6 + $0x480] ss:$16 sps:$4 sm:$0xff]   ;;  %v5466_v56 = vld [vmem:[#allocation6 + $0x444] ss:$16 sps:$4 sm:$0xff]  }
 0x16e   :  { %v889_v2 = vmax.f32 %v856_v45, %v873_v57  ;;  %v876_v3 = vmul.f32 0.01, %v858_v58  ;;  %v860_v4 = vadd.f32 %v859_v63, %v807_v59  ;;  %v898_v7 = vmax.f32 %v886_v60, %v888_v49  ;;  %v5457_v45 = vld [vmem:[#allocation6 + $0x6a4] ss:$16 sps:$4 sm:$0xff]   ;;  %v5458_v53 = vld [vmem:[#allocation6 + $0x460] ss:$16 sps:$4 sm:$0xff]  }
 0x16f   :  { %v5461_v55 = vld [vmem:[#allocation6 + $0x680] ss:$16 sps:$4 sm:$0xff]   ;;  %v5469_v57 = vld [vmem:[#allocation6 + $0x664] ss:$16 sps:$4 sm:$0xff]  }
 0x170   :  { %v899_v9 = vmax.f32 %v887_v61, %v889_v2  ;;  %v892_v10 = vmax.f32 %v858_v58, %v876_v3  ;;  %v877_v11 = vmul.f32 0.01, %v860_v4  ;;  %v6391_v54 = vmax.f32 %v894_v51, %v898_v7  ;;  %v5464_v58 = vld [vmem:[#allocation6 + $0x440] ss:$16 sps:$4 sm:$0xff]   ;;  %v5472_v60 = vld [vmem:[#allocation6 + $0x424] ss:$16 sps:$4 sm:$0xff]  }
 0x171   :  { %v5467_v59 = vld [vmem:[#allocation6 + $0x660] ss:$16 sps:$4 sm:$0xff]   ;;  %v5475_v61 = vld [vmem:[#allocation6 + $0x644] ss:$16 sps:$4 sm:$0xff]  }
 0x172   :  { %v6393_v15 = vmax.f32 %v895_v6, %v899_v9  ;;  %v900_v16 = vmax.f32 %v890_v5, %v892_v10  ;;  %v893_v17 = vmax.f32 %v860_v4, %v877_v11  ;;  %v908_v18 = vrot.slane %v6391_v54, 6  ;;  %v5473_v49 = vld [vmem:[#allocation6 + $0x640] ss:$16 sps:$4 sm:$0xff]   ;;  %v5478_v63 = vld [vmem:[#allocation6 + $0x404] ss:$16 sps:$4 sm:$0xff]  }
 0x173   :  { %v5481_v1 = vld [vmem:[#allocation6 + $0x624] ss:$16 sps:$4 sm:$0xff]   ;;  %v5476_v2 = vld [vmem:[#allocation6 + $0x400] ss:$16 sps:$4 sm:$0xff]  }
 0x174   :  { %v6397_v21 = vmax.f32 %v896_v14, %v900_v16  ;;  %v901_v22 = vmax.f32 %v891_v13, %v893_v17  ;;  %v909_v24 = vrot.slane %v6393_v15, 6  ;;  %v6408_v28 = vpack.c.bf16 %v908_v18, %v908_v18  ;;  %v5479_v3 = vld [vmem:[#allocation6 + $0x620] ss:$16 sps:$4 sm:$0xff]   ;;  %v5484_v4 = vld [vmem:[#allocation6 + $0x5e4] ss:$16 sps:$4 sm:$0xff]  }
 0x175   :  { %v6416_v32 = vpack.c.bf16 %v6393_v15, %v6393_v15  ;;  %v5487_v5 = vld [vmem:[#allocation6 + $0x604] ss:$16 sps:$4 sm:$0xff]   ;;  %v5482_v51 = vld [vmem:[#allocation6 + $0x5e0] ss:$16 sps:$4 sm:$0xff]  }
 0x176   :  { %v6404_v25 = vmax.f32 %v897_v20, %v901_v22  ;;  %v6406_v26 = vpack.c.bf16 %v909_v24, %v909_v24  ;;  %v917_v29 = vrot.slane %v6397_v21, 6  ;;  %v5485_v6 = vld [vmem:[#allocation6 + $0x600] ss:$16 sps:$4 sm:$0xff]   ;;  %v5490_v7 = vld [vmem:[#allocation6 + $0x5c4] ss:$16 sps:$4 sm:$0xff]  }
 0x177   :  { %v5493_v8 = vld [vmem:[#allocation6 + $0x7e4] ss:$16 sps:$4 sm:$0xff]   ;;  %v5488_v9 = vld [vmem:[#allocation6 + $0x5c0] ss:$16 sps:$4 sm:$0xff]  }
 0x178   :  { %4950 = vmatprep.mubr.msk.bf16.mxu0 %vm6400_vm3, %v6406_v26  ;;  %v918_v0 = vrot.slane %v6404_v25, 6  ;;  %v6425_v37 = vpack.c.bf16 %v917_v29, %v917_v29  ;;  %v6435_v41 = vpack.c.bf16 %v6404_v25, %v6404_v25  ;;  %v5491_v10 = vld [vmem:[#allocation6 + $0x7e0] ss:$16 sps:$4 sm:$0xff]   ;;  %v5496_v11 = vld [vmem:[#allocation6 + $0x5a4] ss:$16 sps:$4 sm:$0xff]  }
 0x179   :  { %4955 = vmatmul.mubr.msk.bf16.vlgmr.msra.gmra.mxu0 %vm6400_vm3, %v6408_v28  ;;  %v5499_v12 = vld [vmem:[#allocation6 + $0x7c4] ss:$16 sps:$4 sm:$0xff]   ;;  %v5494_v13 = vld [vmem:[#allocation6 + $0x5a0] ss:$16 sps:$4 sm:$0xff]  }
 0x17a   :  { %2965 = vmatpush1.bf16.msra.mxu0 %v5437_v27  ;;  %2996 = vmatprep.mubr.bf16.mxu0 %v6416_v32  ;;  %v6423_v33 = vpack.c.bf16 %v918_v0, %v918_v0  ;;  %v5497_v14 = vld [vmem:[#allocation6 + $0x7c0] ss:$16 sps:$4 sm:$0xff]   ;;  %v5502_v16 = vld [vmem:[#allocation6 + $0x584] ss:$16 sps:$4 sm:$0xff]  }
 0x17b   :  { %2966 = vmatprep.subr.bf16.mxu0 %v5442_v30  ;;  %v5505_v17 = vld [vmem:[#allocation6 + $0x7a4] ss:$16 sps:$4 sm:$0xff]   ;;  %v5500_v18 = vld [vmem:[#allocation6 + $0x580] ss:$16 sps:$4 sm:$0xff]  }
 0x17c   :  { %4960 = vmatprep.mubr.msk.bf16.mxu1 %vm6400_vm3, %v6423_v33  ;;  %v5503_v20 = vld [vmem:[#allocation6 + $0x7a0] ss:$16 sps:$4 sm:$0xff]   ;;  %v5508_v22 = vld [vmem:[#allocation6 + $0x564] ss:$16 sps:$4 sm:$0xff]  }
 0x17d   :  { %4965 = vmatmul.mubr.msk.bf16.vlgmr.msra.gmra.mxu1 %vm6400_vm3, %v6425_v37  ;;  %v5511_v24 = vld [vmem:[#allocation6 + $0x784] ss:$16 sps:$4 sm:$0xff]   ;;  %v5506_v27 = vld [vmem:[#allocation6 + $0x560] ss:$16 sps:$4 sm:$0xff]  }
 0x17e   :  { %2967 = vmatpush1.bf16.msra.mxu0 %v5440_v34  ;;  %3006 = vmatpush1.bf16.msra.mxu1 %v5443_v36  ;;  %v5509_v29 = vld [vmem:[#allocation6 + $0x780] ss:$16 sps:$4 sm:$0xff]   ;;  %v5514_v30 = vld [vmem:[#allocation6 + $0x544] ss:$16 sps:$4 sm:$0xff]  }
 0x17f   :  { %3037 = vmatprep.mubr.bf16.mxu1 %v6435_v41  ;;  %2968 = vmatprep.subr.bf16.mxu0 %v5448_v38  ;;  %v5517_v0 = vld [vmem:[#allocation6 + $0x764] ss:$16 sps:$4 sm:$0xff]   ;;  %v5512_v34 = vld [vmem:[#allocation6 + $0x540] ss:$16 sps:$4 sm:$0xff]  }
 0x180   :  { %3007 = vmatprep.subr.bf16.mxu1 %v5451_v40  ;;  %v5515_v36 = vld [vmem:[#allocation6 + $0x760] ss:$16 sps:$4 sm:$0xff]   ;;  %v5520_v38 = vld [vmem:[#allocation6 + $0x524] ss:$16 sps:$4 sm:$0xff]  }
 0x181   :  { %v5523_v40 = vld [vmem:[#allocation6 + $0x744] ss:$16 sps:$4 sm:$0xff]  }
 0x182   :  { %2969 = vmatpush1.bf16.msra.mxu0 %v5446_v31  ;;  %3008 = vmatpush1.bf16.msra.mxu1 %v5449_v43  ;;  %v5518_v31 = vld [vmem:[#allocation6 + $0x520] ss:$16 sps:$4 sm:$0xff]  }
 0x183   :  { %2970 = vmatprep.subr.bf16.mxu0 %v5454_v42  ;;  %3009 = vmatprep.subr.bf16.mxu1 %v5457_v45  ;;  %v5521_v43 = vld [vmem:[#allocation6 + $0x740] ss:$16 sps:$4 sm:$0xff]   ;;  %v5526_v42 = vld [vmem:[#allocation6 + $0x504] ss:$16 sps:$4 sm:$0xff]  }
 0x184   :  { %v5529_v45 = vld [vmem:[#allocation6 + $0x724] ss:$16 sps:$4 sm:$0xff]  }
 0x186   :  { %2971 = vmatpush1.bf16.msra.mxu0 %v5452_v47  ;;  %3010 = vmatpush1.bf16.msra.mxu1 %v5455_v48  ;;  %v5524_v47 = vld [vmem:[#allocation6 + $0x500] ss:$16 sps:$4 sm:$0xff]  }
 0x187   :  { %2972 = vmatprep.subr.bf16.mxu0 %v5460_v50  ;;  %3011 = vmatprep.subr.bf16.mxu1 %v5463_v52  ;;  %v5527_v48 = vld [vmem:[#allocation6 + $0x720] ss:$16 sps:$4 sm:$0xff]   ;;  %v5532_v50 = vld [vmem:[#allocation6 + $0x704] ss:$16 sps:$4 sm:$0xff]  }
 0x188   :  { %v5535_v52 = vld [vmem:[#allocation6 + $0x8e4] ss:$16 sps:$4 sm:$0xff]  }
 0x18a   :  { %2973 = vmatpush1.bf16.msra.mxu0 %v5458_v53  ;;  %3012 = vmatpush1.bf16.msra.mxu1 %v5461_v55  ;;  %v924_v53 = vrot.slane %v6393_v15, 2  ;;  %v5530_v55 = vld [vmem:[#allocation6 + $0x700] ss:$16 sps:$4 sm:$0xff]  }
 0x18b   :  { %2974 = vmatprep.subr.bf16.mxu0 %v5466_v56  ;;  %3013 = vmatprep.subr.bf16.mxu1 %v5469_v57  ;;  %v5533_v56 = vld [vmem:[#allocation6 + $0x8e0] ss:$16 sps:$4 sm:$0xff]   ;;  %v6441_v57 = vpack.c.bf16 %v6391_v54, %v6391_v54 }
 0x18c   :  { %v6448_v15 = vpack.c.bf16 %v924_v53, %v924_v53  ;;  %v5599_v53 = vld [vmem:[#allocation6 + $0x1a8] ss:$16 sps:$4 sm:$0xff]  }
 0x18e   :  { %2975 = vmatpush1.bf16.msra.mxu0 %v5464_v58  ;;  %3014 = vmatpush1.bf16.msra.mxu1 %v5467_v59  ;;  %v5538_v58 = vld [vmem:[#allocation6 + $0x8c4] ss:$16 sps:$4 sm:$0xff]   ;;  %v5829_v59 = vld [vmem:[#allocation9 + $0x68] sm:$0xff]  }
 0x18f   :  { %2976 = vmatprep.subr.bf16.mxu0 %v5472_v60  ;;  %3015 = vmatprep.subr.bf16.mxu1 %v5475_v61  ;;  %v5541_v60 = vld [vmem:[#allocation6 + $0xec] ss:$16 sps:$4 sm:$0xff]   ;;  %v5536_v61 = vld [vmem:[#allocation6 + $0x8c0] ss:$16 sps:$4 sm:$0xff]  }
 0x192   :  { %2977 = vmatpush1.bf16.msra.mxu0 %v5470_v62  ;;  %3016 = vmatpush1.bf16.msra.mxu1 %v5473_v49  ;;  %v5539_v62 = vld [vmem:[#allocation6 + $0xe8] ss:$16 sps:$4 sm:$0xff]   ;;  %v6455_v49 = vpack.c.bf16 %v6397_v21, %v6397_v21 }
 0x193   :  { %2978 = vmatprep.subr.bf16.mxu0 %v5478_v63  ;;  %3017 = vmatprep.subr.bf16.mxu1 %v5481_v1  ;;  %v5544_v63 = vld [vmem:[#allocation6 + $0x8a4] ss:$16 sps:$4 sm:$0xff]   ;;  %v5547_v1 = vld [vmem:[#allocation6 + $0xcc] ss:$16 sps:$4 sm:$0xff]  }
 0x196   :  { %2979 = vmatpush1.bf16.msra.mxu0 %v5476_v2  ;;  %3018 = vmatpush1.bf16.msra.mxu1 %v5479_v3  ;;  %v5542_v2 = vld [vmem:[#allocation6 + $0x8a0] ss:$16 sps:$4 sm:$0xff]   ;;  %v5545_v3 = vld [vmem:[#allocation6 + $0xc8] ss:$16 sps:$4 sm:$0xff]  }
 0x197   :  { %2980 = vmatprep.subr.bf16.mxu0 %v5484_v4  ;;  %3019 = vmatprep.subr.bf16.mxu1 %v5487_v5  ;;  %v5550_v4 = vld [vmem:[#allocation6 + $0x884] ss:$16 sps:$4 sm:$0xff]   ;;  %v5553_v5 = vld [vmem:[#allocation6 + $0xac] ss:$16 sps:$4 sm:$0xff]  }
 0x19a   :  { %2981 = vmatpush2.bf16.msra.mxu0 %v5482_v51  ;;  %3020 = vmatpush1.bf16.msra.mxu1 %v5485_v6  ;;  %v5548_v51 = vld [vmem:[#allocation6 + $0x880] ss:$16 sps:$4 sm:$0xff]   ;;  %v5551_v6 = vld [vmem:[#allocation6 + $0xa8] ss:$16 sps:$4 sm:$0xff]  }
 0x19b   :  { %2982 = vmatprep.subr.bf16.mxu0 %v5490_v7  ;;  %3021 = vmatprep.subr.bf16.mxu1 %v5493_v8  ;;  %v5556_v7 = vld [vmem:[#allocation6 + $0x864] ss:$16 sps:$4 sm:$0xff]   ;;  %v5559_v8 = vld [vmem:[#allocation6 + $0x8c] ss:$16 sps:$4 sm:$0xff]  }
 0x19e   :  { %2983 = vmatpush2.bf16.msra.mxu0 %v5488_v9  ;;  %3022 = vmatpush2.bf16.msra.mxu1 %v5491_v10  ;;  %v5554_v9 = vld [vmem:[#allocation6 + $0x860] ss:$16 sps:$4 sm:$0xff]   ;;  %v5557_v10 = vld [vmem:[#allocation6 + $0x88] ss:$16 sps:$4 sm:$0xff]  }
 0x19f   :  { %2984 = vmatprep.subr.bf16.mxu0 %v5496_v11  ;;  %3023 = vmatprep.subr.bf16.mxu1 %v5499_v12  ;;  %v5562_v11 = vld [vmem:[#allocation6 + $0x844] ss:$16 sps:$4 sm:$0xff]   ;;  %v5560_v12 = vld [vmem:[#allocation6 + $0x840] ss:$16 sps:$4 sm:$0xff]  }
 0x1a2   :  { %2985 = vmatpush2.bf16.msra.mxu0 %v5494_v13  ;;  %3024 = vmatpush2.bf16.msra.mxu1 %v5497_v14  ;;  %v5563_v13 = vld [vmem:[#allocation6 + $0x68] ss:$16 sps:$4 sm:$0xff]   ;;  %v5568_v14 = vld [vmem:[#allocation6 + $0x824] ss:$16 sps:$4 sm:$0xff]  }
 0x1a3   :  { %2986 = vmatprep.subr.bf16.mxu0 %v5502_v16  ;;  %3025 = vmatprep.subr.bf16.mxu1 %v5505_v17  ;;  %v5571_v16 = vld [vmem:[#allocation6 + $0x4c] ss:$16 sps:$4 sm:$0xff]   ;;  %v5566_v17 = vld [vmem:[#allocation6 + $0x820] ss:$16 sps:$4 sm:$0xff]  }
 0x1a6   :  { %2987 = vmatpush2.bf16.msra.mxu0 %v5500_v18  ;;  %3026 = vmatpush2.bf16.msra.mxu1 %v5503_v20  ;;  %v5569_v18 = vld [vmem:[#allocation6 + $0x48] ss:$16 sps:$4 sm:$0xff]   ;;  %v5574_v20 = vld [vmem:[#allocation6 + $0x804] ss:$16 sps:$4 sm:$0xff]  }
 0x1a7   :  { %2988 = vmatprep.subr.bf16.mxu0 %v5508_v22  ;;  %3027 = vmatprep.subr.bf16.mxu1 %v5511_v24  ;;  %v5577_v22 = vld [vmem:[#allocation6 + $0x2c] ss:$16 sps:$4 sm:$0xff]   ;;  %v5572_v24 = vld [vmem:[#allocation6 + $0x800] ss:$16 sps:$4 sm:$0xff]  }
 0x1aa   :  { %2989 = vmatpush2.bf16.msra.mxu0 %v5506_v27  ;;  %3028 = vmatpush2.bf16.msra.mxu1 %v5509_v29  ;;  %v5575_v27 = vld [vmem:[#allocation6 + $0x28] ss:$16 sps:$4 sm:$0xff]   ;;  %v5580_v29 = vld [vmem:[#allocation6 + $0x9e4] ss:$16 sps:$4 sm:$0xff]  }
 0x1ab   :  { %2990 = vmatprep.subr.bf16.mxu0 %v5514_v30  ;;  %3029 = vmatprep.subr.bf16.mxu1 %v5517_v0  ;;  %v5583_v30 = vld [vmem:[#allocation6 + $0xc] ss:$16 sps:$4 sm:$0xff]   ;;  %v5578_v0 = vld [vmem:[#allocation6 + $0x9e0] ss:$16 sps:$4 sm:$0xff]  }
 0x1ae   :  { %2991 = vmatpush2.bf16.msra.mxu0 %v5512_v34  ;;  %3030 = vmatpush2.bf16.msra.mxu1 %v5515_v36  ;;  %v5581_v34 = vld [vmem:[#allocation6 + $0x8] ss:$16 sps:$4 sm:$0xff]   ;;  %v5586_v36 = vld [vmem:[#allocation6 + $0x9c4] ss:$16 sps:$4 sm:$0xff]  }
 0x1af   :  { %2992 = vmatprep.subr.bf16.mxu0 %v5520_v38  ;;  %3031 = vmatprep.subr.bf16.mxu1 %v5523_v40  ;;  %v5589_v38 = vld [vmem:[#allocation6 + $0x1ec] ss:$16 sps:$4 sm:$0xff]   ;;  %v5584_v40 = vld [vmem:[#allocation6 + $0x9c0] ss:$16 sps:$4 sm:$0xff]  }
 0x1b2   :  { %2993 = vmatpush2.bf16.msra.mxu0 %v5518_v31  ;;  %3032 = vmatpush2.bf16.msra.mxu1 %v5521_v43  ;;  %v5587_v31 = vld [vmem:[#allocation6 + $0x1e8] ss:$16 sps:$4 sm:$0xff]   ;;  %v5592_v43 = vld [vmem:[#allocation6 + $0x9a4] ss:$16 sps:$4 sm:$0xff]  }
 0x1b3   :  { %2994 = vmatprep.subr.bf16.mxu0 %v5526_v42  ;;  %3033 = vmatprep.subr.bf16.mxu1 %v5529_v45  ;;  %v5595_v42 = vld [vmem:[#allocation6 + $0x1cc] ss:$16 sps:$4 sm:$0xff]   ;;  %v5590_v45 = vld [vmem:[#allocation6 + $0x9a0] ss:$16 sps:$4 sm:$0xff]  }
 0x1b6   :  { %2995 = vmatpush2.bf16.msra.mxu0 %v5524_v47  ;;  %3034 = vmatpush2.bf16.msra.mxu1 %v5527_v48  ;;  %v5593_v47 = vld [vmem:[#allocation6 + $0x1c8] ss:$16 sps:$4 sm:$0xff]   ;;  %v5598_v48 = vld [vmem:[#allocation6 + $0x984] ss:$16 sps:$4 sm:$0xff]  }
 0x1b7   :  { %3035 = vmatprep.subr.bf16.mxu1 %v5532_v50  ;;  %3046 = vmatprep.subr.bf16.mxu0 %v5535_v52  ;;  %v5601_v50 = vld [vmem:[#allocation6 + $0x1ac] ss:$16 sps:$4 sm:$0xff]   ;;  %v5596_v52 = vld [vmem:[#allocation6 + $0x980] ss:$16 sps:$4 sm:$0xff]  }
 0x1b9   :  { %2997 = vmatmul.mubr.bf16.vlgmr.msra.gmra.mxu0 %v6441_v57 }
 0x1ba   :  { %3036 = vmatpush2.bf16.msra.mxu1 %v5530_v55  ;;  %3047 = vmatpush1.bf16.msra.mxu0 %v5533_v56  ;;  %v5604_v55 = vld [vmem:[#allocation6 + $0x964] ss:$16 sps:$4 sm:$0xff]   ;;  %v5607_v56 = vld [vmem:[#allocation6 + $0x18c] ss:$16 sps:$4 sm:$0xff]  }
 0x1bb   :  { %4968 = vmatprep.mubr.msk.bf16.mxu0 %vm6443_vm5, %v6448_v15  ;;  %3048 = vmatprep.subr.bf16.mxu0 %v5538_v58  ;;  %v5602_v58 = vld [vmem:[#allocation6 + $0x960] ss:$16 sps:$4 sm:$0xff]  }
 0x1bc   :  { %3087 = vmatprep.subr.bf16.mxu1 %v5541_v60  ;;  %v5605_v60 = vld [vmem:[#allocation6 + $0x188] ss:$16 sps:$4 sm:$0xff]  }
 0x1bd   :  { %3038 = vmatmul.mubr.bf16.vlgmr.msra.gmra.mxu1 %v6455_v49 }
 0x1be   :  { %3049 = vmatpush1.bf16.msra.mxu0 %v5536_v61  ;;  %3088 = vmatpush1.bf16.msra.mxu1 %v5539_v62  ;;  %v5610_v61 = vld [vmem:[#allocation6 + $0x944] ss:$16 sps:$4 sm:$0xff]   ;;  %v5613_v62 = vld [vmem:[#allocation6 + $0x16c] ss:$16 sps:$4 sm:$0xff]  }
 0x1bf   :  { %4976 = vmatprep.mubr.msk.bf16.mxu1 %vm6400_vm3, %v6406_v26  ;;  %3050 = vmatprep.subr.bf16.mxu0 %v5544_v63  ;;  %v5565_v26 = vld [vmem:[#allocation6 + $0x6c] ss:$16 sps:$4 sm:$0xff]   ;;  %v5608_v63 = vld [vmem:[#allocation6 + $0x940] ss:$16 sps:$4 sm:$0xff]  }
 0x1c0   :  { %3089 = vmatprep.subr.bf16.mxu1 %v5547_v1  ;;  %v5611_v1 = vld [vmem:[#allocation6 + $0x168] ss:$16 sps:$4 sm:$0xff]  }
 0x1c2   :  { %3051 = vmatpush1.bf16.msra.mxu0 %v5542_v2  ;;  %3090 = vmatpush1.bf16.msra.mxu1 %v5545_v3  ;;  %v5616_v2 = vld [vmem:[#allocation6 + $0x924] ss:$16 sps:$4 sm:$0xff]   ;;  %v5619_v3 = vld [vmem:[#allocation6 + $0x14c] ss:$16 sps:$4 sm:$0xff]  }
 0x1c3   :  { %3052 = vmatprep.subr.bf16.mxu0 %v5550_v4  ;;  %3091 = vmatprep.subr.bf16.mxu1 %v5553_v5  ;;  %v5614_v4 = vld [vmem:[#allocation6 + $0x920] ss:$16 sps:$4 sm:$0xff]   ;;  %v5617_v5 = vld [vmem:[#allocation6 + $0x148] ss:$16 sps:$4 sm:$0xff]  }
 0x1c6   :  { %3053 = vmatpush1.bf16.msra.mxu0 %v5548_v51  ;;  %3092 = vmatpush1.bf16.msra.mxu1 %v5551_v6  ;;  %v5622_v51 = vld [vmem:[#allocation6 + $0x904] ss:$16 sps:$4 sm:$0xff]   ;;  %v5625_v6 = vld [vmem:[#allocation6 + $0x12c] ss:$16 sps:$4 sm:$0xff]  }
 0x1c7   :  { %3054 = vmatprep.subr.bf16.mxu0 %v5556_v7  ;;  %3093 = vmatprep.subr.bf16.mxu1 %v5559_v8  ;;  %v5620_v7 = vld [vmem:[#allocation6 + $0x900] ss:$16 sps:$4 sm:$0xff]   ;;  %v5623_v8 = vld [vmem:[#allocation6 + $0x128] ss:$16 sps:$4 sm:$0xff]  }
 0x1ca   :  { %3055 = vmatpush1.bf16.msra.mxu0 %v5554_v9  ;;  %3094 = vmatpush1.bf16.msra.mxu1 %v5557_v10  ;;  %v923_v9 = vrot.slane %v6391_v54, 2  ;;  %v5628_v10 = vld [vmem:[#allocation6 + $0x10c] ss:$16 sps:$4 sm:$0xff]   ;;  %v5632_v54 = vld [vmem:[#allocation6 + $0x2c8] ss:$16 sps:$4 sm:$0xff]  }
 0x1cb   :  { %3056 = vmatprep.subr.bf16.mxu0 %v5562_v11  ;;  %3095 = vmatprep.subr.bf16.mxu1 %v5565_v26  ;;  %v5631_v11 = vld [vmem:[#allocation6 + $0x2ec] ss:$16 sps:$4 sm:$0xff]   ;;  %v5626_v26 = vld [vmem:[#allocation6 + $0x108] ss:$16 sps:$4 sm:$0xff]  }
 0x1ce   :  { %3057 = vmatpush1.bf16.msra.mxu0 %v5560_v12  ;;  %3096 = vmatpush1.bf16.msra.mxu1 %v5563_v13  ;;  %v5629_v12 = vld [vmem:[#allocation6 + $0x2e8] ss:$16 sps:$4 sm:$0xff]   ;;  %v6462_v13 = vpack.c.bf16 %v923_v9, %v923_v9 }
 0x1cf   :  { %3058 = vmatprep.subr.bf16.mxu0 %v5568_v14  ;;  %3097 = vmatprep.subr.bf16.mxu1 %v5571_v16  ;;  %v5634_v14 = vld [vmem:[#allocation6 + $0x2cc] ss:$16 sps:$4 sm:$0xff]   ;;  %v6490_v9 = vld [vmem:[#allocation6 + $0x388] ss:$16 sps:$4 sm:$0xff]  }
 0x1d0   :  { %v5637_v16 = vld [vmem:[#allocation6 + $0x4ec] ss:$16 sps:$4 sm:$0xff]  }
 0x1d2   :  { %3059 = vmatpush1.bf16.msra.mxu0 %v5566_v17  ;;  %3098 = vmatpush1.bf16.msra.mxu1 %v5569_v18  ;;  %v5635_v17 = vld [vmem:[#allocation6 + $0x4e8] ss:$16 sps:$4 sm:$0xff]   ;;  %v5640_v18 = vld [vmem:[#allocation6 + $0x2ac] ss:$16 sps:$4 sm:$0xff]  }
 0x1d3   :  { %3060 = vmatprep.subr.bf16.mxu0 %v5574_v20  ;;  %3099 = vmatprep.subr.bf16.mxu1 %v5577_v22  ;;  %v5643_v20 = vld [vmem:[#allocation6 + $0x4cc] ss:$16 sps:$4 sm:$0xff]   ;;  %v5638_v22 = vld [vmem:[#allocation6 + $0x2a8] ss:$16 sps:$4 sm:$0xff]  }
 0x1d6   :  { %3061 = vmatpush1.bf16.msra.mxu0 %v5572_v24  ;;  %3100 = vmatpush1.bf16.msra.mxu1 %v5575_v27  ;;  %v5641_v24 = vld [vmem:[#allocation6 + $0x4c8] ss:$16 sps:$4 sm:$0xff]   ;;  %v5646_v27 = vld [vmem:[#allocation6 + $0x28c] ss:$16 sps:$4 sm:$0xff]  }
 0x1d7   :  { %3062 = vmatprep.subr.bf16.mxu0 %v5580_v29  ;;  %3101 = vmatprep.subr.bf16.mxu1 %v5583_v30  ;;  %v5649_v29 = vld [vmem:[#allocation6 + $0x4ac] ss:$16 sps:$4 sm:$0xff]   ;;  %v5644_v30 = vld [vmem:[#allocation6 + $0x288] ss:$16 sps:$4 sm:$0xff]  }
 0x1da   :  { %3063 = vmatpush2.bf16.msra.mxu0 %v5578_v0  ;;  %3102 = vmatpush1.bf16.msra.mxu1 %v5581_v34  ;;  %v5647_v0 = vld [vmem:[#allocation6 + $0x4a8] ss:$16 sps:$4 sm:$0xff]   ;;  %v5652_v34 = vld [vmem:[#allocation6 + $0x26c] ss:$16 sps:$4 sm:$0xff]  }
 0x1db   :  { %3064 = vmatprep.subr.bf16.mxu0 %v5586_v36  ;;  %3103 = vmatprep.subr.bf16.mxu1 %v5589_v38  ;;  %v5655_v36 = vld [vmem:[#allocation6 + $0x48c] ss:$16 sps:$4 sm:$0xff]   ;;  %v5653_v38 = vld [vmem:[#allocation6 + $0x488] ss:$16 sps:$4 sm:$0xff]  }
 0x1de   :  { %3065 = vmatpush2.bf16.msra.mxu0 %v5584_v40  ;;  %3104 = vmatpush2.bf16.msra.mxu1 %v5587_v31  ;;  %v5658_v40 = vld [vmem:[#allocation6 + $0x24c] ss:$16 sps:$4 sm:$0xff]  }
 0x1df   :  { %3066 = vmatprep.subr.bf16.mxu0 %v5592_v43  ;;  %3105 = vmatprep.subr.bf16.mxu1 %v5595_v42  ;;  %v5661_v31 = vld [vmem:[#allocation6 + $0x46c] ss:$16 sps:$4 sm:$0xff]   ;;  %v5656_v43 = vld [vmem:[#allocation6 + $0x248] ss:$16 sps:$4 sm:$0xff]  }
 0x1e0   :  { %v5659_v42 = vld [vmem:[#allocation6 + $0x468] ss:$16 sps:$4 sm:$0xff]  }
 0x1e2   :  { %3067 = vmatpush2.bf16.msra.mxu0 %v5590_v45  ;;  %3106 = vmatpush2.bf16.msra.mxu1 %v5593_v47  ;;  %v5664_v45 = vld [vmem:[#allocation6 + $0x22c] ss:$16 sps:$4 sm:$0xff]  }
 0x1e3   :  { %3068 = vmatprep.subr.bf16.mxu0 %v5598_v48  ;;  %3107 = vmatprep.subr.bf16.mxu1 %v5601_v50  ;;  %v5667_v47 = vld [vmem:[#allocation6 + $0x44c] ss:$16 sps:$4 sm:$0xff]   ;;  %v5662_v48 = vld [vmem:[#allocation6 + $0x228] ss:$16 sps:$4 sm:$0xff]  }
 0x1e4   :  { %v5665_v50 = vld [vmem:[#allocation6 + $0x448] ss:$16 sps:$4 sm:$0xff]  }
 0x1e6   :  { %3069 = vmatpush2.bf16.msra.mxu0 %v5596_v52  ;;  %3108 = vmatpush2.bf16.msra.mxu1 %v5599_v53  ;;  %v5670_v52 = vld [vmem:[#allocation6 + $0x20c] ss:$16 sps:$4 sm:$0xff]  }
 0x1e7   :  { %3070 = vmatprep.subr.bf16.mxu0 %v5604_v55  ;;  %3109 = vmatprep.subr.bf16.mxu1 %v5607_v56  ;;  %v5673_v53 = vld [vmem:[#allocation6 + $0x42c] ss:$16 sps:$4 sm:$0xff]   ;;  %v5668_v55 = vld [vmem:[#allocation6 + $0x208] ss:$16 sps:$4 sm:$0xff]  }
 0x1e8   :  { %v5671_v56 = vld [vmem:[#allocation6 + $0x428] ss:$16 sps:$4 sm:$0xff]  }
 0x1ea   :  { %3071 = vmatpush2.bf16.msra.mxu0 %v5602_v58  ;;  %3110 = vmatpush2.bf16.msra.mxu1 %v5605_v60  ;;  %v5676_v58 = vld [vmem:[#allocation6 + $0x3ec] ss:$16 sps:$4 sm:$0xff]  }
 0x1eb   :  { %3072 = vmatprep.subr.bf16.mxu0 %v5610_v61  ;;  %3111 = vmatprep.subr.bf16.mxu1 %v5613_v62  ;;  %v5679_v60 = vld [vmem:[#allocation6 + $0x40c] ss:$16 sps:$4 sm:$0xff]   ;;  %v5674_v61 = vld [vmem:[#allocation6 + $0x3e8] ss:$16 sps:$4 sm:$0xff]  }
 0x1ec   :  { %v5677_v62 = vld [vmem:[#allocation6 + $0x408] ss:$16 sps:$4 sm:$0xff]  }
 0x1ee   :  { %3073 = vmatpush2.bf16.msra.mxu0 %v5608_v63  ;;  %3112 = vmatpush2.bf16.msra.mxu1 %v5611_v1  ;;  %v5682_v63 = vld [vmem:[#allocation6 + $0x3cc] ss:$16 sps:$4 sm:$0xff]  }
 0x1ef   :  { %3074 = vmatprep.subr.bf16.mxu0 %v5616_v2  ;;  %3113 = vmatprep.subr.bf16.mxu1 %v5619_v3  ;;  %v5685_v1 = vld [vmem:[#allocation6 + $0x5ec] ss:$16 sps:$4 sm:$0xff]   ;;  %v5680_v2 = vld [vmem:[#allocation6 + $0x3c8] ss:$16 sps:$4 sm:$0xff]  }
 0x1f0   :  { %v5683_v3 = vld [vmem:[#allocation6 + $0x5e8] ss:$16 sps:$4 sm:$0xff]  }
 0x1f2   :  { %3075 = vmatpush2.bf16.msra.mxu0 %v5614_v4  ;;  %3114 = vmatpush2.bf16.msra.mxu1 %v5617_v5  ;;  %v6474_v4 = vld [vmem:[#allocation6 + $0x3ac] ss:$16 sps:$4 sm:$0xff]  }
 0x1f3   :  { %3076 = vmatprep.subr.bf16.mxu0 %v5622_v51  ;;  %3115 = vmatprep.subr.bf16.mxu1 %v5625_v6  ;;  %v6476_v5 = vld [vmem:[#allocation6 + $0x5cc] ss:$16 sps:$4 sm:$0xff]   ;;  %v6478_v51 = vld [vmem:[#allocation6 + $0x3a8] ss:$16 sps:$4 sm:$0xff]  }
 0x1f4   :  { %v6480_v6 = vld [vmem:[#allocation6 + $0x5c8] ss:$16 sps:$4 sm:$0xff]  }
 0x1f6   :  { %3077 = vmatpush2.bf16.msra.mxu0 %v5620_v7  ;;  %3116 = vmatpush2.bf16.msra.mxu1 %v5623_v8  ;;  %v6484_v7 = vld [vmem:[#allocation6 + $0x38c] ss:$16 sps:$4 sm:$0xff]  }
 0x1f7   :  { %3117 = vmatprep.subr.bf16.mxu1 %v5628_v10  ;;  %3128 = vmatprep.subr.bf16.mxu0 %v5631_v11  ;;  %v6486_v8 = vld [vmem:[#allocation6 + $0x5ac] ss:$16 sps:$4 sm:$0xff]   ;;  %v6492_v10 = vld [vmem:[#allocation6 + $0x5a8] ss:$16 sps:$4 sm:$0xff]  }
 0x1f8   :  { %v6496_v11 = vld [vmem:[#allocation6 + $0x36c] ss:$16 sps:$4 sm:$0xff]  }
 0x1f9   :  { %4971 = vmatmul.mubr.msk.bf16.vlgmr.msra.gmra.mxu0 %vm6443_vm5, %v6462_v13 }
 0x1fa   :  { %3118 = vmatpush2.bf16.msra.mxu1 %v5626_v26  ;;  %3129 = vmatpush1.bf16.msra.mxu0 %v5629_v12  ;;  %v6498_v26 = vld [vmem:[#allocation6 + $0x58c] ss:$16 sps:$4 sm:$0xff]   ;;  %v6502_v12 = vld [vmem:[#allocation6 + $0x368] ss:$16 sps:$4 sm:$0xff]  }
 0x1fb   :  { %4986 = vmatprep.mubr.msk.bf16.mxu0 %vm6400_vm3, %v6423_v33  ;;  %3130 = vmatprep.subr.bf16.mxu0 %v5634_v14  ;;  %v6504_v14 = vld [vmem:[#allocation6 + $0x588] ss:$16 sps:$4 sm:$0xff]  }
 0x1fc   :  { %3169 = vmatprep.subr.bf16.mxu1 %v5637_v16  ;;  %v6508_v16 = vld [vmem:[#allocation6 + $0x34c] ss:$16 sps:$4 sm:$0xff]  }
 0x1fd   :  { %4981 = vmatmul.mubr.msk.bf16.vlgmr.msra.gmra.mxu1 %vm6400_vm3, %v6408_v28  ;;  %v5650_v28 = vld [vmem:[#allocation6 + $0x268] ss:$16 sps:$4 sm:$0xff]  }
 0x1fe   :  { %3131 = vmatpush1.bf16.msra.mxu0 %v5632_v54  ;;  %3170 = vmatpush1.bf16.msra.mxu1 %v5635_v17  ;;  %v6510_v54 = vld [vmem:[#allocation6 + $0x56c] ss:$16 sps:$4 sm:$0xff]   ;;  %v6514_v17 = vld [vmem:[#allocation6 + $0x348] ss:$16 sps:$4 sm:$0xff]  }
 0x1ff   :  { %3201 = vmatprep.mubr.bf16.mxu1 %v6416_v32  ;;  %3132 = vmatprep.subr.bf16.mxu0 %v5640_v18  ;;  %v6516_v18 = vld [vmem:[#allocation6 + $0x568] ss:$16 sps:$4 sm:$0xff]  }
 0x200   :  { %3171 = vmatprep.subr.bf16.mxu1 %v5643_v20  ;;  %v6520_v20 = vld [vmem:[#allocation6 + $0x32c] ss:$16 sps:$4 sm:$0xff]  }
 0x202   :  { %3133 = vmatpush1.bf16.msra.mxu0 %v5638_v22  ;;  %3172 = vmatpush1.bf16.msra.mxu1 %v5641_v24  ;;  %v6522_v22 = vld [vmem:[#allocation6 + $0x54c] ss:$16 sps:$4 sm:$0xff]   ;;  %v6526_v24 = vld [vmem:[#allocation6 + $0x328] ss:$16 sps:$4 sm:$0xff]  }
 0x203   :  { %3134 = vmatprep.subr.bf16.mxu0 %v5646_v27  ;;  %3173 = vmatprep.subr.bf16.mxu1 %v5649_v29  ;;  %v6528_v27 = vld [vmem:[#allocation6 + $0x548] ss:$16 sps:$4 sm:$0xff]   ;;  %v6532_v29 = vld [vmem:[#allocation6 + $0x30c] ss:$16 sps:$4 sm:$0xff]  }
 0x206   :  { %3135 = vmatpush1.bf16.msra.mxu0 %v5644_v30  ;;  %3174 = vmatpush1.bf16.msra.mxu1 %v5647_v0  ;;  %v6534_v30 = vld [vmem:[#allocation6 + $0x52c] ss:$16 sps:$4 sm:$0xff]   ;;  %v6538_v0 = vld [vmem:[#allocation6 + $0x308] ss:$16 sps:$4 sm:$0xff]  }
 0x207   :  { %3136 = vmatprep.subr.bf16.mxu0 %v5652_v34  ;;  %3175 = vmatprep.subr.bf16.mxu1 %v5655_v36  ;;  %v6540_v34 = vld [vmem:[#allocation6 + $0x528] ss:$16 sps:$4 sm:$0xff]   ;;  %v6544_v36 = vld [vmem:[#allocation6 + $0x50c] ss:$16 sps:$4 sm:$0xff]  }
 0x20a   :  { %3137 = vmatpush1.bf16.msra.mxu0 %v5650_v28  ;;  %3176 = vmatpush1.bf16.msra.mxu1 %v5653_v38  ;;  %v6546_v28 = vld [vmem:[#allocation6 + $0x6ec] ss:$16 sps:$4 sm:$0xff]   ;;  %v6548_v38 = vld [vmem:[#allocation7] sm:$0xf] }
 0x20b   :  { %3138 = vmatprep.subr.bf16.mxu0 %v5658_v40  ;;  %3177 = vmatprep.subr.bf16.mxu1 %v5661_v31  ;;  %v6552_v40 = vld [vmem:[#allocation6 + $0x508] ss:$16 sps:$4 sm:$0xff]  }
 0x20c   :  { %v6554_v31 = vld [vmem:[#allocation6 + $0x6e8] ss:$16 sps:$4 sm:$0xff]  }
 0x20e   :  { %3139 = vmatpush1.bf16.msra.mxu0 %v5656_v43  ;;  %3178 = vmatpush1.bf16.msra.mxu1 %v5659_v42  ;;  %v6558_v43 = vld [vmem:[#allocation6 + $0x6cc] ss:$16 sps:$4 sm:$0xff]   ;;  %v6563_v42 = vrot.slane %v6548_v38, %v195_v35  ;;  %v6579_v35 = vld [vmem:[#allocation6 + $0x8e8] ss:$16 sps:$4 sm:$0xff]  }
 0x20f   :  { %3140 = vmatprep.subr.bf16.mxu0 %v5664_v45  ;;  %3179 = vmatprep.subr.bf16.mxu1 %v5667_v47  ;;  %v6565_v45 = vld [vmem:[#allocation6 + $0x8ec] ss:$16 sps:$4 sm:$0xff]  }
 0x212   :  { %3141 = vmatpush1.bf16.msra.mxu0 %v5662_v48  ;;  %3180 = vmatpush1.bf16.msra.mxu1 %v5665_v50  ;;  %v6575_v48 = vrot.slane %v6548_v38, %v199_v39  ;;  %v6577_v50 = vld [vmem:[#allocation6 + $0x6c8] ss:$16 sps:$4 sm:$0xff]  }
 0x213   :  { %3142 = vmatprep.subr.bf16.mxu0 %v5670_v52  ;;  %3181 = vmatprep.subr.bf16.mxu1 %v5673_v53  ;;  %v6583_v53 = vld [vmem:[#allocation6 + $0x6ac] ss:$16 sps:$4 sm:$0xff]  }
 0x214   :  { %7073 = vst [vmem:[#allocation16_spill] sm:$0xff] %v6583_v53 }
 0x216   :  { %3143 = vmatpush1.bf16.msra.mxu0 %v5668_v55  ;;  %3182 = vmatpush1.bf16.msra.mxu1 %v5671_v56  ;;  %v6587_v56 = vld [vmem:[#allocation6 + $0x8cc] ss:$16 sps:$4 sm:$0xff]  }
 0x217   :  { %3144 = vmatprep.subr.bf16.mxu0 %v5676_v58  ;;  %3183 = vmatprep.subr.bf16.mxu1 %v5679_v60  ;;  %7074 = vst [vmem:[#allocation17_spill] sm:$0xff] %v6587_v56 }
 0x21a   :  { %3145 = vmatpush2.bf16.msra.mxu0 %v5674_v61  ;;  %3184 = vmatpush1.bf16.msra.mxu1 %v5677_v62  ;;  %v6595_v62 = vld [vmem:[#allocation6 + $0x6a8] ss:$16 sps:$4 sm:$0xff]  }
 0x21b   :  { %3146 = vmatprep.subr.bf16.mxu0 %v5682_v63  ;;  %3185 = vmatprep.subr.bf16.mxu1 %v5685_v1  ;;  %7075 = vst [vmem:[#allocation18_spill] sm:$0xff] %v6595_v62  ;;  %v6597_v63 = vld [vmem:[#allocation6 + $0x8c8] ss:$16 sps:$4 sm:$0xff]  }
 0x21c   :  { %7076 = vst [vmem:[#allocation19_spill] sm:$0xff] %v6597_v63 }
 0x21e   :  { %3147 = vmatpush2.bf16.msra.mxu0 %v5680_v2  ;;  %3186 = vmatpush2.bf16.msra.mxu1 %v5683_v3  ;;  %v6603_v3 = vld [vmem:[#allocation6 + $0x68c] ss:$16 sps:$4 sm:$0xff]  }
 0x21f   :  { %3148 = vmatprep.subr.bf16.mxu0 %v6474_v4  ;;  %3187 = vmatprep.subr.bf16.mxu1 %v6476_v5  ;;  %7077 = vst [vmem:[#allocation20_spill] sm:$0xff] %v6603_v3 }
 0x222   :  { %3149 = vmatpush2.bf16.msra.mxu0 %v6478_v51  ;;  %3188 = vmatpush2.bf16.msra.mxu1 %v6480_v6 }
 0x223   :  { %3150 = vmatprep.subr.bf16.mxu0 %v6484_v7  ;;  %3189 = vmatprep.subr.bf16.mxu1 %v6486_v8 }
 0x226   :  { %3151 = vmatpush2.bf16.msra.mxu0 %v6490_v9  ;;  %3190 = vmatpush2.bf16.msra.mxu1 %v6492_v10 }
 0x227   :  { %3152 = vmatprep.subr.bf16.mxu0 %v6496_v11  ;;  %3191 = vmatprep.subr.bf16.mxu1 %v6498_v26 }
 0x22a   :  { %3153 = vmatpush2.bf16.msra.mxu0 %v6502_v12  ;;  %3192 = vmatpush2.bf16.msra.mxu1 %v6504_v14 }
 0x22b   :  { %3154 = vmatprep.subr.bf16.mxu0 %v6508_v16  ;;  %3193 = vmatprep.subr.bf16.mxu1 %v6510_v54 }
 0x22e   :  { %3155 = vmatpush2.bf16.msra.mxu0 %v6514_v17  ;;  %3194 = vmatpush2.bf16.msra.mxu1 %v6516_v18 }
 0x22f   :  { %3156 = vmatprep.subr.bf16.mxu0 %v6520_v20  ;;  %3195 = vmatprep.subr.bf16.mxu1 %v6522_v22 }
 0x232   :  { %3157 = vmatpush2.bf16.msra.mxu0 %v6526_v24  ;;  %3196 = vmatpush2.bf16.msra.mxu1 %v6528_v27 }
 0x233   :  { %3158 = vmatprep.subr.bf16.mxu0 %v6532_v29  ;;  %3197 = vmatprep.subr.bf16.mxu1 %v6534_v30 }
 0x236   :  { %3159 = vmatpush2.bf16.msra.mxu0 %v6538_v0  ;;  %3198 = vmatpush2.bf16.msra.mxu1 %v6540_v34 }
 0x237   :  { %3199 = vmatprep.subr.bf16.mxu1 %v6544_v36  ;;  %3210 = vmatprep.subr.bf16.mxu0 %v6546_v28 }
 0x239   :  { %4991 = vmatmul.mubr.msk.bf16.vlgmr.msra.gmra.mxu0 %vm6400_vm3, %v6425_v37  ;;  %v2916_v47 = vpop.f32.mrf.mxu0 }
 0x23a   :  { %3200 = vmatpush2.bf16.msra.mxu1 %v6552_v40  ;;  %3211 = vmatpush1.bf16.msra.mxu0 %v6554_v31  ;;  %v2917_v55 = vadd.f32 %v2916_v47, %v6563_v42  ;;  %v6605_v47 = vld [vmem:[#allocation6 + $0x8ac] ss:$16 sps:$4 sm:$0xff]  }
 0x23b   :  { %3242 = vmatprep.mubr.bf16.mxu0 %v6435_v41  ;;  %v2918_v52 = vpop.f32.mrf.mxu0  ;;  %3212 = vmatprep.subr.bf16.mxu0 %v6558_v43  ;;  %7078 = vst [vmem:[#allocation21_spill] sm:$0xff] %v6605_v47 }
 0x23c   :  { %3251 = vmatprep.subr.bf16.mxu1 %v6565_v45  ;;  %v2919_v60 = vadd.f32 %v2918_v52, %v6575_v48 }
 0x23d   :  { %3202 = vmatmul.mubr.bf16.vlgmr.msra.gmra.mxu1 %v6441_v57  ;;  %v2920_v39 = vpop.f32.mrf.mxu0  ;;  %v2957_v58 = vpop.f32.mrf.mxu1 }
 0x23e   :  { %v6591_v61 = vadd.f32 %v2957_v58, %v2917_v55  ;;  %3213 = vmatpush1.bf16.msra.mxu0 %v6577_v50  ;;  %3252 = vmatpush1.bf16.msra.mxu1 %v6579_v35  ;;  %v6612_v39 = vld [vmem:[#allocation6 + $0x688] ss:$16 sps:$4 sm:$0xff]  }
 0x23f   :  { %4994 = vmatprep.mubr.msk.bf16.mxu1 %vm6443_vm5, %v6448_v15  ;;  %v2921_v1 = vpop.f32.mrf.mxu0  ;;  %v2959_v2 = vpop.f32.mrf.mxu1  ;;  %3214 = vmatprep.subr.bf16.mxu0 %v6583_v53  ;;  %7079 = vst [vmem:[#allocation22_spill] sm:$0xff] %v6612_v39  ;;  %v6614_v58 = vld [vmem:[#allocation6 + $0x8a8] ss:$16 sps:$4 sm:$0xff]   ;;  %v5976_v53 = vld [vmem:[#allocation6 + $0x684] ss:$16 sps:$4 sm:$0xff]  }
 0x240   :  { %v6607_v52 = vadd.f32 %v2959_v2, %v2919_v60  ;;  %3253 = vmatprep.subr.bf16.mxu1 %v6587_v56  ;;  %7080 = vst [vmem:[#allocation23_spill] sm:$0xff] %v6614_v58  ;;  %v6620_v60 = vld [vmem:[#allocation6 + $0x88c] ss:$16 sps:$4 sm:$0xff]   ;;  %v6624_v2 = vld [vmem:[#allocation6 + $0x668] ss:$16 sps:$4 sm:$0xff]  }
 0x241   :  { %v2961_v55 = vpop.f32.mrf.mxu1  ;;  %7082 = vst [vmem:[#allocation25_spill] sm:$0xff] %v6620_v60  ;;  %7083 = vst [vmem:[#allocation26_spill] sm:$0xff] %v6624_v2  ;;  %v5911_v56 = vld [vmem:[#allocation6 + $0x64] ss:$16 sps:$4 sm:$0xff]  }
 0x242   :  { %3215 = vmatpush1.bf16.msra.mxu0 %v6595_v62  ;;  %3254 = vmatpush1.bf16.msra.mxu1 %v6597_v63  ;;  %v6626_v55 = vld [vmem:[#allocation6 + $0x888] ss:$16 sps:$4 sm:$0xff]   ;;  %v5903_v63 = vld [vmem:[#allocation6 + $0xa4] ss:$16 sps:$4 sm:$0xff]   ;;  %v5906_v62 = vld [vmem:[#allocation6 + $0x2c0] ss:$16 sps:$4 sm:$0xff]  }
 0x243   :  { %v2962_v1 = vpop.f32.mrf.mxu1  ;;  %3216 = vmatprep.subr.bf16.mxu0 %v6603_v3  ;;  %3255 = vmatprep.subr.bf16.mxu1 %v6605_v47  ;;  %7084 = vst [vmem:[#allocation27_spill] sm:$0xff] %v6626_v55  ;;  %v6636_v47 = vld [vmem:[#allocation6 + $0x648] ss:$16 sps:$4 sm:$0xff]  }
 0x244   :  { %v6630_v1 = vld [vmem:[#allocation6 + $0x64c] ss:$16 sps:$4 sm:$0xff]   ;;  %7087 = vst [vmem:[#allocation30_spill] sm:$0xff] %v6636_v47 }
 0x245   :  { %7085 = vst [vmem:[#allocation28_spill] sm:$0xff] %v6630_v1 }
 0x246   :  { %3217 = vmatpush1.bf16.msra.mxu0 %v6612_v39  ;;  %3256 = vmatpush1.bf16.msra.mxu1 %v6614_v58  ;;  %v6638_v39 = vld [vmem:[#allocation6 + $0x868] ss:$16 sps:$4 sm:$0xff]   ;;  %v6642_v58 = vld [vmem:[#allocation6 + $0x62c] ss:$16 sps:$4 sm:$0xff]  }
 0x247   :  { %3218 = vmatprep.subr.bf16.mxu0 %v6618_v46  ;;  %3257 = vmatprep.subr.bf16.mxu1 %v6620_v60  ;;  %7088 = vst [vmem:[#allocation31_spill] sm:$0xff] %v6638_v39  ;;  %7089 = vst [vmem:[#allocation32_spill] sm:$0xff] %v6642_v58  ;;  %v6644_v46 = vld [vmem:[#allocation6 + $0x84c] ss:$16 sps:$4 sm:$0xff]   ;;  %v6648_v60 = vld [vmem:[#allocation6 + $0x628] ss:$16 sps:$4 sm:$0xff]  }
 0x248   :  { %7090 = vst [vmem:[#allocation33_spill] sm:$0xff] %v6644_v46  ;;  %7091 = vst [vmem:[#allocation34_spill] sm:$0xff] %v6648_v60 }
 0x24a   :  { %3219 = vmatpush1.bf16.msra.mxu0 %v6624_v2  ;;  %3258 = vmatpush1.bf16.msra.mxu1 %v6626_v55  ;;  %v6650_v2 = vld [vmem:[#allocation6 + $0x848] ss:$16 sps:$4 sm:$0xff]   ;;  %v6654_v55 = vld [vmem:[#allocation6 + $0x60c] ss:$16 sps:$4 sm:$0xff]  }
 0x24b   :  { %3220 = vmatprep.subr.bf16.mxu0 %v6630_v1  ;;  %3259 = vmatprep.subr.bf16.mxu1 %v6632_v44  ;;  %7092 = vst [vmem:[#allocation35_spill] sm:$0xff] %v6650_v2  ;;  %7093 = vst [vmem:[#allocation36_spill] sm:$0xff] %v6654_v55  ;;  %v6656_v1 = vld [vmem:[#allocation6 + $0x82c] ss:$16 sps:$4 sm:$0xff]   ;;  %v6660_v44 = vld [vmem:[#allocation6 + $0x608] ss:$16 sps:$4 sm:$0xff]  }
 0x24c   :  { %7094 = vst [vmem:[#allocation37_spill] sm:$0xff] %v6656_v1  ;;  %7095 = vst [vmem:[#allocation38_spill] sm:$0xff] %v6660_v44 }
 0x24e   :  { %3221 = vmatpush1.bf16.msra.mxu0 %v6636_v47  ;;  %3260 = vmatpush1.bf16.msra.mxu1 %v6638_v39  ;;  %v6662_v47 = vld [vmem:[#allocation6 + $0x828] ss:$16 sps:$4 sm:$0xff]   ;;  %v6666_v39 = vld [vmem:[#allocation6 + $0x7ec] ss:$16 sps:$4 sm:$0xff]  }
 0x24f   :  { %3222 = vmatprep.subr.bf16.mxu0 %v6642_v58  ;;  %3261 = vmatprep.subr.bf16.mxu1 %v6644_v46  ;;  %7096 = vst [vmem:[#allocation39_spill] sm:$0xff] %v6662_v47  ;;  %7097 = vst [vmem:[#allocation40_spill] sm:$0xff] %v6666_v39  ;;  %v6668_v58 = vld [vmem:[#allocation6 + $0x80c] ss:$16 sps:$4 sm:$0xff]   ;;  %v6672_v46 = vld [vmem:[#allocation6 + $0x7e8] ss:$16 sps:$4 sm:$0xff]  }
 0x250   :  { %7098 = vst [vmem:[#allocation41_spill] sm:$0xff] %v6668_v58  ;;  %7099 = vst [vmem:[#allocation42_spill] sm:$0xff] %v6672_v46 }
 0x252   :  { %3223 = vmatpush1.bf16.msra.mxu0 %v6648_v60  ;;  %3262 = vmatpush1.bf16.msra.mxu1 %v6650_v2  ;;  %v6674_v60 = vld [vmem:[#allocation6 + $0x808] ss:$16 sps:$4 sm:$0xff]   ;;  %v6678_v2 = vld [vmem:[#allocation6 + $0x7cc] ss:$16 sps:$4 sm:$0xff]  }
 0x253   :  { %3224 = vmatprep.subr.bf16.mxu0 %v6654_v55  ;;  %3263 = vmatprep.subr.bf16.mxu1 %v6656_v1  ;;  %7100 = vst [vmem:[#allocation43_spill] sm:$0xff] %v6674_v60  ;;  %7101 = vst [vmem:[#allocation44_spill] sm:$0xff] %v6678_v2  ;;  %v6680_v55 = vld [vmem:[#allocation6 + $0x9ec] ss:$16 sps:$4 sm:$0xff]   ;;  %v6684_v1 = vld [vmem:[#allocation6 + $0x7c8] ss:$16 sps:$4 sm:$0xff]  }
 0x254   :  { %7102 = vst [vmem:[#allocation45_spill] sm:$0xff] %v6680_v55  ;;  %7103 = vst [vmem:[#allocation46_spill] sm:$0xff] %v6684_v1 }
 0x256   :  { %3225 = vmatpush1.bf16.msra.mxu0 %v6660_v44  ;;  %3264 = vmatpush1.bf16.msra.mxu1 %v6662_v47  ;;  %v6686_v44 = vld [vmem:[#allocation6 + $0x9e8] ss:$16 sps:$4 sm:$0xff]   ;;  %v6690_v47 = vld [vmem:[#allocation6 + $0x7ac] ss:$16 sps:$4 sm:$0xff]  }
 0x257   :  { %3226 = vmatprep.subr.bf16.mxu0 %v6666_v39  ;;  %3265 = vmatprep.subr.bf16.mxu1 %v6668_v58  ;;  %7104 = vst [vmem:[#allocation47_spill] sm:$0xff] %v6686_v44  ;;  %7105 = vst [vmem:[#allocation48_spill] sm:$0xff] %v6690_v47  ;;  %v6692_v39 = vld [vmem:[#allocation6 + $0x9cc] ss:$16 sps:$4 sm:$0xff]   ;;  %v6696_v58 = vld [vmem:[#allocation6 + $0x7a8] ss:$16 sps:$4 sm:$0xff]  }
 0x258   :  { %7106 = vst [vmem:[#allocation49_spill] sm:$0xff] %v6692_v39  ;;  %7107 = vst [vmem:[#allocation50_spill] sm:$0xff] %v6696_v58 }
 0x25a   :  { %3227 = vmatpush2.bf16.msra.mxu0 %v6672_v46  ;;  %3266 = vmatpush1.bf16.msra.mxu1 %v6674_v60  ;;  %v6698_v46 = vld [vmem:[#allocation6 + $0x9c8] ss:$16 sps:$4 sm:$0xff]   ;;  %v6702_v60 = vld [vmem:[#allocation6 + $0x78c] ss:$16 sps:$4 sm:$0xff]  }
 0x25b   :  { %3228 = vmatprep.subr.bf16.mxu0 %v6678_v2  ;;  %3267 = vmatprep.subr.bf16.mxu1 %v6680_v55  ;;  %7108 = vst [vmem:[#allocation51_spill] sm:$0xff] %v6698_v46  ;;  %7109 = vst [vmem:[#allocation52_spill] sm:$0xff] %v6702_v60  ;;  %v6704_v2 = vld [vmem:[#allocation6 + $0x9ac] ss:$16 sps:$4 sm:$0xff]   ;;  %v6708_v55 = vld [vmem:[#allocation6 + $0x788] ss:$16 sps:$4 sm:$0xff]  }
 0x25c   :  { %7110 = vst [vmem:[#allocation53_spill] sm:$0xff] %v6704_v2  ;;  %7111 = vst [vmem:[#allocation54_spill] sm:$0xff] %v6708_v55 }
 0x25e   :  { %3229 = vmatpush2.bf16.msra.mxu0 %v6684_v1  ;;  %3268 = vmatpush2.bf16.msra.mxu1 %v6686_v44  ;;  %v6710_v1 = vld [vmem:[#allocation6 + $0x9a8] ss:$16 sps:$4 sm:$0xff]   ;;  %v6714_v44 = vld [vmem:[#allocation6 + $0x76c] ss:$16 sps:$4 sm:$0xff]  }
 0x25f   :  { %3230 = vmatprep.subr.bf16.mxu0 %v6690_v47  ;;  %3269 = vmatprep.subr.bf16.mxu1 %v6692_v39  ;;  %7112 = vst [vmem:[#allocation55_spill] sm:$0xff] %v6710_v1  ;;  %7113 = vst [vmem:[#allocation56_spill] sm:$0xff] %v6714_v44  ;;  %v6716_v47 = vld [vmem:[#allocation6 + $0x98c] ss:$16 sps:$4 sm:$0xff]   ;;  %v6720_v39 = vld [vmem:[#allocation6 + $0x768] ss:$16 sps:$4 sm:$0xff]  }
 0x260   :  { %7114 = vst [vmem:[#allocation57_spill] sm:$0xff] %v6716_v47  ;;  %7115 = vst [vmem:[#allocation58_spill] sm:$0xff] %v6720_v39 }
 0x262   :  { %3231 = vmatpush2.bf16.msra.mxu0 %v6696_v58  ;;  %3270 = vmatpush2.bf16.msra.mxu1 %v6698_v46  ;;  %v6722_v58 = vld [vmem:[#allocation6 + $0x988] ss:$16 sps:$4 sm:$0xff]   ;;  %v6726_v46 = vld [vmem:[#allocation6 + $0x74c] ss:$16 sps:$4 sm:$0xff]  }
 0x263   :  { %3232 = vmatprep.subr.bf16.mxu0 %v6702_v60  ;;  %3271 = vmatprep.subr.bf16.mxu1 %v6704_v2  ;;  %7116 = vst [vmem:[#allocation59_spill] sm:$0xff] %v6722_v58  ;;  %7117 = vst [vmem:[#allocation60_spill] sm:$0xff] %v6726_v46  ;;  %v6728_v60 = vld [vmem:[#allocation6 + $0x96c] ss:$16 sps:$4 sm:$0xff]   ;;  %v6732_v2 = vld [vmem:[#allocation6 + $0x748] ss:$16 sps:$4 sm:$0xff]  }
 0x264   :  { %7118 = vst [vmem:[#allocation61_spill] sm:$0xff] %v6728_v60  ;;  %7119 = vst [vmem:[#allocation62_spill] sm:$0xff] %v6732_v2 }
 0x266   :  { %3233 = vmatpush2.bf16.msra.mxu0 %v6708_v55  ;;  %3272 = vmatpush2.bf16.msra.mxu1 %v6710_v1  ;;  %v6734_v55 = vld [vmem:[#allocation6 + $0x968] ss:$16 sps:$4 sm:$0xff]   ;;  %v6738_v1 = vld [vmem:[#allocation6 + $0x72c] ss:$16 sps:$4 sm:$0xff]  }
 0x267   :  { %3234 = vmatprep.subr.bf16.mxu0 %v6714_v44  ;;  %3273 = vmatprep.subr.bf16.mxu1 %v6716_v47  ;;  %7120 = vst [vmem:[#allocation63_spill] sm:$0xff] %v6734_v55  ;;  %7121 = vst [vmem:[#allocation64_spill] sm:$0xff] %v6738_v1  ;;  %v6740_v44 = vld [vmem:[#allocation6 + $0x94c] ss:$16 sps:$4 sm:$0xff]   ;;  %v6744_v47 = vld [vmem:[#allocation6 + $0x728] ss:$16 sps:$4 sm:$0xff]  }
 0x268   :  { %7122 = vst [vmem:[#allocation65_spill] sm:$0xff] %v6740_v44  ;;  %7123 = vst [vmem:[#allocation66_spill] sm:$0xff] %v6744_v47 }
 0x26a   :  { %3235 = vmatpush2.bf16.msra.mxu0 %v6720_v39  ;;  %3274 = vmatpush2.bf16.msra.mxu1 %v6722_v58  ;;  %v6746_v39 = vld [vmem:[#allocation6 + $0x948] ss:$16 sps:$4 sm:$0xff]   ;;  %v6750_v58 = vld [vmem:[#allocation6 + $0x70c] ss:$16 sps:$4 sm:$0xff]  }
 0x26b   :  { %3236 = vmatprep.subr.bf16.mxu0 %v6726_v46  ;;  %3275 = vmatprep.subr.bf16.mxu1 %v6728_v60  ;;  %7124 = vst [vmem:[#allocation67_spill] sm:$0xff] %v6746_v39  ;;  %7125 = vst [vmem:[#allocation68_spill] sm:$0xff] %v6750_v58  ;;  %v6752_v46 = vld [vmem:[#allocation6 + $0x92c] ss:$16 sps:$4 sm:$0xff]   ;;  %v6756_v60 = vld [vmem:[#allocation6 + $0x708] ss:$16 sps:$4 sm:$0xff]  }
 0x26c   :  { %7126 = vst [vmem:[#allocation69_spill] sm:$0xff] %v6752_v46  ;;  %7127 = vst [vmem:[#allocation70_spill] sm:$0xff] %v6756_v60 }
 0x26e   :  { %3237 = vmatpush2.bf16.msra.mxu0 %v6732_v2  ;;  %3276 = vmatpush2.bf16.msra.mxu1 %v6734_v55  ;;  %v6758_v2 = vld [vmem:[#allocation6 + $0x928] ss:$16 sps:$4 sm:$0xff]   ;;  %v6762_v55 = vld [vmem:[#allocation6 + $0x90c] ss:$16 sps:$4 sm:$0xff]  }
 0x26f   :  { %3238 = vmatprep.subr.bf16.mxu0 %v6738_v1  ;;  %3277 = vmatprep.subr.bf16.mxu1 %v6740_v44  ;;  %7128 = vst [vmem:[#allocation71_spill] sm:$0xff] %v6758_v2  ;;  %7129 = vst [vmem:[#allocation72_spill] sm:$0xff] %v6762_v55  ;;  %v6766_v44 = vld [vmem:[#allocation6 + $0x908] ss:$16 sps:$4 sm:$0xff]  }
 0x270   :  { %7130 = vst [vmem:[#allocation73_spill] sm:$0xff] %v6766_v44 }
 0x272   :  { %3239 = vmatpush2.bf16.msra.mxu0 %v6744_v47  ;;  %3278 = vmatpush2.bf16.msra.mxu1 %v6746_v39  ;;  %v5897_v47 = vld [vmem:[#allocation6 + $0xe4] ss:$16 sps:$4 sm:$0xff]  }
 0x273   :  { %3240 = vmatprep.subr.bf16.mxu0 %v6750_v58  ;;  %3279 = vmatprep.subr.bf16.mxu1 %v6752_v46  ;;  %v5898_v46 = vld [vmem:[#allocation6 + $0xe0] ss:$16 sps:$4 sm:$0xff]   ;;  %v5900_v58 = vld [vmem:[#allocation6 + $0x2e4] ss:$16 sps:$4 sm:$0xff]  }
 0x276   :  { %3241 = vmatpush2.bf16.msra.mxu0 %v6756_v60  ;;  %3280 = vmatpush2.bf16.msra.mxu1 %v6758_v2  ;;  %v5899_v60 = vld [vmem:[#allocation6 + $0xc4] ss:$16 sps:$4 sm:$0xff]  }
 0x277   :  { %3281 = vmatprep.subr.bf16.mxu1 %v6762_v55  ;;  %3310 = vmatprep.subr.bf16.mxu0 %v5897_v47 }
 0x279   :  { %v2998_v39 = vpop.f32.mrf.mxu0  ;;  %3243 = vmatmul.mubr.bf16.vlgmr.msra.gmra.mxu0 %v6455_v49 }
 0x27a   :  { %v2999_v1 = vadd.f32 %v2998_v39, %v6591_v61  ;;  %3282 = vmatpush2.bf16.msra.mxu1 %v6766_v44  ;;  %3311 = vmatpush1.bf16.msra.mxu0 %v5898_v46  ;;  %v5901_v46 = vld [vmem:[#allocation6 + $0xc0] ss:$16 sps:$4 sm:$0xff]  }
 0x27b   :  { %5002 = vmatprep.mubr.msk.bf16.mxu0 %vm6400_vm3, %v6423_v33  ;;  %v3000_v2 = vpop.f32.mrf.mxu0  ;;  %3312 = vmatprep.subr.bf16.mxu0 %v5899_v60  ;;  %v5902_v39 = vld [vmem:[#allocation6 + $0x2e0] ss:$16 sps:$4 sm:$0xff]  }
 0x27c   :  { %v3001_v55 = vadd.f32 %v3000_v2, %v6607_v52  ;;  %3351 = vmatprep.subr.bf16.mxu1 %v5900_v58  ;;  %v5904_v58 = vld [vmem:[#allocation6 + $0x2c4] ss:$16 sps:$4 sm:$0xff]  }
 0x27d   :  { %v3002_v47 = vpop.f32.mrf.mxu0  ;;  %v3039_v3 = vpop.f32.mrf.mxu1  ;;  %4997 = vmatmul.mubr.msk.bf16.vlgmr.msra.gmra.mxu1 %vm6443_vm5, %v6462_v13 }
 0x27e   :  { %v6779_v61 = vadd.f32 %v3039_v3, %v2999_v1  ;;  %3313 = vmatpush1.bf16.msra.mxu0 %v5901_v46  ;;  %3352 = vmatpush1.bf16.msra.mxu1 %v5902_v39  ;;  %v5905_v47 = vld [vmem:[#allocation6 + $0xa0] ss:$16 sps:$4 sm:$0xff]   ;;  %v5907_v1 = vld [vmem:[#allocation6 + $0x84] ss:$16 sps:$4 sm:$0xff]  }
 0x27f   :  { %3383 = vmatprep.mubr.bf16.mxu1 %v6416_v32  ;;  %v3003_v44 = vpop.f32.mrf.mxu0  ;;  %v3041_v60 = vpop.f32.mrf.mxu1  ;;  %3314 = vmatprep.subr.bf16.mxu0 %v5903_v63  ;;  %v5908_v46 = vld [vmem:[#allocation6 + $0x2a4] ss:$16 sps:$4 sm:$0xff]   ;;  %v5909_v39 = vld [vmem:[#allocation6 + $0x80] ss:$16 sps:$4 sm:$0xff]  }
 0x280   :  { %v6782_v52 = vadd.f32 %v3041_v60, %v3001_v55  ;;  %3353 = vmatprep.subr.bf16.mxu1 %v5904_v58  ;;  %v5910_v44 = vld [vmem:[#allocation6 + $0x2a0] ss:$16 sps:$4 sm:$0xff]   ;;  %v5912_v63 = vld [vmem:[#allocation6 + $0x284] ss:$16 sps:$4 sm:$0xff]  }
 0x281   :  { %v3043_v2 = vpop.f32.mrf.mxu1  ;;  %v5913_v55 = vld [vmem:[#allocation6 + $0x60] ss:$16 sps:$4 sm:$0xff]   ;;  %v5915_v58 = vld [vmem:[#allocation6 + $0x44] ss:$16 sps:$4 sm:$0xff]  }
 0x282   :  { %3315 = vmatpush1.bf16.msra.mxu0 %v5905_v47  ;;  %3354 = vmatpush1.bf16.msra.mxu1 %v5906_v62  ;;  %v5914_v60 = vld [vmem:[#allocation6 + $0x280] ss:$16 sps:$4 sm:$0xff]   ;;  %v5916_v62 = vld [vmem:[#allocation6 + $0x264] ss:$16 sps:$4 sm:$0xff]  }
 0x283   :  { %v3044_v3 = vpop.f32.mrf.mxu1  ;;  %3316 = vmatprep.subr.bf16.mxu0 %v5907_v1  ;;  %3355 = vmatprep.subr.bf16.mxu1 %v5908_v46  ;;  %v5917_v2 = vld [vmem:[#allocation6 + $0x40] ss:$16 sps:$4 sm:$0xff]   ;;  %v5920_v1 = vld [vmem:[#allocation6 + $0x244] ss:$16 sps:$4 sm:$0xff]  }
 0x284   :  { %v5918_v47 = vld [vmem:[#allocation6 + $0x260] ss:$16 sps:$4 sm:$0xff]   ;;  %v5919_v3 = vld [vmem:[#allocation6 + $0x24] ss:$16 sps:$4 sm:$0xff]  }
 0x285   :  { %v5921_v46 = vld [vmem:[#allocation6 + $0x20] ss:$16 sps:$4 sm:$0xff]  }
 0x286   :  { %3317 = vmatpush1.bf16.msra.mxu0 %v5909_v39  ;;  %3356 = vmatpush1.bf16.msra.mxu1 %v5910_v44  ;;  %v5923_v39 = vld [vmem:[#allocation6 + $0x4] ss:$16 sps:$4 sm:$0xff]  }
 0x287   :  { %3318 = vmatprep.subr.bf16.mxu0 %v5911_v56  ;;  %3357 = vmatprep.subr.bf16.mxu1 %v5912_v63  ;;  %v5922_v56 = vld [vmem:[#allocation6 + $0x240] ss:$16 sps:$4 sm:$0xff]   ;;  %v5924_v44 = vld [vmem:[#allocation6 + $0x224] ss:$16 sps:$4 sm:$0xff]  }
 0x288   :  { %v5925_v63 = vld [vmem:[#allocation6] ss:$16 sps:$4 sm:$0xff]  }
 0x28a   :  { %3319 = vmatpush1.bf16.msra.mxu0 %v5913_v55  ;;  %3358 = vmatpush1.bf16.msra.mxu1 %v5914_v60  ;;  %v5926_v55 = vld [vmem:[#allocation6 + $0x220] ss:$16 sps:$4 sm:$0xff]   ;;  %v5927_v60 = vld [vmem:[#allocation6 + $0x1e4] ss:$16 sps:$4 sm:$0xff]  }
 0x28b   :  { %3320 = vmatprep.subr.bf16.mxu0 %v5915_v58  ;;  %3359 = vmatprep.subr.bf16.mxu1 %v5916_v62  ;;  %v5928_v58 = vld [vmem:[#allocation6 + $0x204] ss:$16 sps:$4 sm:$0xff]   ;;  %v5929_v62 = vld [vmem:[#allocation6 + $0x1e0] ss:$16 sps:$4 sm:$0xff]  }
 0x28e   :  { %3321 = vmatpush1.bf16.msra.mxu0 %v5917_v2  ;;  %3360 = vmatpush1.bf16.msra.mxu1 %v5918_v47  ;;  %v5930_v2 = vld [vmem:[#allocation6 + $0x200] ss:$16 sps:$4 sm:$0xff]   ;;  %v5931_v47 = vld [vmem:[#allocation6 + $0x1c4] ss:$16 sps:$4 sm:$0xff]  }
 0x28f   :  { %3322 = vmatprep.subr.bf16.mxu0 %v5919_v3  ;;  %3361 = vmatprep.subr.bf16.mxu1 %v5920_v1  ;;  %v5932_v3 = vld [vmem:[#allocation6 + $0x3e4] ss:$16 sps:$4 sm:$0xff]   ;;  %v5933_v1 = vld [vmem:[#allocation6 + $0x1c0] ss:$16 sps:$4 sm:$0xff]  }
 0x292   :  { %3323 = vmatpush1.bf16.msra.mxu0 %v5921_v46  ;;  %3362 = vmatpush1.bf16.msra.mxu1 %v5922_v56  ;;  %v5934_v46 = vld [vmem:[#allocation6 + $0x3e0] ss:$16 sps:$4 sm:$0xff]   ;;  %v5935_v56 = vld [vmem:[#allocation6 + $0x1a4] ss:$16 sps:$4 sm:$0xff]  }
 0x293   :  { %3324 = vmatprep.subr.bf16.mxu0 %v5923_v39  ;;  %3363 = vmatprep.subr.bf16.mxu1 %v5924_v44  ;;  %v5936_v39 = vld [vmem:[#allocation6 + $0x3c4] ss:$16 sps:$4 sm:$0xff]   ;;  %v5937_v44 = vld [vmem:[#allocation6 + $0x1a0] ss:$16 sps:$4 sm:$0xff]  }
 0x296   :  { %3325 = vmatpush1.bf16.msra.mxu0 %v5925_v63  ;;  %3364 = vmatpush1.bf16.msra.mxu1 %v5926_v55  ;;  %v5938_v63 = vld [vmem:[#allocation6 + $0x3c0] ss:$16 sps:$4 sm:$0xff]   ;;  %v5939_v55 = vld [vmem:[#allocation6 + $0x184] ss:$16 sps:$4 sm:$0xff]  }
 0x297   :  { %3326 = vmatprep.subr.bf16.mxu0 %v5927_v60  ;;  %3365 = vmatprep.subr.bf16.mxu1 %v5928_v58  ;;  %v5940_v60 = vld [vmem:[#allocation6 + $0x3a4] ss:$16 sps:$4 sm:$0xff]   ;;  %v5941_v58 = vld [vmem:[#allocation6 + $0x180] ss:$16 sps:$4 sm:$0xff]  }
 0x29a   :  { %3327 = vmatpush2.bf16.msra.mxu0 %v5929_v62  ;;  %3366 = vmatpush1.bf16.msra.mxu1 %v5930_v2  ;;  %v5942_v62 = vld [vmem:[#allocation6 + $0x3a0] ss:$16 sps:$4 sm:$0xff]   ;;  %v5943_v2 = vld [vmem:[#allocation6 + $0x164] ss:$16 sps:$4 sm:$0xff]  }
 0x29b   :  { %3328 = vmatprep.subr.bf16.mxu0 %v5931_v47  ;;  %3367 = vmatprep.subr.bf16.mxu1 %v5932_v3  ;;  %v5944_v47 = vld [vmem:[#allocation6 + $0x384] ss:$16 sps:$4 sm:$0xff]   ;;  %v5945_v3 = vld [vmem:[#allocation6 + $0x160] ss:$16 sps:$4 sm:$0xff]  }
 0x29e   :  { %3329 = vmatpush2.bf16.msra.mxu0 %v5933_v1  ;;  %3368 = vmatpush2.bf16.msra.mxu1 %v5934_v46  ;;  %v5946_v1 = vld [vmem:[#allocation6 + $0x380] ss:$16 sps:$4 sm:$0xff]   ;;  %v5947_v46 = vld [vmem:[#allocation6 + $0x144] ss:$16 sps:$4 sm:$0xff]  }
 0x29f   :  { %3330 = vmatprep.subr.bf16.mxu0 %v5935_v56  ;;  %3369 = vmatprep.subr.bf16.mxu1 %v5936_v39  ;;  %v5948_v56 = vld [vmem:[#allocation6 + $0x364] ss:$16 sps:$4 sm:$0xff]   ;;  %v5949_v39 = vld [vmem:[#allocation6 + $0x140] ss:$16 sps:$4 sm:$0xff]  }
 0x2a2   :  { %3331 = vmatpush2.bf16.msra.mxu0 %v5937_v44  ;;  %3370 = vmatpush2.bf16.msra.mxu1 %v5938_v63  ;;  %v5950_v44 = vld [vmem:[#allocation6 + $0x360] ss:$16 sps:$4 sm:$0xff]   ;;  %v5951_v63 = vld [vmem:[#allocation6 + $0x124] ss:$16 sps:$4 sm:$0xff]  }
 0x2a3   :  { %3332 = vmatprep.subr.bf16.mxu0 %v5939_v55  ;;  %3371 = vmatprep.subr.bf16.mxu1 %v5940_v60  ;;  %v5952_v55 = vld [vmem:[#allocation6 + $0x344] ss:$16 sps:$4 sm:$0xff]   ;;  %v5953_v60 = vld [vmem:[#allocation6 + $0x120] ss:$16 sps:$4 sm:$0xff]  }
 0x2a6   :  { %3333 = vmatpush2.bf16.msra.mxu0 %v5941_v58  ;;  %3372 = vmatpush2.bf16.msra.mxu1 %v5942_v62  ;;  %v5954_v58 = vld [vmem:[#allocation6 + $0x340] ss:$16 sps:$4 sm:$0xff]   ;;  %v5955_v62 = vld [vmem:[#allocation6 + $0x104] ss:$16 sps:$4 sm:$0xff]  }
 0x2a7   :  { %3334 = vmatprep.subr.bf16.mxu0 %v5943_v2  ;;  %3373 = vmatprep.subr.bf16.mxu1 %v5944_v47  ;;  %v5956_v2 = vld [vmem:[#allocation6 + $0x324] ss:$16 sps:$4 sm:$0xff]   ;;  %v5957_v47 = vld [vmem:[#allocation6 + $0x100] ss:$16 sps:$4 sm:$0xff]  }
 0x2aa   :  { %3335 = vmatpush2.bf16.msra.mxu0 %v5945_v3  ;;  %3374 = vmatpush2.bf16.msra.mxu1 %v5946_v1  ;;  %v5958_v3 = vld [vmem:[#allocation6 + $0x320] ss:$16 sps:$4 sm:$0xff]   ;;  %v5959_v1 = vld [vmem:[#allocation6 + $0x304] ss:$16 sps:$4 sm:$0xff]  }
 0x2ab   :  { %3336 = vmatprep.subr.bf16.mxu0 %v5947_v46  ;;  %3375 = vmatprep.subr.bf16.mxu1 %v5948_v56  ;;  %v5960_v46 = vld [vmem:[#allocation6 + $0x4e4] ss:$16 sps:$4 sm:$0xff]  }
 0x2ae   :  { %3337 = vmatpush2.bf16.msra.mxu0 %v5949_v39  ;;  %3376 = vmatpush2.bf16.msra.mxu1 %v5950_v44  ;;  %v5961_v44 = vld [vmem:[#allocation6 + $0x300] ss:$16 sps:$4 sm:$0xff]  }
 0x2af   :  { %3338 = vmatprep.subr.bf16.mxu0 %v5951_v63  ;;  %3377 = vmatprep.subr.bf16.mxu1 %v5952_v55  ;;  %v5962_v63 = vld [vmem:[#allocation6 + $0x4e0] ss:$16 sps:$4 sm:$0xff]  }
 0x2b2   :  { %3339 = vmatpush2.bf16.msra.mxu0 %v5953_v60  ;;  %3378 = vmatpush2.bf16.msra.mxu1 %v5954_v58  ;;  %v5963_v60 = vld [vmem:[#allocation6 + $0x4c4] ss:$16 sps:$4 sm:$0xff]  }
 0x2b3   :  { %3340 = vmatprep.subr.bf16.mxu0 %v5955_v62  ;;  %3379 = vmatprep.subr.bf16.mxu1 %v5956_v2  ;;  %v5964_v62 = vld [vmem:[#allocation6 + $0x6e4] ss:$16 sps:$4 sm:$0xff]  }
 0x2b6   :  { %3341 = vmatpush2.bf16.msra.mxu0 %v5957_v47  ;;  %3380 = vmatpush2.bf16.msra.mxu1 %v5958_v3  ;;  %v5966_v3 = vld [vmem:[#allocation6 + $0x6e0] ss:$16 sps:$4 sm:$0xff]  }
 0x2b7   :  { %3381 = vmatprep.subr.bf16.mxu1 %v5959_v1  ;;  %3392 = vmatprep.subr.bf16.mxu0 %v5960_v46 }
 0x2b9   :  { %v3080_v56 = vpop.f32.mrf.mxu0  ;;  %5007 = vmatmul.mubr.msk.bf16.vlgmr.msra.gmra.mxu0 %vm6400_vm3, %v6425_v37 }
 0x2ba   :  { %v6788_v39 = vadd.f32 %v3080_v56, %v6779_v61  ;;  %3382 = vmatpush2.bf16.msra.mxu1 %v5961_v44  ;;  %3393 = vmatpush1.bf16.msra.mxu0 %v5962_v63  ;;  %v5965_v61 = vld [vmem:[#allocation6 + $0x4c0] ss:$16 sps:$4 sm:$0xff]   ;;  %v5968_v56 = vld [vmem:[#allocation6 + $0x6c4] ss:$16 sps:$4 sm:$0xff]  }
 0x2bb   :  { %3424 = vmatprep.mubr.bf16.mxu0 %v6435_v41  ;;  %v3082_v55 = vpop.f32.mrf.mxu0  ;;  %3394 = vmatprep.subr.bf16.mxu0 %v5963_v60  ;;  %v5969_v63 = vld [vmem:[#allocation6 + $0x4a0] ss:$16 sps:$4 sm:$0xff]  }
 0x2bc   :  { %v6792_v58 = vadd.f32 %v3082_v55, %v6782_v52  ;;  %3433 = vmatprep.subr.bf16.mxu1 %v5964_v62  ;;  %v5967_v52 = vld [vmem:[#allocation6 + $0x4a4] ss:$16 sps:$4 sm:$0xff]   ;;  %v5970_v55 = vld [vmem:[#allocation6 + $0x6c0] ss:$16 sps:$4 sm:$0xff]  }
 0x2bd   :  { %v3084_v2 = vpop.f32.mrf.mxu0  ;;  %v6794_v47 = vpop.f32.mrf.mxu1  ;;  %3384 = vmatmul.mubr.bf16.vlgmr.msra.gmra.mxu1 %v6441_v57  ;;  %v5971_v62 = vld [vmem:[#allocation6 + $0x484] ss:$16 sps:$4 sm:$0xff]  }
 0x2be   :  { %3395 = vmatpush1.bf16.msra.mxu0 %v5965_v61  ;;  %3434 = vmatpush1.bf16.msra.mxu1 %v5966_v3  ;;  %v5972_v2 = vld [vmem:[#allocation6 + $0x6a4] ss:$16 sps:$4 sm:$0xff]   ;;  %v5973_v61 = vld [vmem:[#allocation6 + $0x480] ss:$16 sps:$4 sm:$0xff]  }
 0x2bf   :  { %5010 = vmatprep.mubr.msk.bf16.mxu1 %vm6443_vm5, %v6448_v15  ;;  %v3085_v1 = vpop.f32.mrf.mxu0  ;;  %v6800_v46 = vpop.f32.mrf.mxu1  ;;  %3396 = vmatprep.subr.bf16.mxu0 %v5967_v52  ;;  %v5974_v3 = vld [vmem:[#allocation6 + $0x6a0] ss:$16 sps:$4 sm:$0xff]  }
 0x2c0   :  { %3435 = vmatprep.subr.bf16.mxu1 %v5968_v56  ;;  %v5975_v1 = vld [vmem:[#allocation6 + $0x464] ss:$16 sps:$4 sm:$0xff]   ;;  %v5977_v52 = vld [vmem:[#allocation6 + $0x460] ss:$16 sps:$4 sm:$0xff]  }
 0x2c1   :  { %v3125_v44 = vpop.f32.mrf.mxu1  ;;  %v5978_v56 = vld [vmem:[#allocation6 + $0x680] ss:$16 sps:$4 sm:$0xff]  }
 0x2c2   :  { %3397 = vmatpush1.bf16.msra.mxu0 %v5969_v63  ;;  %3436 = vmatpush1.bf16.msra.mxu1 %v5970_v55  ;;  %v5979_v44 = vld [vmem:[#allocation6 + $0x444] ss:$16 sps:$4 sm:$0xff]   ;;  %v5981_v55 = vld [vmem:[#allocation6 + $0x440] ss:$16 sps:$4 sm:$0xff]  }
 0x2c3   :  { %v3126_v60 = vpop.f32.mrf.mxu1  ;;  %3398 = vmatprep.subr.bf16.mxu0 %v5971_v62  ;;  %3437 = vmatprep.subr.bf16.mxu1 %v5972_v2  ;;  %v5980_v63 = vld [vmem:[#allocation6 + $0x664] ss:$16 sps:$4 sm:$0xff]  }
 0x2c4   :  { %v5982_v60 = vld [vmem:[#allocation6 + $0x660] ss:$16 sps:$4 sm:$0xff]   ;;  %v5983_v62 = vld [vmem:[#allocation6 + $0x424] ss:$16 sps:$4 sm:$0xff]  }
 0x2c5   :  { %v5984_v2 = vld [vmem:[#allocation6 + $0x644] ss:$16 sps:$4 sm:$0xff]  }
 0x2c6   :  { %3399 = vmatpush1.bf16.msra.mxu0 %v5973_v61  ;;  %3438 = vmatpush1.bf16.msra.mxu1 %v5974_v3  ;;  %v5985_v61 = vld [vmem:[#allocation6 + $0x420] ss:$16 sps:$4 sm:$0xff]  }
 0x2c7   :  { %3400 = vmatprep.subr.bf16.mxu0 %v5975_v1  ;;  %3439 = vmatprep.subr.bf16.mxu1 %v5976_v53  ;;  %v5986_v3 = vld [vmem:[#allocation6 + $0x640] ss:$16 sps:$4 sm:$0xff]   ;;  %v5987_v53 = vld [vmem:[#allocation6 + $0x404] ss:$16 sps:$4 sm:$0xff]  }
 0x2c8   :  { %v5988_v1 = vld [vmem:[#allocation6 + $0x624] ss:$16 sps:$4 sm:$0xff]  }
 0x2ca   :  { %3401 = vmatpush1.bf16.msra.mxu0 %v5977_v52  ;;  %3440 = vmatpush1.bf16.msra.mxu1 %v5978_v56  ;;  %v5989_v52 = vld [vmem:[#allocation6 + $0x400] ss:$16 sps:$4 sm:$0xff]  }
 0x2cb   :  { %3402 = vmatprep.subr.bf16.mxu0 %v5979_v44  ;;  %3441 = vmatprep.subr.bf16.mxu1 %v5980_v63  ;;  %v5990_v56 = vld [vmem:[#allocation6 + $0x620] ss:$16 sps:$4 sm:$0xff]   ;;  %v5991_v44 = vld [vmem:[#allocation6 + $0x5e4] ss:$16 sps:$4 sm:$0xff]  }
 0x2cc   :  { %v5992_v63 = vld [vmem:[#allocation6 + $0x604] ss:$16 sps:$4 sm:$0xff]  }
 0x2ce   :  { %3403 = vmatpush1.bf16.msra.mxu0 %v5981_v55  ;;  %3442 = vmatpush1.bf16.msra.mxu1 %v5982_v60  ;;  %v5993_v55 = vld [vmem:[#allocation6 + $0x5e0] ss:$16 sps:$4 sm:$0xff]  }
 0x2cf   :  { %3404 = vmatprep.subr.bf16.mxu0 %v5983_v62  ;;  %3443 = vmatprep.subr.bf16.mxu1 %v5984_v2  ;;  %v5994_v60 = vld [vmem:[#allocation6 + $0x600] ss:$16 sps:$4 sm:$0xff]   ;;  %v5995_v62 = vld [vmem:[#allocation6 + $0x5c4] ss:$16 sps:$4 sm:$0xff]  }
 0x2d0   :  { %v5996_v2 = vld [vmem:[#allocation6 + $0x7e4] ss:$16 sps:$4 sm:$0xff]  }
 0x2d2   :  { %3405 = vmatpush1.bf16.msra.mxu0 %v5985_v61  ;;  %3444 = vmatpush1.bf16.msra.mxu1 %v5986_v3  ;;  %v5997_v61 = vld [vmem:[#allocation6 + $0x5c0] ss:$16 sps:$4 sm:$0xff]  }
 0x2d3   :  { %3406 = vmatprep.subr.bf16.mxu0 %v5987_v53  ;;  %3445 = vmatprep.subr.bf16.mxu1 %v5988_v1  ;;  %v5998_v3 = vld [vmem:[#allocation6 + $0x7e0] ss:$16 sps:$4 sm:$0xff]   ;;  %v5999_v53 = vld [vmem:[#allocation6 + $0x5a4] ss:$16 sps:$4 sm:$0xff]  }
 0x2d4   :  { %v6000_v1 = vld [vmem:[#allocation6 + $0x7c4] ss:$16 sps:$4 sm:$0xff]  }
 0x2d6   :  { %3407 = vmatpush1.bf16.msra.mxu0 %v5989_v52  ;;  %3446 = vmatpush1.bf16.msra.mxu1 %v5990_v56  ;;  %v6001_v52 = vld [vmem:[#allocation6 + $0x5a0] ss:$16 sps:$4 sm:$0xff]  }
 0x2d7   :  { %3408 = vmatprep.subr.bf16.mxu0 %v5991_v44  ;;  %3447 = vmatprep.subr.bf16.mxu1 %v5992_v63  ;;  %v6002_v56 = vld [vmem:[#allocation6 + $0x7c0] ss:$16 sps:$4 sm:$0xff]   ;;  %v6003_v44 = vld [vmem:[#allocation6 + $0x584] ss:$16 sps:$4 sm:$0xff]  }
 0x2d8   :  { %v6004_v63 = vld [vmem:[#allocation6 + $0x7a4] ss:$16 sps:$4 sm:$0xff]  }
 0x2da   :  { %3409 = vmatpush2.bf16.msra.mxu0 %v5993_v55  ;;  %3448 = vmatpush1.bf16.msra.mxu1 %v5994_v60  ;;  %v6005_v55 = vld [vmem:[#allocation6 + $0x580] ss:$16 sps:$4 sm:$0xff]  }
 0x2db   :  { %3410 = vmatprep.subr.bf16.mxu0 %v5995_v62  ;;  %3449 = vmatprep.subr.bf16.mxu1 %v5996_v2  ;;  %v6006_v60 = vld [vmem:[#allocation6 + $0x7a0] ss:$16 sps:$4 sm:$0xff]   ;;  %v6007_v62 = vld [vmem:[#allocation6 + $0x564] ss:$16 sps:$4 sm:$0xff]  }
 0x2dc   :  { %v6008_v2 = vld [vmem:[#allocation6 + $0x784] ss:$16 sps:$4 sm:$0xff]  }
 0x2de   :  { %3411 = vmatpush2.bf16.msra.mxu0 %v5997_v61  ;;  %3450 = vmatpush2.bf16.msra.mxu1 %v5998_v3  ;;  %v6009_v61 = vld [vmem:[#allocation6 + $0x560] ss:$16 sps:$4 sm:$0xff]  }
 0x2df   :  { %3412 = vmatprep.subr.bf16.mxu0 %v5999_v53  ;;  %3451 = vmatprep.subr.bf16.mxu1 %v6000_v1  ;;  %v6010_v3 = vld [vmem:[#allocation6 + $0x780] ss:$16 sps:$4 sm:$0xff]   ;;  %v6011_v53 = vld [vmem:[#allocation6 + $0x544] ss:$16 sps:$4 sm:$0xff]  }
 0x2e0   :  { %v6012_v1 = vld [vmem:[#allocation6 + $0x764] ss:$16 sps:$4 sm:$0xff]  }
 0x2e2   :  { %3413 = vmatpush2.bf16.msra.mxu0 %v6001_v52  ;;  %3452 = vmatpush2.bf16.msra.mxu1 %v6002_v56  ;;  %v6013_v52 = vld [vmem:[#allocation6 + $0x540] ss:$16 sps:$4 sm:$0xff]  }
 0x2e3   :  { %3414 = vmatprep.subr.bf16.mxu0 %v6003_v44  ;;  %3453 = vmatprep.subr.bf16.mxu1 %v6004_v63  ;;  %v6014_v56 = vld [vmem:[#allocation6 + $0x760] ss:$16 sps:$4 sm:$0xff]   ;;  %v6015_v44 = vld [vmem:[#allocation6 + $0x524] ss:$16 sps:$4 sm:$0xff]  }
 0x2e4   :  { %v6016_v63 = vld [vmem:[#allocation6 + $0x744] ss:$16 sps:$4 sm:$0xff]  }
 0x2e6   :  { %3415 = vmatpush2.bf16.msra.mxu0 %v6005_v55  ;;  %3454 = vmatpush2.bf16.msra.mxu1 %v6006_v60  ;;  %v6017_v55 = vld [vmem:[#allocation6 + $0x520] ss:$16 sps:$4 sm:$0xff]  }
 0x2e7   :  { %3416 = vmatprep.subr.bf16.mxu0 %v6007_v62  ;;  %3455 = vmatprep.subr.bf16.mxu1 %v6008_v2  ;;  %v6018_v60 = vld [vmem:[#allocation6 + $0x740] ss:$16 sps:$4 sm:$0xff]   ;;  %v6019_v62 = vld [vmem:[#allocation6 + $0x504] ss:$16 sps:$4 sm:$0xff]  }
 0x2e8   :  { %v6020_v2 = vld [vmem:[#allocation6 + $0x724] ss:$16 sps:$4 sm:$0xff]  }
 0x2ea   :  { %3417 = vmatpush2.bf16.msra.mxu0 %v6009_v61  ;;  %3456 = vmatpush2.bf16.msra.mxu1 %v6010_v3  ;;  %v7131_v61 = vsub.s32 2, %v6365_v19 }
 0x2eb   :  { %3418 = vmatprep.subr.bf16.mxu0 %v6011_v53  ;;  %3457 = vmatprep.subr.bf16.mxu1 %v6012_v1  ;;  %v3303_v53 = vrot.slane %v6404_v25, 2  ;;  %v7132_v1 = vsub.s32 3, %v6365_v19 }
 0x2ec   :  { %v6805_v3 = vrot.slane %v6548_v38, %v7131_v61  ;;  %v6026_v61 = vld [vmem:[#allocation6 + $0x8e0] ss:$16 sps:$4 sm:$0xff]  }
 0x2ed   :  { %v6816_v25 = vpack.c.bf16 %v3303_v53, %v3303_v53 }
 0x2ee   :  { %3419 = vmatpush2.bf16.msra.mxu0 %v6013_v52  ;;  %3458 = vmatpush2.bf16.msra.mxu1 %v6014_v56  ;;  %v6811_v52 = vrot.slane %v6548_v38, %v7132_v1  ;;  %v6021_v56 = vld [vmem:[#allocation6 + $0x500] ss:$16 sps:$4 sm:$0xff]  }
 0x2ef   :  { %3420 = vmatprep.subr.bf16.mxu0 %v6015_v44  ;;  %3459 = vmatprep.subr.bf16.mxu1 %v6016_v63  ;;  %v6022_v44 = vld [vmem:[#allocation6 + $0x720] ss:$16 sps:$4 sm:$0xff]   ;;  %v6023_v63 = vld [vmem:[#allocation6 + $0x704] ss:$16 sps:$4 sm:$0xff]  }
 0x2f0   :  { %v3124_v19 = vadd.f32 %v6800_v46, %v6811_v52 }
 0x2f2   :  { %3421 = vmatpush2.bf16.msra.mxu0 %v6017_v55  ;;  %3460 = vmatpush2.bf16.msra.mxu1 %v6018_v60  ;;  %v6024_v55 = vld [vmem:[#allocation6 + $0x8e4] ss:$16 sps:$4 sm:$0xff]   ;;  %v3122_v60 = vadd.f32 %v6794_v47, %v6805_v3 }
 0x2f3   :  { %3422 = vmatprep.subr.bf16.mxu0 %v6019_v62  ;;  %3461 = vmatprep.subr.bf16.mxu1 %v6020_v2  ;;  %v6025_v2 = vld [vmem:[#allocation6 + $0x700] ss:$16 sps:$4 sm:$0xff]  }
 0x2f6   :  { %3423 = vmatpush2.bf16.msra.mxu0 %v6021_v56  ;;  %3462 = vmatpush2.bf16.msra.mxu1 %v6022_v44  ;;  %v6027_v56 = vld [vmem:[#allocation6 + $0x8c4] ss:$16 sps:$4 sm:$0xff]   ;;  %v6028_v44 = vld [vmem:[#allocation6 + $0xec] ss:$16 sps:$4 sm:$0xff]  }
 0x2f7   :  { %3463 = vmatprep.subr.bf16.mxu1 %v6023_v63  ;;  %3474 = vmatprep.subr.bf16.mxu0 %v6024_v55  ;;  %v6029_v55 = vld [vmem:[#allocation6 + $0x8c0] ss:$16 sps:$4 sm:$0xff]  }
 0x2f9   :  { %v3162_v62 = vpop.f32.mrf.mxu0  ;;  %3425 = vmatmul.mubr.bf16.vlgmr.msra.gmra.mxu0 %v6455_v49 }
 0x2fa   :  { %v3163_v38 = vadd.f32 %v3162_v62, %v3122_v60  ;;  %3464 = vmatpush2.bf16.msra.mxu1 %v6025_v2  ;;  %3475 = vmatpush1.bf16.msra.mxu0 %v6026_v61  ;;  %v6030_v60 = vld [vmem:[#allocation6 + $0xe8] ss:$16 sps:$4 sm:$0xff]   ;;  %v6031_v2 = vld [vmem:[#allocation6 + $0x8a4] ss:$16 sps:$4 sm:$0xff]  }
 0x2fb   :  { %5016 = vmatprep.mubr.msk.bf16.mxu0 %vm6443_vm5, %v6816_v25  ;;  %v3164_v1 = vpop.f32.mrf.mxu0  ;;  %3476 = vmatprep.subr.bf16.mxu0 %v6027_v56 }
 0x2fc   :  { %v3165_v47 = vadd.f32 %v3164_v1, %v3124_v19  ;;  %3515 = vmatprep.subr.bf16.mxu1 %v6028_v44  ;;  %v6032_v1 = vld [vmem:[#allocation6 + $0xcc] ss:$16 sps:$4 sm:$0xff]   ;;  %v6033_v44 = vld [vmem:[#allocation6 + $0x8a0] ss:$16 sps:$4 sm:$0xff]  }
 0x2fd   :  { %v3166_v53 = vpop.f32.mrf.mxu0  ;;  %v3203_v63 = vpop.f32.mrf.mxu1  ;;  %5013 = vmatmul.mubr.msk.bf16.vlgmr.msra.gmra.mxu1 %vm6443_vm5, %v6462_v13 }
 0x2fe   :  { %v6826_v46 = vadd.f32 %v3203_v63, %v3163_v38  ;;  %3477 = vmatpush1.bf16.msra.mxu0 %v6029_v55  ;;  %3516 = vmatpush1.bf16.msra.mxu1 %v6030_v60  ;;  %v6034_v38 = vld [vmem:[#allocation6 + $0xc8] ss:$16 sps:$4 sm:$0xff]   ;;  %v6035_v63 = vld [vmem:[#allocation6 + $0x884] ss:$16 sps:$4 sm:$0xff]   ;;  %v6036_v55 = vld [vmem:[#allocation6 + $0xac] ss:$16 sps:$4 sm:$0xff]  }
 0x2ff   :  { %5024 = vmatprep.mubr.msk.bf16.mxu1 %vm6400_vm3, %v6423_v33  ;;  %v3167_v62 = vpop.f32.mrf.mxu0  ;;  %v3205_v19 = vpop.f32.mrf.mxu1  ;;  %3478 = vmatprep.subr.bf16.mxu0 %v6031_v2  ;;  %v6037_v60 = vld [vmem:[#allocation6 + $0x880] ss:$16 sps:$4 sm:$0xff]   ;;  %v6038_v33 = vld [vmem:[#allocation6 + $0xa8] ss:$16 sps:$4 sm:$0xff]  }
 0x300   :  { %v6831_v61 = vadd.f32 %v3205_v19, %v3165_v47  ;;  %3517 = vmatprep.subr.bf16.mxu1 %v6032_v1  ;;  %v6039_v62 = vld [vmem:[#allocation6 + $0x864] ss:$16 sps:$4 sm:$0xff]   ;;  %v6040_v47 = vld [vmem:[#allocation6 + $0x8c] ss:$16 sps:$4 sm:$0xff]   ;;  %v6041_v19 = vld [vmem:[#allocation6 + $0x860] ss:$16 sps:$4 sm:$0xff]  }
 0x301   :  { %v3207_v56 = vpop.f32.mrf.mxu1  ;;  %v6042_v2 = vld [vmem:[#allocation6 + $0x88] ss:$16 sps:$4 sm:$0xff]   ;;  %v6043_v1 = vld [vmem:[#allocation6 + $0x844] ss:$16 sps:$4 sm:$0xff]  }
 0x302   :  { %3479 = vmatpush1.bf16.msra.mxu0 %v6033_v44  ;;  %3518 = vmatpush1.bf16.msra.mxu1 %v6034_v38  ;;  %v6044_v56 = vld [vmem:[#allocation6 + $0x6c] ss:$16 sps:$4 sm:$0xff]   ;;  %v6045_v44 = vld [vmem:[#allocation6 + $0x840] ss:$16 sps:$4 sm:$0xff]   ;;  %v6046_v38 = vld [vmem:[#allocation6 + $0x68] ss:$16 sps:$4 sm:$0xff]  }
 0x303   :  { %v3208_v53 = vpop.f32.mrf.mxu1  ;;  %3480 = vmatprep.subr.bf16.mxu0 %v6035_v63  ;;  %3519 = vmatprep.subr.bf16.mxu1 %v6036_v55  ;;  %v6048_v63 = vld [vmem:[#allocation6 + $0x4c] ss:$16 sps:$4 sm:$0xff]   ;;  %v6049_v55 = vld [vmem:[#allocation6 + $0x820] ss:$16 sps:$4 sm:$0xff]  }
 0x304   :  { %v6047_v53 = vld [vmem:[#allocation6 + $0x824] ss:$16 sps:$4 sm:$0xff]  }
 0x306   :  { %3481 = vmatpush1.bf16.msra.mxu0 %v6037_v60  ;;  %3520 = vmatpush1.bf16.msra.mxu1 %v6038_v33  ;;  %v6050_v60 = vld [vmem:[#allocation6 + $0x48] ss:$16 sps:$4 sm:$0xff]   ;;  %v6051_v33 = vld [vmem:[#allocation6 + $0x804] ss:$16 sps:$4 sm:$0xff]  }
 0x307   :  { %3482 = vmatprep.subr.bf16.mxu0 %v6039_v62  ;;  %3521 = vmatprep.subr.bf16.mxu1 %v6040_v47  ;;  %v6052_v62 = vld [vmem:[#allocation6 + $0x2c] ss:$16 sps:$4 sm:$0xff]   ;;  %v6053_v47 = vld [vmem:[#allocation6 + $0x800] ss:$16 sps:$4 sm:$0xff]  }
 0x30a   :  { %3483 = vmatpush1.bf16.msra.mxu0 %v6041_v19  ;;  %3522 = vmatpush1.bf16.msra.mxu1 %v6042_v2  ;;  %v6054_v19 = vld [vmem:[#allocation6 + $0x28] ss:$16 sps:$4 sm:$0xff]   ;;  %v6055_v2 = vld [vmem:[#allocation6 + $0x9e4] ss:$16 sps:$4 sm:$0xff]  }
 0x30b   :  { %3484 = vmatprep.subr.bf16.mxu0 %v6043_v1  ;;  %3523 = vmatprep.subr.bf16.mxu1 %v6044_v56  ;;  %v6056_v1 = vld [vmem:[#allocation6 + $0xc] ss:$16 sps:$4 sm:$0xff]   ;;  %v6057_v56 = vld [vmem:[#allocation6 + $0x9e0] ss:$16 sps:$4 sm:$0xff]  }
 0x30e   :  { %3485 = vmatpush1.bf16.msra.mxu0 %v6045_v44  ;;  %3524 = vmatpush1.bf16.msra.mxu1 %v6046_v38  ;;  %v6058_v44 = vld [vmem:[#allocation6 + $0x8] ss:$16 sps:$4 sm:$0xff]   ;;  %v6059_v38 = vld [vmem:[#allocation6 + $0x9c4] ss:$16 sps:$4 sm:$0xff]  }
 0x30f   :  { %3486 = vmatprep.subr.bf16.mxu0 %v6047_v53  ;;  %3525 = vmatprep.subr.bf16.mxu1 %v6048_v63  ;;  %v6060_v53 = vld [vmem:[#allocation6 + $0x1ec] ss:$16 sps:$4 sm:$0xff]   ;;  %v6061_v63 = vld [vmem:[#allocation6 + $0x9c0] ss:$16 sps:$4 sm:$0xff]  }
 0x312   :  { %3487 = vmatpush1.bf16.msra.mxu0 %v6049_v55  ;;  %3526 = vmatpush1.bf16.msra.mxu1 %v6050_v60  ;;  %v6062_v55 = vld [vmem:[#allocation6 + $0x1e8] ss:$16 sps:$4 sm:$0xff]   ;;  %v6063_v60 = vld [vmem:[#allocation6 + $0x9a4] ss:$16 sps:$4 sm:$0xff]  }
 0x313   :  { %3488 = vmatprep.subr.bf16.mxu0 %v6051_v33  ;;  %3527 = vmatprep.subr.bf16.mxu1 %v6052_v62  ;;  %v6064_v33 = vld [vmem:[#allocation6 + $0x1cc] ss:$16 sps:$4 sm:$0xff]   ;;  %v6065_v62 = vld [vmem:[#allocation6 + $0x9a0] ss:$16 sps:$4 sm:$0xff]  }
 0x316   :  { %3489 = vmatpush1.bf16.msra.mxu0 %v6053_v47  ;;  %3528 = vmatpush1.bf16.msra.mxu1 %v6054_v19  ;;  %v6066_v47 = vld [vmem:[#allocation6 + $0x1c8] ss:$16 sps:$4 sm:$0xff]   ;;  %v6067_v19 = vld [vmem:[#allocation6 + $0x984] ss:$16 sps:$4 sm:$0xff]  }
 0x317   :  { %3490 = vmatprep.subr.bf16.mxu0 %v6055_v2  ;;  %3529 = vmatprep.subr.bf16.mxu1 %v6056_v1  ;;  %v6068_v2 = vld [vmem:[#allocation6 + $0x1ac] ss:$16 sps:$4 sm:$0xff]   ;;  %v6069_v1 = vld [vmem:[#allocation6 + $0x980] ss:$16 sps:$4 sm:$0xff]  }
 0x31a   :  { %3491 = vmatpush2.bf16.msra.mxu0 %v6057_v56  ;;  %3530 = vmatpush1.bf16.msra.mxu1 %v6058_v44  ;;  %v6070_v56 = vld [vmem:[#allocation6 + $0x1a8] ss:$16 sps:$4 sm:$0xff]   ;;  %v6071_v44 = vld [vmem:[#allocation6 + $0x964] ss:$16 sps:$4 sm:$0xff]  }
 0x31b   :  { %3492 = vmatprep.subr.bf16.mxu0 %v6059_v38  ;;  %3531 = vmatprep.subr.bf16.mxu1 %v6060_v53  ;;  %v6072_v38 = vld [vmem:[#allocation6 + $0x18c] ss:$16 sps:$4 sm:$0xff]   ;;  %v6073_v53 = vld [vmem:[#allocation6 + $0x960] ss:$16 sps:$4 sm:$0xff]  }
 0x31e   :  { %3493 = vmatpush2.bf16.msra.mxu0 %v6061_v63  ;;  %3532 = vmatpush2.bf16.msra.mxu1 %v6062_v55  ;;  %v6074_v63 = vld [vmem:[#allocation6 + $0x188] ss:$16 sps:$4 sm:$0xff]   ;;  %v6075_v55 = vld [vmem:[#allocation6 + $0x944] ss:$16 sps:$4 sm:$0xff]  }
 0x31f   :  { %3494 = vmatprep.subr.bf16.mxu0 %v6063_v60  ;;  %3533 = vmatprep.subr.bf16.mxu1 %v6064_v33  ;;  %v6076_v60 = vld [vmem:[#allocation6 + $0x16c] ss:$16 sps:$4 sm:$0xff]   ;;  %v6077_v33 = vld [vmem:[#allocation6 + $0x940] ss:$16 sps:$4 sm:$0xff]  }
 0x322   :  { %3495 = vmatpush2.bf16.msra.mxu0 %v6065_v62  ;;  %3534 = vmatpush2.bf16.msra.mxu1 %v6066_v47  ;;  %v6078_v62 = vld [vmem:[#allocation6 + $0x168] ss:$16 sps:$4 sm:$0xff]   ;;  %v6079_v47 = vld [vmem:[#allocation6 + $0x924] ss:$16 sps:$4 sm:$0xff]  }
 0x323   :  { %3496 = vmatprep.subr.bf16.mxu0 %v6067_v19  ;;  %3535 = vmatprep.subr.bf16.mxu1 %v6068_v2  ;;  %v6080_v19 = vld [vmem:[#allocation6 + $0x14c] ss:$16 sps:$4 sm:$0xff]   ;;  %v6081_v2 = vld [vmem:[#allocation6 + $0x920] ss:$16 sps:$4 sm:$0xff]  }
 0x326   :  { %3497 = vmatpush2.bf16.msra.mxu0 %v6069_v1  ;;  %3536 = vmatpush2.bf16.msra.mxu1 %v6070_v56  ;;  %v6082_v1 = vld [vmem:[#allocation6 + $0x148] ss:$16 sps:$4 sm:$0xff]   ;;  %v3302_v56 = vrot.slane %v6397_v21, 2 }
 0x327   :  { %3498 = vmatprep.subr.bf16.mxu0 %v6071_v44  ;;  %3537 = vmatprep.subr.bf16.mxu1 %v6072_v38  ;;  %v6083_v44 = vld [vmem:[#allocation6 + $0x904] ss:$16 sps:$4 sm:$0xff]   ;;  %v6084_v38 = vld [vmem:[#allocation6 + $0x12c] ss:$16 sps:$4 sm:$0xff]  }
 0x32a   :  { %3499 = vmatpush2.bf16.msra.mxu0 %v6073_v53  ;;  %3538 = vmatpush2.bf16.msra.mxu1 %v6074_v63  ;;  %v6085_v53 = vld [vmem:[#allocation6 + $0x900] ss:$16 sps:$4 sm:$0xff]   ;;  %v6086_v63 = vld [vmem:[#allocation6 + $0x128] ss:$16 sps:$4 sm:$0xff]  }
 0x32b   :  { %3500 = vmatprep.subr.bf16.mxu0 %v6075_v55  ;;  %3539 = vmatprep.subr.bf16.mxu1 %v6076_v60  ;;  %v6834_v55 = vpack.c.bf16 %v3302_v56, %v3302_v56  ;;  %v6087_v60 = vld [vmem:[#allocation6 + $0x10c] ss:$16 sps:$4 sm:$0xff]  }
 0x32e   :  { %3501 = vmatpush2.bf16.msra.mxu0 %v6077_v33  ;;  %3540 = vmatpush2.bf16.msra.mxu1 %v6078_v62  ;;  %v6088_v33 = vld [vmem:[#allocation6 + $0x2ec] ss:$16 sps:$4 sm:$0xff]  }
 0x32f   :  { %3502 = vmatprep.subr.bf16.mxu0 %v6079_v47  ;;  %3541 = vmatprep.subr.bf16.mxu1 %v6080_v19  ;;  %v6089_v47 = vld [vmem:[#allocation6 + $0x108] ss:$16 sps:$4 sm:$0xff]  }
 0x330   :  { %v6090_v19 = vld [vmem:[#allocation6 + $0x2e8] ss:$16 sps:$4 sm:$0xff]  }
 0x332   :  { %3503 = vmatpush2.bf16.msra.mxu0 %v6081_v2  ;;  %3542 = vmatpush2.bf16.msra.mxu1 %v6082_v1  ;;  %v6091_v1 = vld [vmem:[#allocation6 + $0x2cc] ss:$16 sps:$4 sm:$0xff]  }
 0x333   :  { %3504 = vmatprep.subr.bf16.mxu0 %v6083_v44  ;;  %3543 = vmatprep.subr.bf16.mxu1 %v6084_v38  ;;  %v6092_v44 = vld [vmem:[#allocation6 + $0x4ec] ss:$16 sps:$4 sm:$0xff]  }
 0x336   :  { %3505 = vmatpush2.bf16.msra.mxu0 %v6085_v53  ;;  %3544 = vmatpush2.bf16.msra.mxu1 %v6086_v63 }
 0x337   :  { %3545 = vmatprep.subr.bf16.mxu1 %v6087_v60  ;;  %3556 = vmatprep.subr.bf16.mxu0 %v6088_v33  ;;  %v6093_v60 = vld [vmem:[#allocation6 + $0x2c8] ss:$16 sps:$4 sm:$0xff]  }
 0x338   :  { %v6094_v33 = vld [vmem:[#allocation6 + $0x4e8] ss:$16 sps:$4 sm:$0xff]  }
 0x339   :  { %v3244_v62 = vpop.f32.mrf.mxu0  ;;  %5019 = vmatmul.mubr.msk.bf16.vlgmr.msra.gmra.mxu0 %vm6443_vm5, %v6834_v55 }
 0x33a   :  { %v3245_v21 = vadd.f32 %v3244_v62, %v6826_v46  ;;  %3546 = vmatpush2.bf16.msra.mxu1 %v6089_v47  ;;  %3557 = vmatpush1.bf16.msra.mxu0 %v6090_v19  ;;  %v3292_v46 = vmul.f32 0.01, %v6788_v39  ;;  %v3293_v47 = vmul.f32 0.01, %v6792_v58 }
 0x33b   :  { %3588 = vmatprep.mubr.bf16.mxu0 %v6416_v32  ;;  %v3246_v2 = vpop.f32.mrf.mxu0  ;;  %3558 = vmatprep.subr.bf16.mxu0 %v6091_v1  ;;  %v6096_v1 = vld [vmem:[#allocation6 + $0x4cc] ss:$16 sps:$4 sm:$0xff]  }
 0x33c   :  { %v3247_v56 = vadd.f32 %v3246_v2, %v6831_v61  ;;  %3597 = vmatprep.subr.bf16.mxu1 %v6092_v44  ;;  %v6095_v61 = vld [vmem:[#allocation6 + $0x2ac] ss:$16 sps:$4 sm:$0xff]  }
 0x33d   :  { %v3248_v38 = vpop.f32.mrf.mxu0  ;;  %v3285_v53 = vpop.f32.mrf.mxu1  ;;  %5029 = vmatmul.mubr.msk.bf16.vlgmr.msra.gmra.mxu1 %vm6400_vm3, %v6425_v37  ;;  %v3296_v37 = vmax.f32 %v6788_v39, %v3292_v46  ;;  %v6102_v39 = vld [vmem:[#allocation6 + $0x4a8] ss:$16 sps:$4 sm:$0xff]   ;;  %v6103_v46 = vld [vmem:[#allocation6 + $0x26c] ss:$16 sps:$4 sm:$0xff]  }
 0x33e   :  { %v3286_v63 = vadd.f32 %v3285_v53, %v3245_v21  ;;  %3559 = vmatpush1.bf16.msra.mxu0 %v6093_v60  ;;  %3598 = vmatpush1.bf16.msra.mxu1 %v6094_v33  ;;  %v6097_v38 = vld [vmem:[#allocation6 + $0x2a8] ss:$16 sps:$4 sm:$0xff]   ;;  %v6099_v60 = vld [vmem:[#allocation6 + $0x28c] ss:$16 sps:$4 sm:$0xff]  }
 0x33f   :  { %3629 = vmatprep.mubr.bf16.mxu1 %v6435_v41  ;;  %v3249_v32 = vpop.f32.mrf.mxu0  ;;  %v3287_v62 = vpop.f32.mrf.mxu1  ;;  %3560 = vmatprep.subr.bf16.mxu0 %v6095_v61  ;;  %v6098_v53 = vld [vmem:[#allocation6 + $0x4c8] ss:$16 sps:$4 sm:$0xff]   ;;  %v6100_v33 = vld [vmem:[#allocation6 + $0x4ac] ss:$16 sps:$4 sm:$0xff]  }
 0x340   :  { %v3294_v19 = vmul.f32 0.01, %v3286_v63  ;;  %v3288_v2 = vadd.f32 %v3287_v62, %v3247_v56  ;;  %3599 = vmatprep.subr.bf16.mxu1 %v6096_v1  ;;  %v3297_v32 = vmax.f32 %v6792_v58, %v3293_v47  ;;  %v6101_v1 = vld [vmem:[#allocation6 + $0x288] ss:$16 sps:$4 sm:$0xff]   ;;  %v6108_v58 = vld [vmem:[#allocation6 + $0x46c] ss:$16 sps:$4 sm:$0xff]  }
 0x341   :  { %v3289_v23 = vpop.f32.mrf.mxu1  ;;  %v6109_v47 = vld [vmem:[#allocation6 + $0x248] ss:$16 sps:$4 sm:$0xff]  }
 0x342   :  { %v3298_v21 = vmax.f32 %v3286_v63, %v3294_v19  ;;  %v3295_v44 = vmul.f32 0.01, %v3288_v2  ;;  %3561 = vmatpush1.bf16.msra.mxu0 %v6097_v38  ;;  %3600 = vmatpush1.bf16.msra.mxu1 %v6098_v53  ;;  %v6104_v63 = vld [vmem:[#allocation6 + $0x48c] ss:$16 sps:$4 sm:$0xff]   ;;  %v6105_v19 = vld [vmem:[#allocation6 + $0x268] ss:$16 sps:$4 sm:$0xff]  }
 0x343   :  { %v3290_v41 = vpop.f32.mrf.mxu1  ;;  %3562 = vmatprep.subr.bf16.mxu0 %v6099_v60  ;;  %3601 = vmatprep.subr.bf16.mxu1 %v6100_v33  ;;  %v6106_v23 = vld [vmem:[#allocation6 + $0x488] ss:$16 sps:$4 sm:$0xff]   ;;  %v6107_v38 = vld [vmem:[#allocation6 + $0x24c] ss:$16 sps:$4 sm:$0xff]  }
 0x344   :  { %v6850_v61 = vmax.f32 %v3296_v37, %v3298_v21  ;;  %v3299_v56 = vmax.f32 %v3288_v2, %v3295_v44  ;;  %v6110_v2 = vld [vmem:[#allocation6 + $0x468] ss:$16 sps:$4 sm:$0xff]   ;;  %v6111_v37 = vld [vmem:[#allocation6 + $0x22c] ss:$16 sps:$4 sm:$0xff]  }
 0x345   :  { %v6112_v21 = vld [vmem:[#allocation6 + $0x44c] ss:$16 sps:$4 sm:$0xff]   ;;  %v6113_v44 = vld [vmem:[#allocation6 + $0x228] ss:$16 sps:$4 sm:$0xff]  }
 0x346   :  { %v6852_v62 = vmax.f32 %v3297_v32, %v3299_v56  ;;  %3563 = vmatpush1.bf16.msra.mxu0 %v6101_v1  ;;  %3602 = vmatpush1.bf16.msra.mxu1 %v6102_v39  ;;  %v6114_v53 = vld [vmem:[#allocation6 + $0x448] ss:$16 sps:$4 sm:$0xff]   ;;  %v6115_v41 = vld [vmem:[#allocation6 + $0x20c] ss:$16 sps:$4 sm:$0xff]  }
 0x347   :  { %3564 = vmatprep.subr.bf16.mxu0 %v6103_v46  ;;  %3603 = vmatprep.subr.bf16.mxu1 %v6104_v63  ;;  %v6116_v60 = vld [vmem:[#allocation6 + $0x42c] ss:$16 sps:$4 sm:$0xff]   ;;  %v6117_v33 = vld [vmem:[#allocation6 + $0x208] ss:$16 sps:$4 sm:$0xff]  }
 0x348   :  { %v6118_v32 = vld [vmem:[#allocation6 + $0x428] ss:$16 sps:$4 sm:$0xff]   ;;  %v6119_v56 = vld [vmem:[#allocation6 + $0x3ec] ss:$16 sps:$4 sm:$0xff]  }
 0x349   :  { %v6120_v1 = vld [vmem:[#allocation6 + $0x40c] ss:$16 sps:$4 sm:$0xff]   ;;  %v6121_v39 = vld [vmem:[#allocation6 + $0x3e8] ss:$16 sps:$4 sm:$0xff]  }
 0x34a   :  { %3565 = vmatpush1.bf16.msra.mxu0 %v6105_v19  ;;  %3604 = vmatpush1.bf16.msra.mxu1 %v6106_v23  ;;  %v6122_v46 = vld [vmem:[#allocation6 + $0x408] ss:$16 sps:$4 sm:$0xff]   ;;  %v6123_v63 = vld [vmem:[#allocation6 + $0x3cc] ss:$16 sps:$4 sm:$0xff]  }
 0x34b   :  { %3566 = vmatprep.subr.bf16.mxu0 %v6107_v38  ;;  %3605 = vmatprep.subr.bf16.mxu1 %v6108_v58  ;;  %v6124_v19 = vld [vmem:[#allocation6 + $0x5ec] ss:$16 sps:$4 sm:$0xff]   ;;  %v6125_v23 = vld [vmem:[#allocation6 + $0x3c8] ss:$16 sps:$4 sm:$0xff]  }
 0x34c   :  { %v6126_v38 = vld [vmem:[#allocation6 + $0x5e8] ss:$16 sps:$4 sm:$0xff]  }
 0x34d   :  { %v7159_v58 = vld [vmem:[#allocation42_spill] sm:$0xff] }
 0x34e   :  { %3567 = vmatpush1.bf16.msra.mxu0 %v6109_v47  ;;  %3606 = vmatpush1.bf16.msra.mxu1 %v6110_v2  ;;  %v7160_v47 = vld [vmem:[#allocation43_spill] sm:$0xff]  ;;  %v7161_v2 = vld [vmem:[#allocation44_spill] sm:$0xff] }
 0x34f   :  { %3568 = vmatprep.subr.bf16.mxu0 %v6111_v37  ;;  %3607 = vmatprep.subr.bf16.mxu1 %v6112_v21  ;;  %v7162_v37 = vld [vmem:[#allocation45_spill] sm:$0xff]  ;;  %v7163_v21 = vld [vmem:[#allocation46_spill] sm:$0xff] }
 0x352   :  { %3569 = vmatpush1.bf16.msra.mxu0 %v6113_v44  ;;  %3608 = vmatpush1.bf16.msra.mxu1 %v6114_v53  ;;  %v7164_v44 = vld [vmem:[#allocation47_spill] sm:$0xff]  ;;  %v7165_v53 = vld [vmem:[#allocation48_spill] sm:$0xff] }
 0x353   :  { %3570 = vmatprep.subr.bf16.mxu0 %v6115_v41  ;;  %3609 = vmatprep.subr.bf16.mxu1 %v6116_v60  ;;  %v7166_v41 = vld [vmem:[#allocation49_spill] sm:$0xff]  ;;  %v7167_v60 = vld [vmem:[#allocation50_spill] sm:$0xff] }
 0x356   :  { %3571 = vmatpush1.bf16.msra.mxu0 %v6117_v33  ;;  %3610 = vmatpush1.bf16.msra.mxu1 %v6118_v32  ;;  %v7168_v33 = vld [vmem:[#allocation51_spill] sm:$0xff]  ;;  %v7169_v32 = vld [vmem:[#allocation52_spill] sm:$0xff] }
 0x357   :  { %3572 = vmatprep.subr.bf16.mxu0 %v6119_v56  ;;  %3611 = vmatprep.subr.bf16.mxu1 %v6120_v1  ;;  %v7170_v56 = vld [vmem:[#allocation53_spill] sm:$0xff]  ;;  %v7171_v1 = vld [vmem:[#allocation54_spill] sm:$0xff] }
 0x35a   :  { %3573 = vmatpush2.bf16.msra.mxu0 %v6121_v39  ;;  %3612 = vmatpush1.bf16.msra.mxu1 %v6122_v46  ;;  %v7172_v39 = vld [vmem:[#allocation55_spill] sm:$0xff]  ;;  %v7173_v46 = vld [vmem:[#allocation56_spill] sm:$0xff] }
 0x35b   :  { %3574 = vmatprep.subr.bf16.mxu0 %v6123_v63  ;;  %3613 = vmatprep.subr.bf16.mxu1 %v6124_v19  ;;  %v7174_v63 = vld [vmem:[#allocation57_spill] sm:$0xff]  ;;  %v7175_v19 = vld [vmem:[#allocation58_spill] sm:$0xff] }
 0x35e   :  { %3575 = vmatpush2.bf16.msra.mxu0 %v6125_v23  ;;  %3614 = vmatpush2.bf16.msra.mxu1 %v6126_v38  ;;  %v7176_v23 = vld [vmem:[#allocation59_spill] sm:$0xff]  ;;  %v7177_v38 = vld [vmem:[#allocation60_spill] sm:$0xff] }
 0x35f   :  { %3576 = vmatprep.subr.bf16.mxu0 %v6474_v4  ;;  %3615 = vmatprep.subr.bf16.mxu1 %v6476_v5 }
 0x362   :  { %3577 = vmatpush2.bf16.msra.mxu0 %v6478_v51  ;;  %3616 = vmatpush2.bf16.msra.mxu1 %v6480_v6 }
 0x363   :  { %3578 = vmatprep.subr.bf16.mxu0 %v6484_v7  ;;  %3617 = vmatprep.subr.bf16.mxu1 %v6486_v8 }
 0x366   :  { %3579 = vmatpush2.bf16.msra.mxu0 %v6490_v9  ;;  %3618 = vmatpush2.bf16.msra.mxu1 %v6492_v10  ;;  %v7133_v10 = vld [vmem:[#allocation16_spill] sm:$0xff] }
 0x367   :  { %3580 = vmatprep.subr.bf16.mxu0 %v6496_v11  ;;  %3619 = vmatprep.subr.bf16.mxu1 %v6498_v26  ;;  %v7134_v26 = vld [vmem:[#allocation17_spill] sm:$0xff] }
 0x36a   :  { %3581 = vmatpush2.bf16.msra.mxu0 %v6502_v12  ;;  %3620 = vmatpush2.bf16.msra.mxu1 %v6504_v14  ;;  %v7135_v12 = vld [vmem:[#allocation18_spill] sm:$0xff]  ;;  %v7136_v14 = vld [vmem:[#allocation19_spill] sm:$0xff] }
 0x36b   :  { %3582 = vmatprep.subr.bf16.mxu0 %v6508_v16  ;;  %3621 = vmatprep.subr.bf16.mxu1 %v6510_v54  ;;  %v7137_v54 = vld [vmem:[#allocation20_spill] sm:$0xff] }
 0x36e   :  { %3583 = vmatpush2.bf16.msra.mxu0 %v6514_v17  ;;  %3622 = vmatpush2.bf16.msra.mxu1 %v6516_v18  ;;  %v7138_v17 = vld [vmem:[#allocation21_spill] sm:$0xff]  ;;  %v7139_v18 = vld [vmem:[#allocation22_spill] sm:$0xff] }
 0x36f   :  { %3584 = vmatprep.subr.bf16.mxu0 %v6520_v20  ;;  %3623 = vmatprep.subr.bf16.mxu1 %v6522_v22  ;;  %v7140_v20 = vld [vmem:[#allocation23_spill] sm:$0xff]  ;;  %v7141_v22 = vld [vmem:[#allocation24_spill] sm:$0xff] }
 0x372   :  { %3585 = vmatpush2.bf16.msra.mxu0 %v6526_v24  ;;  %3624 = vmatpush2.bf16.msra.mxu1 %v6528_v27  ;;  %v7142_v24 = vld [vmem:[#allocation25_spill] sm:$0xff]  ;;  %v7143_v27 = vld [vmem:[#allocation26_spill] sm:$0xff] }
 0x373   :  { %3586 = vmatprep.subr.bf16.mxu0 %v6532_v29  ;;  %3625 = vmatprep.subr.bf16.mxu1 %v6534_v30  ;;  %v7144_v29 = vld [vmem:[#allocation27_spill] sm:$0xff]  ;;  %v7145_v30 = vld [vmem:[#allocation28_spill] sm:$0xff] }
 0x376   :  { %3587 = vmatpush2.bf16.msra.mxu0 %v6538_v0  ;;  %3626 = vmatpush2.bf16.msra.mxu1 %v6540_v34  ;;  %v7146_v0 = vld [vmem:[#allocation29_spill] sm:$0xff]  ;;  %v7147_v34 = vld [vmem:[#allocation30_spill] sm:$0xff] }
 0x377   :  { %3627 = vmatprep.subr.bf16.mxu1 %v6544_v36  ;;  %3638 = vmatprep.subr.bf16.mxu0 %v6546_v28  ;;  %v7148_v36 = vld [vmem:[#allocation31_spill] sm:$0xff]  ;;  %v7149_v28 = vld [vmem:[#allocation32_spill] sm:$0xff] }
 0x379   :  { %v3344_v4 = vpop.f32.mrf.mxu0  ;;  %3589 = vmatmul.mubr.bf16.vlgmr.msra.gmra.mxu0 %v6441_v57 }
 0x37a   :  { %3628 = vmatpush2.bf16.msra.mxu1 %v6552_v40  ;;  %3639 = vmatpush1.bf16.msra.mxu0 %v6554_v31  ;;  %v3345_v51 = vadd.f32 %v3344_v4, %v6563_v42  ;;  %v7150_v40 = vld [vmem:[#allocation33_spill] sm:$0xff]  ;;  %v7151_v31 = vld [vmem:[#allocation34_spill] sm:$0xff]  ;;  %v7153_v42 = vld [vmem:[#allocation36_spill] sm:$0xff] }
 0x37b   :  { %5032 = vmatprep.mubr.msk.bf16.mxu0 %vm6443_vm5, %v6448_v15  ;;  %v3346_v5 = vpop.f32.mrf.mxu0  ;;  %3640 = vmatprep.subr.bf16.mxu0 %v6558_v43  ;;  %v7152_v43 = vld [vmem:[#allocation35_spill] sm:$0xff]  ;;  %v7178_v4 = vld [vmem:[#allocation61_spill] sm:$0xff] }
 0x37c   :  { %3679 = vmatprep.subr.bf16.mxu1 %v6565_v45  ;;  %v3347_v57 = vadd.f32 %v3346_v5, %v6575_v48  ;;  %v7154_v45 = vld [vmem:[#allocation37_spill] sm:$0xff]  ;;  %v7155_v48 = vld [vmem:[#allocation38_spill] sm:$0xff] }
 0x37d   :  { %v3348_v6 = vpop.f32.mrf.mxu0  ;;  %v3385_v7 = vpop.f32.mrf.mxu1  ;;  %3630 = vmatmul.mubr.bf16.vlgmr.msra.gmra.mxu1 %v6455_v49  ;;  %v7179_v5 = vld [vmem:[#allocation62_spill] sm:$0xff] }
 0x37e   :  { %v6891_v8 = vadd.f32 %v3385_v7, %v3345_v51  ;;  %3641 = vmatpush1.bf16.msra.mxu0 %v6577_v50  ;;  %3680 = vmatpush1.bf16.msra.mxu1 %v6579_v35  ;;  %v7156_v50 = vld [vmem:[#allocation39_spill] sm:$0xff]  ;;  %v7157_v35 = vld [vmem:[#allocation40_spill] sm:$0xff]  ;;  %v7182_v7 = vld [vmem:[#allocation65_spill] sm:$0xff] }
 0x37f   :  { %5038 = vmatprep.mubr.msk.bf16.mxu1 %vm6443_vm5, %v6816_v25  ;;  %v3349_v15 = vpop.f32.mrf.mxu0  ;;  %v3387_v9 = vpop.f32.mrf.mxu1  ;;  %3642 = vmatprep.subr.bf16.mxu0 %v7133_v10  ;;  %v7158_v25 = vld [vmem:[#allocation41_spill] sm:$0xff]  ;;  %v7180_v51 = vld [vmem:[#allocation63_spill] sm:$0xff]  ;;  %v7181_v6 = vld [vmem:[#allocation64_spill] sm:$0xff] }
 0x380   :  { %v6899_v11 = vadd.f32 %v3387_v9, %v3347_v57  ;;  %3681 = vmatprep.subr.bf16.mxu1 %v7134_v26  ;;  %v7183_v57 = vld [vmem:[#allocation66_spill] sm:$0xff]  ;;  %v7184_v15 = vld [vmem:[#allocation67_spill] sm:$0xff]  ;;  %v7185_v9 = vld [vmem:[#allocation68_spill] sm:$0xff] }
 0x381   :  { %v3389_v49 = vpop.f32.mrf.mxu1  ;;  %v7186_v10 = vld [vmem:[#allocation69_spill] sm:$0xff]  ;;  %v7187_v26 = vld [vmem:[#allocation70_spill] sm:$0xff] }
 0x382   :  { %3643 = vmatpush1.bf16.msra.mxu0 %v7135_v12  ;;  %3682 = vmatpush1.bf16.msra.mxu1 %v7136_v14  ;;  %v7188_v49 = vld [vmem:[#allocation71_spill] sm:$0xff]  ;;  %v7189_v12 = vld [vmem:[#allocation72_spill] sm:$0xff] }
 0x383   :  { %v3390_v16 = vpop.f32.mrf.mxu1  ;;  %3644 = vmatprep.subr.bf16.mxu0 %v7137_v54  ;;  %3683 = vmatprep.subr.bf16.mxu1 %v7138_v17  ;;  %v7190_v54 = vld [vmem:[#allocation73_spill] sm:$0xff] }
 0x386   :  { %3645 = vmatpush1.bf16.msra.mxu0 %v7139_v18  ;;  %3684 = vmatpush1.bf16.msra.mxu1 %v7140_v20 }
 0x387   :  { %3646 = vmatprep.subr.bf16.mxu0 %v7141_v22  ;;  %3685 = vmatprep.subr.bf16.mxu1 %v7142_v24 }
 0x38a   :  { %3647 = vmatpush1.bf16.msra.mxu0 %v7143_v27  ;;  %3686 = vmatpush1.bf16.msra.mxu1 %v7144_v29 }
 0x38b   :  { %3648 = vmatprep.subr.bf16.mxu0 %v7145_v30  ;;  %3687 = vmatprep.subr.bf16.mxu1 %v7146_v0 }
 0x38e   :  { %3649 = vmatpush1.bf16.msra.mxu0 %v7147_v34  ;;  %3688 = vmatpush1.bf16.msra.mxu1 %v7148_v36  ;;  %v5822_v36 = vld [vmem:[#allocation9 + $0x38] sm:$0xff]  }
 0x38f   :  { %3650 = vmatprep.subr.bf16.mxu0 %v7149_v28  ;;  %3689 = vmatprep.subr.bf16.mxu1 %v7150_v40  ;;  %v5824_v28 = vld [vmem:[#allocation9 + $0xb8] sm:$0xff]   ;;  %v5825_v40 = vld [vmem:[#allocation9 + $0x70] sm:$0xff]  }
 0x392   :  { %3651 = vmatpush1.bf16.msra.mxu0 %v7151_v31  ;;  %3690 = vmatpush1.bf16.msra.mxu1 %v7152_v43  ;;  %v5826_v31 = vld [vmem:[#allocation9 + $0x30] sm:$0xff]  }
 0x393   :  { %3652 = vmatprep.subr.bf16.mxu0 %v7153_v42  ;;  %3691 = vmatprep.subr.bf16.mxu1 %v7154_v45  ;;  %v5828_v43 = vld [vmem:[#allocation9 + $0xb0] sm:$0xff]   ;;  %v5830_v42 = vld [vmem:[#allocation9 + $0x28] sm:$0xff]  }
 0x394   :  { %v5832_v45 = vld [vmem:[#allocation9 + $0xa8] sm:$0xff]  }
 0x396   :  { %3653 = vmatpush1.bf16.msra.mxu0 %v7155_v48  ;;  %3692 = vmatpush1.bf16.msra.mxu1 %v7156_v50  ;;  %v5833_v48 = vld [vmem:[#allocation9 + $0x60] sm:$0xff]  }
 0x397   :  { %3654 = vmatprep.subr.bf16.mxu0 %v7157_v35  ;;  %3693 = vmatprep.subr.bf16.mxu1 %v7158_v25  ;;  %v5834_v50 = vld [vmem:[#allocation9 + $0x20] sm:$0xff]  }
 0x398   :  { %v5835_v25 = vld [vmem:[#allocation9 + $0xe0] sm:$0xff]  }
 0x39a   :  { %3655 = vmatpush2.bf16.msra.mxu0 %v7159_v58  ;;  %3694 = vmatpush1.bf16.msra.mxu1 %v7160_v47  ;;  %v5836_v47 = vld [vmem:[#allocation9 + $0xa0] sm:$0xff]  }
 0x39b   :  { %3656 = vmatprep.subr.bf16.mxu0 %v7161_v2  ;;  %3695 = vmatprep.subr.bf16.mxu1 %v7162_v37  ;;  %v5837_v37 = vld [vmem:[#allocation9 + $0x58] sm:$0xff]  }
 0x39e   :  { %3657 = vmatpush2.bf16.msra.mxu0 %v7163_v21  ;;  %3696 = vmatpush2.bf16.msra.mxu1 %v7164_v44  ;;  %v5838_v44 = vld [vmem:[#allocation9 + $0x18] sm:$0xff]  }
 0x39f   :  { %3658 = vmatprep.subr.bf16.mxu0 %v7165_v53  ;;  %3697 = vmatprep.subr.bf16.mxu1 %v7166_v41 }
 0x3a2   :  { %3659 = vmatpush2.bf16.msra.mxu0 %v7167_v60  ;;  %3698 = vmatpush2.bf16.msra.mxu1 %v7168_v33  ;;  %v5839_v60 = vld [vmem:[#allocation9 + $0xd8] sm:$0xff]  }
 0x3a3   :  { %3660 = vmatprep.subr.bf16.mxu0 %v7169_v32  ;;  %3699 = vmatprep.subr.bf16.mxu1 %v7170_v56  ;;  %v5840_v33 = vld [vmem:[#allocation9 + $0x98] sm:$0xff]  }
 0x3a6   :  { %3661 = vmatpush2.bf16.msra.mxu0 %v7171_v1  ;;  %3700 = vmatpush2.bf16.msra.mxu1 %v7172_v39  ;;  %v5841_v1 = vld [vmem:[#allocation9 + $0x50] sm:$0xff]  }
 0x3a7   :  { %3662 = vmatprep.subr.bf16.mxu0 %v7173_v46  ;;  %3701 = vmatprep.subr.bf16.mxu1 %v7174_v63  ;;  %v5842_v39 = vld [vmem:[#allocation9 + $0x10] sm:$0xff]  }
 0x3a8   :  { %v5843_v63 = vld [vmem:[#allocation9 + $0xd0] sm:$0xff]  }
 0x3aa   :  { %3663 = vmatpush2.bf16.msra.mxu0 %v7175_v19  ;;  %3702 = vmatpush2.bf16.msra.mxu1 %v7176_v23  ;;  %v5844_v19 = vld [vmem:[#allocation9 + $0x90] sm:$0xff]  }
 0x3ab   :  { %3664 = vmatprep.subr.bf16.mxu0 %v7177_v38  ;;  %3703 = vmatprep.subr.bf16.mxu1 %v7178_v4  ;;  %v5845_v38 = vld [vmem:[#allocation9 + $0x48] sm:$0xff]  }
 0x3ac   :  { %v5846_v4 = vld [vmem:[#allocation9 + $0x8] sm:$0xff]  }
 0x3ae   :  { %3665 = vmatpush2.bf16.msra.mxu0 %v7179_v5  ;;  %3704 = vmatpush2.bf16.msra.mxu1 %v7180_v51  ;;  %v5847_v5 = vld [vmem:[#allocation9 + $0xc8] sm:$0xff]  }
 0x3af   :  { %3666 = vmatprep.subr.bf16.mxu0 %v7181_v6  ;;  %3705 = vmatprep.subr.bf16.mxu1 %v7182_v7  ;;  %v5848_v51 = vld [vmem:[#allocation9 + $0x88] sm:$0xff]   ;;  %v5849_v6 = vld [vmem:[#allocation9 + $0x40] sm:$0xff]  }
 0x3b0   :  { %v5850_v7 = vld [vmem:[#allocation9] sm:$0xff]  }
 0x3b2   :  { %3667 = vmatpush2.bf16.msra.mxu0 %v7183_v57  ;;  %3706 = vmatpush2.bf16.msra.mxu1 %v7184_v15  ;;  %v5851_v57 = vld [vmem:[#allocation9 + $0xc0] sm:$0xff]  }
 0x3b3   :  { %3668 = vmatprep.subr.bf16.mxu0 %v7185_v9  ;;  %3707 = vmatprep.subr.bf16.mxu1 %v7186_v10  ;;  %v5852_v15 = vld [vmem:[#allocation9 + $0x80] sm:$0xff]   ;;  %v5853_v9 = vld [vmem:[#allocation9 + $0x178] sm:$0xff]  }
 0x3b4   :  { %v5855_v10 = vld [vmem:[#allocation9 + $0x1f8] sm:$0xff]  }
 0x3b6   :  { %3669 = vmatpush2.bf16.msra.mxu0 %v7187_v26  ;;  %3708 = vmatpush2.bf16.msra.mxu1 %v7188_v49 }
 0x3b7   :  { %3709 = vmatprep.subr.bf16.mxu1 %v7189_v12 }
 0x3b9   :  { %v3426_v14 = vpop.f32.mrf.mxu0  ;;  %5035 = vmatmul.mubr.msk.bf16.vlgmr.msra.gmra.mxu0 %vm6443_vm5, %v6462_v13  ;;  %v5821_v13 = vld [vmem:[#allocation9 + $0x78] sm:$0xff]  }
 0x3ba   :  { %v3427_v16 = vadd.f32 %v3426_v14, %v6891_v8  ;;  %3710 = vmatpush2.bf16.msra.mxu1 %v7190_v54  ;;  %v5823_v8 = vld [vmem:[#allocation9 + $0xf8] sm:$0xff]   ;;  %5107 = vmatprep.subr.bf16.mxu0 %v5821_v13 }
 0x3bb   :  { %v3428_v17 = vpop.f32.mrf.mxu0  ;;  %5129 = vmatprep.subr.bf16.mxu1 %v5823_v8  ;;  %5108 = vmatpush3.bf16.msra.mxu0 %v5822_v36 }
 0x3bc   :  { %v3429_v18 = vadd.f32 %v3428_v17, %v6899_v11  ;;  %v5827_v11 = vld [vmem:[#allocation9 + $0xf0] sm:$0xff]   ;;  %5109 = vmatprep.subr.bf16.mxu0 %v5825_v40 }
 0x3bd   :  { %v3430_v20 = vpop.f32.mrf.mxu0  ;;  %v3467_v22 = vpop.f32.mrf.mxu1  ;;  %5041 = vmatmul.mubr.msk.bf16.vlgmr.msra.gmra.mxu1 %vm6443_vm5, %v6834_v55  ;;  %v5831_v55 = vld [vmem:[#allocation9 + $0xe8] sm:$0xff]  }
 0x3be   :  { %v3468_v24 = vadd.f32 %v3467_v22, %v3427_v16  ;;  %5130 = vmatpush3.bf16.msra.mxu1 %v5824_v28 }
 0x3bf   :  { %v3431_v27 = vpop.f32.mrf.mxu0  ;;  %v3469_v29 = vpop.f32.mrf.mxu1  ;;  %5131 = vmatprep.subr.bf16.mxu1 %v5827_v11  ;;  %5110 = vmatpush3.bf16.msra.mxu0 %v5826_v31 }
 0x3c0   :  { %v3470_v30 = vadd.f32 %v3469_v29, %v3429_v18  ;;  %5111 = vmatprep.subr.bf16.mxu0 %v5829_v59 }
 0x3c1   :  { %v3471_v0 = vpop.f32.mrf.mxu1 }
 0x3c2   :  { %5132 = vmatpush3.bf16.msra.mxu1 %v5828_v43 }
 0x3c3   :  { %v3472_v34 = vpop.f32.mrf.mxu1  ;;  %5133 = vmatprep.subr.bf16.mxu1 %v5831_v55  ;;  %5112 = vmatpush3.bf16.msra.mxu0 %v5830_v42 }
 0x3c4   :  { %5113 = vmatprep.subr.bf16.mxu0 %v5833_v48 }
 0x3c6   :  { %5134 = vmatpush3.bf16.msra.mxu1 %v5832_v45 }
 0x3c7   :  { %5114 = vmatpush3.bf16.msra.mxu0 %v5834_v50  ;;  %5135 = vmatprep.subr.bf16.mxu1 %v5835_v25 }
 0x3c8   :  { %5115 = vmatprep.subr.bf16.mxu0 %v5837_v37 }
 0x3ca   :  { %5136 = vmatpush3.bf16.msra.mxu1 %v5836_v47 }
 0x3cb   :  { %5116 = vmatpush3.bf16.msra.mxu0 %v5838_v44  ;;  %5137 = vmatprep.subr.bf16.mxu1 %v5839_v60  ;;  %v5854_v60 = vld [vmem:[#allocation9 + $0x138] sm:$0xff]  }
 0x3cc   :  { %5117 = vmatprep.subr.bf16.mxu0 %v5841_v1 }
 0x3ce   :  { %5138 = vmatpush3.bf16.msra.mxu1 %v5840_v33 }
 0x3cf   :  { %5118 = vmatpush3.bf16.msra.mxu0 %v5842_v39  ;;  %5139 = vmatprep.subr.bf16.mxu1 %v5843_v63  ;;  %v5856_v39 = vld [vmem:[#allocation9 + $0x1b8] sm:$0xff]   ;;  %v5859_v63 = vld [vmem:[#allocation9 + $0x1f0] sm:$0xff]  }
 0x3d0   :  { %5119 = vmatprep.subr.bf16.mxu0 %v5845_v38  ;;  %v5860_v38 = vld [vmem:[#allocation9 + $0x1b0] sm:$0xff]  }
 0x3d2   :  { %5140 = vmatpush3.bf16.msra.mxu1 %v5844_v19 }
 0x3d3   :  { %5120 = vmatpush3.bf16.msra.mxu0 %v5846_v4  ;;  %5141 = vmatprep.subr.bf16.mxu1 %v5847_v5  ;;  %v5863_v4 = vld [vmem:[#allocation9 + $0x1e8] sm:$0xff]  }
 0x3d4   :  { %5121 = vmatprep.subr.bf16.mxu0 %v5849_v6  ;;  %v5862_v5 = vld [vmem:[#allocation9 + $0x128] sm:$0xff]  }
 0x3d5   :  { %v5864_v6 = vld [vmem:[#allocation9 + $0x1a8] sm:$0xff]  }
 0x3d6   :  { %5142 = vmatpush3.bf16.msra.mxu1 %v5848_v51  ;;  %v5865_v51 = vld [vmem:[#allocation9 + $0x160] sm:$0xff]  }
 0x3d7   :  { %5122 = vmatpush3.bf16.msra.mxu0 %v5850_v7  ;;  %5143 = vmatprep.subr.bf16.mxu1 %v5851_v57  ;;  %v5867_v7 = vld [vmem:[#allocation9 + $0x1e0] sm:$0xff]  }
 0x3d8   :  { %5151 = vmatprep.subr.bf16.mxu0 %v5853_v9  ;;  %v5866_v57 = vld [vmem:[#allocation9 + $0x120] sm:$0xff]  }
 0x3d9   :  { %v5868_v9 = vld [vmem:[#allocation9 + $0x1a0] sm:$0xff]  }
 0x3da   :  { %5144 = vmatpush3.bf16.msra.mxu1 %v5852_v15  ;;  %v5869_v15 = vld [vmem:[#allocation9 + $0x158] sm:$0xff]  }
 0x3db   :  { %5173 = vmatprep.subr.bf16.mxu1 %v5855_v10  ;;  %v5871_v10 = vld [vmem:[#allocation9 + $0x1d8] sm:$0xff]  }
 0x3f9   :  { %v3508_v35 = vpop.f32.mrf.mxu0 }
 0x3fa   :  { %v6966_v58 = vadd.f32 %v3508_v35, %v3468_v24 }
 0x3fb   :  { %v3510_v2 = vpop.f32.mrf.mxu0 }
 0x3fc   :  { %v6968_v21 = vadd.f32 %v3510_v2, %v3470_v30 }
 0x3fd   :  { %v3512_v53 = vpop.f32.mrf.mxu0  ;;  %v3549_v41 = vpop.f32.mrf.mxu1 }
 0x3fe   :  { %v3550_v26 = vadd.f32 %v3549_v41, %v6805_v3  ;;  %v3720_v3 = vmul.f32 0.01, %v6966_v58  ;;  %v3721_v43 = vmul.f32 0.01, %v6968_v21 }
 0x3ff   :  { %v3513_v32 = vpop.f32.mrf.mxu0  ;;  %v3551_v56 = vpop.f32.mrf.mxu1 }
 0x400   :  { %v3552_v24 = vadd.f32 %v3551_v56, %v6811_v52  ;;  %v3724_v52 = vmax.f32 %v6966_v58, %v3720_v3  ;;  %v3725_v35 = vmax.f32 %v6968_v21, %v3721_v43 }
 0x401   :  { %v3553_v46 = vpop.f32.mrf.mxu1 }
 0x402   :  { %v5857_v46 = vld [vmem:[#allocation9 + $0x170] sm:$0xff]  }
 0x403   :  { %v3554_v23 = vpop.f32.mrf.mxu1 }
 0x404   :  { %v5861_v23 = vld [vmem:[#allocation9 + $0x168] sm:$0xff]  }
 0x439   :  { %v3590_v49 = vpop.f32.mrf.mxu0 }
 0x43a   :  { %v3591_v12 = vadd.f32 %v3590_v49, %v3550_v26  ;;  %v5870_v26 = vld [vmem:[#allocation9 + $0x118] sm:$0xff]   ;;  %v5873_v49 = vld [vmem:[#allocation9 + $0x150] sm:$0xff]  }
 0x43b   :  { %v3592_v14 = vpop.f32.mrf.mxu0 }
 0x43c   :  { %v3593_v29 = vadd.f32 %v3592_v14, %v3552_v24  ;;  %v5875_v14 = vld [vmem:[#allocation9 + $0x1d0] sm:$0xff]   ;;  %v5880_v24 = vld [vmem:[#allocation9 + $0x188] sm:$0xff]  }
 0x43d   :  { %v3594_v16 = vpop.f32.mrf.mxu0  ;;  %v3631_v54 = vpop.f32.mrf.mxu1 }
 0x43e   :  { %v3632_v30 = vadd.f32 %v3631_v54, %v3591_v12  ;;  %v5872_v12 = vld [vmem:[#allocation9 + $0x198] sm:$0xff]   ;;  %v5874_v16 = vld [vmem:[#allocation9 + $0x110] sm:$0xff]   ;;  %v5877_v54 = vld [vmem:[#allocation9 + $0x148] sm:$0xff]  }
 0x43f   :  { %v3595_v17 = vpop.f32.mrf.mxu0  ;;  %v3633_v18 = vpop.f32.mrf.mxu1 }
 0x440   :  { %v3634_v34 = vadd.f32 %v3633_v18, %v3593_v29  ;;  %v5876_v17 = vld [vmem:[#allocation9 + $0x190] sm:$0xff]   ;;  %v5879_v18 = vld [vmem:[#allocation9 + $0x1c8] sm:$0xff]   ;;  %v5882_v29 = vld [vmem:[#allocation9 + $0x100] sm:$0xff]  }
 0x441   :  { %v3635_v20 = vpop.f32.mrf.mxu1 }
 0x442   :  { %v5878_v20 = vld [vmem:[#allocation9 + $0x108] sm:$0xff]  }
 0x443   :  { %v3636_v22 = vpop.f32.mrf.mxu1 }
 0x444   :  { %v5881_v22 = vld [vmem:[#allocation9 + $0x140] sm:$0xff]  }
 0x479   :  { %v3672_v27 = vpop.f32.mrf.mxu0 }
 0x47a   :  { %v3673_v13 = vadd.f32 %v3672_v27, %v3632_v30  ;;  %v5883_v27 = vld [vmem:[#allocation9 + $0x1c0] sm:$0xff]  }
 0x47b   :  { %v3674_v0 = vpop.f32.mrf.mxu0 }
 0x47c   :  { %v3675_v28 = vadd.f32 %v3674_v0, %v3634_v34  ;;  %v5884_v0 = vld [vmem:[#allocation9 + $0x180] sm:$0xff]  }
 0x47d   :  { %v3676_v36 = vpop.f32.mrf.mxu0  ;;  %v3713_v8 = vpop.f32.mrf.mxu1 }
 0x47e   :  { %v3714_v40 = vadd.f32 %v3713_v8, %v3673_v13 }
 0x47f   :  { %v3677_v11 = vpop.f32.mrf.mxu0  ;;  %v3715_v31 = vpop.f32.mrf.mxu1 }
 0x480   :  { %v3722_v59 = vmul.f32 0.01, %v3714_v40  ;;  %v3716_v55 = vadd.f32 %v3715_v31, %v3675_v28 }
 0x481   :  { %v3717_v42 = vpop.f32.mrf.mxu1 }
 0x482   :  { %v3726_v45 = vmax.f32 %v3714_v40, %v3722_v59  ;;  %v3723_v48 = vmul.f32 0.01, %v3716_v55  ;;  %v5042_v42 = vld [vmem:[#allocation10] ss:$0 sm:$0xff] }
 0x483   :  { %v3718_v50 = vpop.f32.mrf.mxu1 }
 0x484   :  { %v3728_v25 = vmax.f32 %v3724_v52, %v3726_v45  ;;  %v3727_v47 = vmax.f32 %v3716_v55, %v3723_v48 }
 0x486   :  { %v6977_v2 = vmax.f32 %v6850_v61, %v3728_v25  ;;  %v3729_v37 = vmax.f32 %v3725_v35, %v3727_v47 }
 0x488   :  { %v3731_v44 = vmax.f32 %v6852_v62, %v3729_v37  ;;  %v3734_v53 = vrot.slane %v6977_v2, 2  ;;  %v3746_v58 = vpack.c.bf16 %v6977_v2, %v6977_v2  ;;  %v5858_v62 = vld [vmem:[#allocation9 + $0x130] sm:$0xff]   ;;  %v3738_v30 = vrot.slane %v6977_v2, 4 }
 0x489   :  { %v3742_v34 = vrot.slane %v6977_v2, 6 }
 0x48a   :  { %v3747_v41 = vpack.c.bf16 %v3731_v44, %v3731_v44  ;;  %v3735_v33 = vrot.slane %v3731_v44, 2  ;;  %v3739_v32 = vrot.slane %v3731_v44, 4  ;;  %v3743_v56 = vrot.slane %v3731_v44, 6 }
 0x48b   :  { %v3748_v61 = vpack.c.bf16 %v3734_v53, %v3734_v53  ;;  %v3750_v13 = vpack.c.bf16 %v3738_v30, %v3738_v30  ;;  %v3752_v36 = vpack.c.bf16 %v3742_v34, %v3742_v34 }
 0x48c   :  { %4305 = vmatprep.mubr.bf16.mxu0 %v3747_v41  ;;  %v3749_v21 = vpack.c.bf16 %v3735_v33, %v3735_v33  ;;  %v3751_v1 = vpack.c.bf16 %v3739_v32, %v3739_v32  ;;  %v3753_v19 = vpack.c.bf16 %v3743_v56, %v3743_v56 }
 0x48d   :  { %4306 = vmatmul.mubr.bf16.vlgmr.msra.gmra.mxu0 %v3746_v58 }
 0x48e   :  { %5152 = vmatpush3.bf16.msra.mxu0 %v5854_v60  ;;  %4345 = vmatprep.mubr.bf16.mxu1 %v3749_v21 }
 0x48f   :  { %4385 = vmatprep.mubr.bf16.mxu0 %v3751_v1  ;;  %4346 = vmatmul.mubr.bf16.vlgmr.msra.gmra.mxu1 %v3748_v61 }
 0x490   :  { %5174 = vmatpush3.bf16.msra.mxu1 %v5856_v39  ;;  %5153 = vmatprep.subr.bf16.mxu0 %v5857_v46 }
 0x491   :  { %4425 = vmatprep.mubr.bf16.mxu1 %v3753_v19  ;;  %5175 = vmatprep.subr.bf16.mxu1 %v5859_v63 }
 0x492   :  { %5154 = vmatpush3.bf16.msra.mxu0 %v5858_v62 }
 0x493   :  { %5155 = vmatprep.subr.bf16.mxu0 %v5861_v23 }
 0x494   :  { %5176 = vmatpush3.bf16.msra.mxu1 %v5860_v38 }
 0x495   :  { %5177 = vmatprep.subr.bf16.mxu1 %v5863_v4 }
 0x496   :  { %5156 = vmatpush3.bf16.msra.mxu0 %v5862_v5 }
 0x497   :  { %5157 = vmatprep.subr.bf16.mxu0 %v5865_v51 }
 0x498   :  { %5178 = vmatpush3.bf16.msra.mxu1 %v5864_v6 }
 0x499   :  { %5179 = vmatprep.subr.bf16.mxu1 %v5867_v7 }
 0x49a   :  { %5158 = vmatpush3.bf16.msra.mxu0 %v5866_v57 }
 0x49b   :  { %5159 = vmatprep.subr.bf16.mxu0 %v5869_v15 }
 0x49c   :  { %5180 = vmatpush3.bf16.msra.mxu1 %v5868_v9 }
 0x49d   :  { %5181 = vmatprep.subr.bf16.mxu1 %v5871_v10 }
 0x49e   :  { %5160 = vmatpush3.bf16.msra.mxu0 %v5870_v26 }
 0x49f   :  { %5161 = vmatprep.subr.bf16.mxu0 %v5873_v49 }
 0x4a0   :  { %5182 = vmatpush3.bf16.msra.mxu1 %v5872_v12 }
 0x4a1   :  { %5183 = vmatprep.subr.bf16.mxu1 %v5875_v14 }
 0x4a2   :  { %5162 = vmatpush3.bf16.msra.mxu0 %v5874_v16 }
 0x4a3   :  { %5163 = vmatprep.subr.bf16.mxu0 %v5877_v54 }
 0x4a4   :  { %5184 = vmatpush3.bf16.msra.mxu1 %v5876_v17 }
 0x4a5   :  { %5185 = vmatprep.subr.bf16.mxu1 %v5879_v18 }
 0x4a6   :  { %5164 = vmatpush3.bf16.msra.mxu0 %v5878_v20 }
 0x4a7   :  { %5165 = vmatprep.subr.bf16.mxu0 %v5881_v22 }
 0x4a8   :  { %5186 = vmatpush3.bf16.msra.mxu1 %v5880_v24 }
 0x4a9   :  { %5187 = vmatprep.subr.bf16.mxu1 %v5883_v27 }
 0x4aa   :  { %5166 = vmatpush3.bf16.msra.mxu0 %v5882_v29 }
 0x4ac   :  { %5188 = vmatpush3.bf16.msra.mxu1 %v5884_v0 }
 0x4ad   :  { %4386 = vmatmul.mubr.bf16.vlgmr.msra.gmra.mxu0 %v3750_v13 }
 0x4af   :  { %4426 = vmatmul.mubr.bf16.vlgmr.msra.gmra.mxu1 %v3752_v36 }
 0x54d   :  { %v5123_v8 = vpop.f32.mrf.mxu0 }
 0x54f   :  { %v5124_v3 = vpop.f32.mrf.mxu0  ;;  %v5145_v28 = vpop.f32.mrf.mxu1 }
 0x550   :  { %v5125_v55 = vadd.f32 %v5124_v3, %v5123_v8 }
 0x551   :  { %v5126_v40 = vpop.f32.mrf.mxu0  ;;  %v5146_v11 = vpop.f32.mrf.mxu1 }
 0x552   :  { %v4308_v52 = vadd.f32 %v5125_v55, %v5042_v42  ;;  %v5147_v45 = vadd.f32 %v5146_v11, %v5145_v28 }
 0x553   :  { %v5127_v31 = vpop.f32.mrf.mxu0  ;;  %v5148_v43 = vpop.f32.mrf.mxu1 }
 0x554   :  { %v4348_v25 = vadd.f32 %v5147_v45, %v4308_v52 }
 0x555   :  { %v5149_v59 = vpop.f32.mrf.mxu1 }
 0x56d   :  { %v5167_v48 = vpop.f32.mrf.mxu0 }
 0x56f   :  { %v5168_v50 = vpop.f32.mrf.mxu0  ;;  %v5189_v35 = vpop.f32.mrf.mxu1 }
 0x570   :  { %v5169_v47 = vadd.f32 %v5168_v50, %v5167_v48 }
 0x571   :  { %v5170_v2 = vpop.f32.mrf.mxu0  ;;  %v5190_v37 = vpop.f32.mrf.mxu1 }
 0x572   :  { %v4388_v44 = vadd.f32 %v5169_v47, %v4348_v25  ;;  %v5191_v53 = vadd.f32 %v5190_v37, %v5189_v35 }
 0x573   :  { %v5171_v41 = vpop.f32.mrf.mxu0  ;;  %v5192_v60 = vpop.f32.mrf.mxu1 }
 0x574   :  { %v6985_v33 = vadd.f32 %v5191_v53, %v4388_v44 }
 0x575   :  { %v5193_v32 = vpop.f32.mrf.mxu1 }
 0x576   :  { %v4485_v58 = vsel %vm4484_vm6, %v6985_v33, -inf  ;;  %v4452_v56 = vsel %vm4451_vm7, %v6985_v33, -inf  ;;  %v4469_v21 = vsel %vm4468_vm8, %v6985_v33, -inf  ;;  %v4433_v51 = vmul.f32 %v6985_v33, %v6985_v33 }
 0x577   :  { %4486 = vmax.xlane.f32.xlu1 %v4485_v58  ;;  %4453 = vmax.xlane.f32.xlu0 %v4452_v56 }
 0x57b   :  { %4470 = vmax.xlane.f32.xlu0 %v4469_v21 }
 0x588   :  { %4441 = vrot.lane.b32.xlu1 %v6985_v33, %s6266_s0 }
 0x600   :  { %v4454_v1 = vpop.xlane.xlu0 %4453  ;;  %v4487_v46 = vpop.xlane.xlu1 %4486 }
 0x601   :  { %v4455_v39 = vsub.f32 %v6985_v33, %v4454_v1  ;;  %v4488_v62 = vsub.f32 %v6985_v33, %v4487_v46 }
 0x603   :  { %v4456_v61 = vmul.f32 1.442695, %v4455_v39  ;;  %v4489_v38 = vmul.f32 1.442695, %v4488_v62 }
 0x604   :  { %v4471_v63 = vpop.xlane.xlu0 %4470  ;;  %v4442_v7 = vpop.permute.xlu1 %4441 }
 0x605   :  { %v4472_v19 = vsub.f32 %v6985_v33, %v4471_v63  ;;  %5885 = vpow2.f32 %v4456_v61  ;;  %v4444_v57 = vmul.f32 %v4442_v7, %v6985_v33 }
 0x607   :  { %v4473_v23 = vmul.f32 1.442695, %v4472_v19 }
 0x609   :  { %5887 = vpow2.f32 %v4473_v23 }
 0x60a   :  { %5889 = vpow2.f32 %v4489_v38 }
 0x612   :  { %v5886_v4 = vpop.eup %5885 }
 0x613   :  { %4459 = vrot.lane.b32.xlu0 %v5886_v4, %s6267_s18 }
 0x616   :  { %v5888_v5 = vpop.eup %5887 }
 0x617   :  { %4476 = vrot.lane.b32.xlu1 %v5888_v5, %s6268_s4  ;;  %4435 = vrot.lane.b32.xlu0 %v4433_v51, %s6269_s19  ;;  %v5890_v6 = vpop.eup %5889 }
 0x61b   :  { %4492 = vrot.lane.b32.xlu1 %v5890_v6, %s6270_s20 }
 0x61f   :  { %4446 = vrot.lane.b32.xlu1 %v4444_v57, %s6269_s19 }
 0x685   :  { %v4460_v15 = vpop.permute.xlu0 %4459 }
 0x686   :  { %v4463_v9 = vsel %vm4462_vm9, %v4460_v15, 0.0 }
 0x687   :  { %4464 = vadd.xlane.f32.xlu1 %v4463_v9 }
 0x689   :  { %v4477_v10 = vpop.permute.xlu1 %4476  ;;  %v4436_v54 = vpop.permute.xlu0 %4435 }
 0x68a   :  { %v4479_v26 = vsel %vm4462_vm9, %v4477_v10, 0.0  ;;  %v4438_v17 = vadd.f32 %v4436_v54, %v4433_v51 }
 0x68b   :  { %4480 = vadd.xlane.f32.xlu0 %v4479_v26 }
 0x68c   :  { %v4439_v20 = vmul.f32 0.5, %v4438_v17 }
 0x68d   :  { %v4493_v49 = vpop.permute.xlu1 %4492 }
 0x68e   :  { %v4495_v12 = vsel %vm4462_vm9, %v4493_v49, 0.0  ;;  %v4512_v0 = vsel %vm4511_vm10, %v6985_v33, %v4439_v20 }
 0x68f   :  { %4496 = vadd.xlane.f32.xlu0 %v4495_v12 }
 0x691   :  { %v4447_v14 = vpop.permute.xlu1 %4446 }
 0x692   :  { %v4449_v16 = vadd.f32 %v4447_v14, %v4444_v57 }
 0x694   :  { %v4450_v18 = vmul.f32 0.5, %v4449_v16 }
 0x698   :  { %4504 = vrot.lane.b32.xlu1 %v4450_v18, %s6271_s21 }
 0x69c   :  { %4508 = vrot.lane.b32.xlu1 %v4439_v20, %s6271_s21 }
 0x6a5   :  { %4501 = vrot.lane.b32.xlu0 %v4450_v18, %s6272_s22 }
 0x710   :  { %v4465_v22 = vpop.xlane.xlu1 %4464 }
 0x711   :  { %5891 = vrcp.f32 %v4465_v22 }
 0x714   :  { %v4481_v24 = vpop.xlane.xlu0 %4480  ;;  %v4505_v30 = vpop.permute.xlu1 %4504 }
 0x715   :  { %5893 = vrcp.f32 %v4481_v24 }
 0x718   :  { %v4497_v27 = vpop.xlane.xlu0 %4496  ;;  %v4509_v3 = vpop.permute.xlu1 %4508 }
 0x719   :  { %5895 = vrcp.f32 %v4497_v27 }
 0x71c   :  { %v4502_v29 = vpop.permute.xlu0 %4501 }
 0x71d   :  { %v4514_v34 = vsel %vm4513_vm11, %v4512_v0, %v4502_v29 }
 0x71e   :  { %v5892_v13 = vpop.eup %5891  ;;  %v4516_v36 = vsel %vm4515_vm12, %v4514_v34, %v4505_v30 }
 0x71f   :  { %v4467_v28 = vmul.f32 %v5892_v13, %v5886_v4  ;;  %v4518_v11 = vsel %vm4517_vm13, %v4516_v36, %v4509_v3 }
 0x721   :  { %v4520_v59 = vsel %vm4519_vm14, %v4518_v11, %v4467_v28 }
 0x722   :  { %v5894_v8 = vpop.eup %5893 }
 0x723   :  { %v4483_v40 = vmul.f32 %v5894_v8, %v5888_v5 }
 0x725   :  { %v4522_v55 = vsel %vm4521_vm15, %v4520_v59, %v4483_v40 }
 0x726   :  { %v5896_v31 = vpop.eup %5895 }
 0x727   :  { %v4499_v43 = vmul.f32 %v5896_v31, %v5890_v6 }
 0x729   :  { %v4524_v42 = vsel %vm4523_vm0, %v4522_v55, %v4499_v43 }
 0x72a   :  { %v4526_v52 = vsel %vm4525_vm1, %v4524_v42, 0.0 }
 0x72b   :  { %4527 = vst [vmem:[%s7008_s7] sm:$0x3] %v4526_v52 }
 0x72c   :  { %4532 = vsyncpa [#allocation3], 1 }
 0x72d   :  { %4533 = vsyncpa [#allocation5], 1 }
 0x72e   :  { %4534 = vsyncpa [#allocation8], 1 }
 0x72f   :  { %4535 = vsyncpa [#allocation11], 1 }

</bundles_post_ra>
